<compile_context>
chip_gen: v7x
topology: tpu7x:2x2x1
jax: 0.10.0
libtpu: 0.0.40
codegen_flags: <defaults>
</compile_context>

<pallas_src>
import functools

import jax
import jax.numpy as jnp
from jax.experimental import pallas as pl
from jax.experimental.pallas import tpu as pltpu

LAYER_DIMS = [28 * 28, 256, 128, 64, 32, 16, 8, 16, 32, 64, 128, 256, 28 * 28]
N_LAYERS = len(LAYER_DIMS) - 1                 # 12
LATENT_LAYER = 5                               # enfc6 (0-based) -> latent z
LATENT_DIM = LAYER_DIMS[LATENT_LAYER + 1]      # 8
D_IN = LAYER_DIMS[0]                           # 784
MID_DIM = 256                                  # max fan_in / fan_out of layers 1..10
BIAS_SLAB_W = 896                              # 7*128 >= widest bias (784)


def _round_up(x, m):
    return ((x + m - 1) // m) * m


# ----------------------------------------------------------------------------
# Kernel: whole 12-layer forward pass for one batch tile.  All parameters are
# VMEM-resident (single-buffered replicated blocks), so every matmul runs on
# the MXU inside this single fused kernel.
# ----------------------------------------------------------------------------
def _dae_kernel(x_ref, w_first_ref, w_mid_ref, w_last_ref, b_ref, z_ref, dec_ref):
    h = x_ref[...].astype(jnp.bfloat16)                       # (tile, 784) bf16
    for li in range(N_LAYERS):
        n_in, n_out = LAYER_DIMS[li], LAYER_DIMS[li + 1]
        if li == 0:
            w = w_first_ref[...]                              # (784, 256) bf16
        elif li == N_LAYERS - 1:
            w = w_last_ref[...]                               # (256, 784) bf16
        else:
            w = w_mid_ref[li - 1, 0:n_in, 0:n_out]            # packed mid-layer slab
        b = b_ref[li:li + 1, 0:n_out]                         # (1, n_out) f32
        y = jnp.dot(h, w, preferred_element_type=jnp.float32) + b
        if li == N_LAYERS - 1:
            # Exact sigmoid via one EUP tanh + cheap fma (instead of exp +
            # reciprocal) on the widest layer.
            dec_ref[...] = (0.5 * jnp.tanh(0.5 * y) + 0.5).astype(dec_ref.dtype)
        else:
            a = jnp.maximum(y, 0.0)                           # ReLU in f32
            if li == LATENT_LAYER:
                z_ref[...] = a                                # latent z (tile, 8) f32
            h = a.astype(jnp.bfloat16)                        # bf16 operand for next MXU matmul


# ----------------------------------------------------------------------------
# One-time parameter packing (do this OFF the hot path).
# ----------------------------------------------------------------------------
def pack_params(weights, biases):
    """Pack 12 (W, b) pairs into 4 arrays -> 4 replicated DMAs instead of 24.

    Returns (w_first, w_mid, w_last, b_slab):
      w_first : (784, 256)       bf16
      w_mid   : (10, 256, 256)   bf16, layer li at [li-1, :fan_in, :fan_out]
      w_last  : (256, 784)       bf16
      b_slab  : (12, 896)        f32,  bias of layer li in row li, lanes [0, fan_out)
    """
    w_first = jnp.asarray(weights[0], jnp.float32).astype(jnp.bfloat16)
    w_last = jnp.asarray(weights[N_LAYERS - 1], jnp.float32).astype(jnp.bfloat16)
    w_mid = jnp.zeros((N_LAYERS - 2, MID_DIM, MID_DIM), jnp.bfloat16)
    for li in range(1, N_LAYERS - 1):
        w = jnp.asarray(weights[li], jnp.float32).astype(jnp.bfloat16)
        w_mid = w_mid.at[li - 1, :w.shape[0], :w.shape[1]].set(w)
    b_slab = jnp.zeros((N_LAYERS, BIAS_SLAB_W), jnp.float32)
    for li in range(N_LAYERS):
        b = jnp.reshape(jnp.asarray(biases[li], jnp.float32), (-1,))
        b_slab = b_slab.at[li, :b.shape[0]].set(b)
    return w_first, w_mid, w_last, b_slab


# ----------------------------------------------------------------------------
# Tiling policy.
# ----------------------------------------------------------------------------
def _tensorcores_per_device():
    """TensorCores addressable by one kernel launch (megacore v4/v5p, v7x -> 2)."""
    try:
        kind = jax.devices()[0].device_kind.lower()
    except Exception:
        return 1
    for tag in ("v4", "v5p", "v7"):
        if tag in kind:
            return 2
    return 1


def _pick_tile_b(batch, requested, num_cores):
    b8 = _round_up(batch, 8)
    tile = min(requested, b8)                  # single big step on 1-TC chips (v5e/v6e)
    if num_cores > 1 and b8 > 2 * 256:
        # 2-TC devices: aim for >= 2 grid steps per core so the input DMA and
        # the decoded writeback pipeline, but never shrink M below 256 (MXU
        # fill/drain amortization for the 12 serialized small-N matmuls).
        per_step = _round_up(pl.cdiv(b8, 2 * num_cores), 8)
        tile = min(tile, max(256, per_step))
    return max(8, (tile // 8) * 8)


# ----------------------------------------------------------------------------
# Wrapper.
# ----------------------------------------------------------------------------
def dae_forward(x, packed_params, *, tile_b=1024, num_cores=None):
    """Denoising-autoencoder forward pass as one fused Pallas TPU kernel.

    x:              (B, 784) float32 or bfloat16.
    packed_params:  result of pack_params(weights, biases).
    Returns (z, decoded): z (B, 8) float32, decoded (B, 784) bfloat16.
    """
    w_first, w_mid, w_last, b_slab = packed_params
    B, D = x.shape
    assert D == D_IN
    if num_cores is None:
        num_cores = _tensorcores_per_device()
    tile = _pick_tile_b(B, tile_b, num_cores)
    grid_b = pl.cdiv(B, tile)
    b_pad = grid_b * tile

    # Only pad the batch if it is not a tile multiple (no-op in the common case).
    x_in = x if b_pad == B else jnp.pad(x, ((0, b_pad - B), (0, 0)))

    def _rep2(shape):
        # Constant block index -> never re-fetched; single-buffer to save VMEM.
        return pl.BlockSpec(shape, lambda i: (0, 0), pipeline_mode=pl.Buffered(1))

    def _rep3(shape):
        return pl.BlockSpec(shape, lambda i: (0, 0, 0), pipeline_mode=pl.Buffered(1))

    in_specs = [
        pl.BlockSpec((tile, D_IN), lambda i: (i, 0)),
        _rep2(w_first.shape),
        _rep3(w_mid.shape),
        _rep2(w_last.shape),
        _rep2(b_slab.shape),
    ]
    out_specs = (
        pl.BlockSpec((tile, LATENT_DIM), lambda i: (i, 0)),      # z
        pl.BlockSpec((tile, D_IN), lambda i: (i, 0)),            # decoded (784-wide)
    )
    out_shape = (
        jax.ShapeDtypeStruct((b_pad, LATENT_DIM), jnp.float32),
        jax.ShapeDtypeStruct((b_pad, D_IN), jnp.bfloat16),       # bf16 halves HBM writeback
    )

    flops = 2 * b_pad * sum(LAYER_DIMS[i] * LAYER_DIMS[i + 1] for i in range(N_LAYERS))
    bytes_accessed = (x_in.size * x_in.dtype.itemsize
                      + (w_first.size + w_mid.size + w_last.size) * 2
                      + b_slab.size * 4
                      + b_pad * LATENT_DIM * 4
                      + b_pad * D_IN * 2)
    cost = pl.CostEstimate(flops=int(flops),
                           transcendentals=int(b_pad * D_IN),    # one tanh per output elem
                           bytes_accessed=int(bytes_accessed))

    # Live VMEM: double-buffered x / z / decoded blocks, single-buffered params,
    # plus headroom for the widest intermediate activations.
    vmem_est = (2 * tile * D_IN * x_in.dtype.itemsize
                + 2 * tile * D_IN * 2
                + 2 * tile * LATENT_DIM * 4
                + (w_first.size + w_mid.size + w_last.size) * 2
                + b_slab.size * 4
                + 4 * tile * 256 * 4)
    vmem_limit = int(min(48 * 1024 * 1024, max(24 * 1024 * 1024, 2 * vmem_est)))

    z, dec = pl.pallas_call(
        _dae_kernel,
        grid=(grid_b,),
        in_specs=in_specs,
        out_specs=out_specs,
        out_shape=out_shape,
        compiler_params=pltpu.CompilerParams(
            dimension_semantics=("parallel",),
            vmem_limit_bytes=vmem_limit,
        ),
        cost_estimate=cost,
    )(x_in, w_first, w_mid, w_last, b_slab)

    if b_pad != B:
        z, dec = z[:B], dec[:B]
    return z, dec


# ----------------------------------------------------------------------------
# Reference + demo.
# ----------------------------------------------------------------------------
def init_params(key):
    """Deterministic PyTorch-style init: U(-1/sqrt(fan_in), +1/sqrt(fan_in))."""
    weights, biases = [], []
    for li in range(N_LAYERS):
        fan_in, fan_out = LAYER_DIMS[li], LAYER_DIMS[li + 1]
        key, kw, kb = jax.random.split(key, 3)
        bound = 1.0 / float(fan_in) ** 0.5
        weights.append(jax.random.uniform(kw, (fan_in, fan_out), jnp.float32,
                                          -bound, bound))
        biases.append(jax.random.uniform(kb, (fan_out,), jnp.float32,
                                         -bound, bound))
    return weights, biases


def dae_forward_ref(x, weights, biases, *, bf16_matmul=False):
    """Pure-JAX reference.  bf16_matmul=True mirrors the kernel's quantization
    (bf16 MXU operands, f32 accumulation)."""
    h = x
    z = None
    for li in range(N_LAYERS):
        w, b = weights[li], biases[li]
        if bf16_matmul:
            y = jnp.dot(h.astype(jnp.bfloat16), w.astype(jnp.bfloat16),
                        preferred_element_type=jnp.float32) + b
        else:
            y = h @ w + b
        if li == N_LAYERS - 1:
            h = jax.nn.sigmoid(y)
        else:
            h = jax.nn.relu(y)
            if li == LATENT_LAYER:
                z = h
    return z, h


if __name__ == "__main__":
    key = jax.random.PRNGKey(0)
    key, kx = jax.random.split(key)

    B = 128
    x = jax.random.uniform(kx, (B, D_IN), jnp.float32)        # pixel-like input in [0, 1)
    weights, biases = init_params(key)

    packed = pack_params(weights, biases)                      # one-time, off hot path
    run = jax.jit(functools.partial(dae_forward, tile_b=1024))
    z, decoded = run(x, packed)
    jax.block_until_ready((z, decoded))

    assert z.shape == (B, LATENT_DIM) and decoded.shape == (B, D_IN)

    dec_f32 = decoded.astype(jnp.float32)

    # Tight check against a reference using the same bf16-operand / f32-acc math.
    z_q, dec_q = dae_forward_ref(x, weights, biases, bf16_matmul=True)
    assert jnp.allclose(z, z_q, atol=5e-3, rtol=5e-3)
    assert jnp.allclose(dec_f32, dec_q, atol=1e-2, rtol=1e-2)

    # Looser sanity check against the pure-f32 reference (bf16 quantization noise).
    z_f, dec_f = dae_forward_ref(x, weights, biases)
    assert jnp.allclose(z, z_f, atol=5e-2, rtol=5e-2)
    assert jnp.allclose(dec_f32, dec_f, atol=5e-2, rtol=5e-2)

    print("KERNEL_OK")
</pallas_src>

<mosaic_0001>
module attributes {stable_mosaic.version = 11 : i64} {
  func.func @_dae_kernel(%arg0: i32, %arg1: memref<128x784xf32, #tpu.memory_space<vmem>>, %arg2: memref<784x256xbf16, #tpu.memory_space<vmem>>, %arg3: memref<10x256x256xbf16, #tpu.memory_space<vmem>>, %arg4: memref<256x784xbf16, #tpu.memory_space<vmem>>, %arg5: memref<12x896xf32, #tpu.memory_space<vmem>>, %arg6: memref<128x8xf32, #tpu.memory_space<vmem>>, %arg7: memref<128x784xbf16, #tpu.memory_space<vmem>>) attributes {dimension_semantics = [#tpu.dimension_semantics<parallel>], iteration_bounds = array<i64: 1>, scalar_prefetch = 0 : i64, scratch_operands = 0 : i64, tpu.core_type = #tpu.core_type<tc>, window_params = [{transform_indices = @transform_0, window_bounds = array<i64: 128, 784>}, {pipeline_mode = #tpu.pipeline_mode<synchronous>, transform_indices = @transform_1, window_bounds = array<i64: 784, 256>}, {pipeline_mode = #tpu.pipeline_mode<synchronous>, transform_indices = @transform_2, window_bounds = array<i64: 10, 256, 256>}, {pipeline_mode = #tpu.pipeline_mode<synchronous>, transform_indices = @transform_3, window_bounds = array<i64: 256, 784>}, {pipeline_mode = #tpu.pipeline_mode<synchronous>, transform_indices = @transform_4, window_bounds = array<i64: 12, 896>}, {transform_indices = @transform_5, window_bounds = array<i64: 128, 8>}, {transform_indices = @transform_6, window_bounds = array<i64: 128, 784>}]} {
    %c0 = arith.constant 0 : index
    %c0_0 = arith.constant 0 : index
    %0 = vector.load %arg1[%c0, %c0_0] : memref<128x784xf32, #tpu.memory_space<vmem>>, vector<128x784xf32>
    %1 = arith.truncf %0 : vector<128x784xf32> to vector<128x784xbf16>
    %c0_1 = arith.constant 0 : index
    %c0_2 = arith.constant 0 : index
    %2 = vector.load %arg2[%c0_1, %c0_2] : memref<784x256xbf16, #tpu.memory_space<vmem>>, vector<784x256xbf16>
    %c0_3 = arith.constant 0 : index
    %c0_4 = arith.constant 0 : index
    %3 = vector.load %arg5[%c0_3, %c0_4] : memref<12x896xf32, #tpu.memory_space<vmem>>, vector<1x256xf32>
    %cst = arith.constant dense<0.000000e+00> : vector<128x256xf32>
    %4 = tpu.matmul %1, %2, %cst {dimension_numbers = #tpu.dot_dimension_numbers<[1], [0], [0], [1], [0, 0, 1, 1], [], []>} : vector<128x784xbf16>, vector<784x256xbf16>, vector<128x256xf32> -> vector<128x256xf32>
    %5 = vector.broadcast %3 : vector<1x256xf32> to vector<128x256xf32>
    %6 = arith.addf %4, %5 : vector<128x256xf32>
    %cst_5 = arith.constant 0.000000e+00 : f32
    %7 = vector.broadcast %cst_5 : f32 to vector<128x256xf32>
    %8 = arith.maximumf %6, %7 : vector<128x256xf32>
    %9 = arith.truncf %8 : vector<128x256xf32> to vector<128x256xbf16>
    %c0_6 = arith.constant 0 : index
    %c0_7 = arith.constant 0 : index
    %c0_8 = arith.constant 0 : index
    %10 = vector.load %arg3[%c0_6, %c0_7, %c0_8] : memref<10x256x256xbf16, #tpu.memory_space<vmem>>, vector<1x256x128xbf16>
    %11 = vector.shape_cast %10 : vector<1x256x128xbf16> to vector<256x128xbf16>
    %c1 = arith.constant 1 : index
    %c0_9 = arith.constant 0 : index
    %12 = vector.load %arg5[%c1, %c0_9] : memref<12x896xf32, #tpu.memory_space<vmem>>, vector<1x128xf32>
    %cst_10 = arith.constant dense<0.000000e+00> : vector<128x128xf32>
    %13 = tpu.matmul %9, %11, %cst_10 {dimension_numbers = #tpu.dot_dimension_numbers<[1], [0], [0], [1], [0, 0, 1, 1], [], []>} : vector<128x256xbf16>, vector<256x128xbf16>, vector<128x128xf32> -> vector<128x128xf32>
    %14 = vector.broadcast %12 : vector<1x128xf32> to vector<128x128xf32>
    %15 = arith.addf %13, %14 : vector<128x128xf32>
    %cst_11 = arith.constant 0.000000e+00 : f32
    %16 = vector.broadcast %cst_11 : f32 to vector<128x128xf32>
    %17 = arith.maximumf %15, %16 : vector<128x128xf32>
    %18 = arith.truncf %17 : vector<128x128xf32> to vector<128x128xbf16>
    %c1_12 = arith.constant 1 : index
    %c0_13 = arith.constant 0 : index
    %c0_14 = arith.constant 0 : index
    %19 = vector.load %arg3[%c1_12, %c0_13, %c0_14] : memref<10x256x256xbf16, #tpu.memory_space<vmem>>, vector<1x128x64xbf16>
    %20 = vector.shape_cast %19 : vector<1x128x64xbf16> to vector<128x64xbf16>
    %c2 = arith.constant 2 : index
    %c0_15 = arith.constant 0 : index
    %21 = vector.load %arg5[%c2, %c0_15] : memref<12x896xf32, #tpu.memory_space<vmem>>, vector<1x64xf32>
    %cst_16 = arith.constant dense<0.000000e+00> : vector<128x64xf32>
    %22 = tpu.matmul %18, %20, %cst_16 {dimension_numbers = #tpu.dot_dimension_numbers<[1], [0], [0], [1], [0, 0, 1, 1], [], []>} : vector<128x128xbf16>, vector<128x64xbf16>, vector<128x64xf32> -> vector<128x64xf32>
    %23 = vector.broadcast %21 : vector<1x64xf32> to vector<128x64xf32>
    %24 = arith.addf %22, %23 : vector<128x64xf32>
    %cst_17 = arith.constant 0.000000e+00 : f32
    %25 = vector.broadcast %cst_17 : f32 to vector<128x64xf32>
    %26 = arith.maximumf %24, %25 : vector<128x64xf32>
    %27 = arith.truncf %26 : vector<128x64xf32> to vector<128x64xbf16>
    %c2_18 = arith.constant 2 : index
    %c0_19 = arith.constant 0 : index
    %c0_20 = arith.constant 0 : index
    %28 = vector.load %arg3[%c2_18, %c0_19, %c0_20] : memref<10x256x256xbf16, #tpu.memory_space<vmem>>, vector<1x64x32xbf16>
    %29 = vector.shape_cast %28 : vector<1x64x32xbf16> to vector<64x32xbf16>
    %c3 = arith.constant 3 : index
    %c0_21 = arith.constant 0 : index
    %30 = vector.load %arg5[%c3, %c0_21] : memref<12x896xf32, #tpu.memory_space<vmem>>, vector<1x32xf32>
    %cst_22 = arith.constant dense<0.000000e+00> : vector<128x32xf32>
    %31 = tpu.matmul %27, %29, %cst_22 {dimension_numbers = #tpu.dot_dimension_numbers<[1], [0], [0], [1], [0, 0, 1, 1], [], []>} : vector<128x64xbf16>, vector<64x32xbf16>, vector<128x32xf32> -> vector<128x32xf32>
    %32 = vector.broadcast %30 : vector<1x32xf32> to vector<128x32xf32>
    %33 = arith.addf %31, %32 : vector<128x32xf32>
    %cst_23 = arith.constant 0.000000e+00 : f32
    %34 = vector.broadcast %cst_23 : f32 to vector<128x32xf32>
    %35 = arith.maximumf %33, %34 : vector<128x32xf32>
    %36 = arith.truncf %35 : vector<128x32xf32> to vector<128x32xbf16>
    %c3_24 = arith.constant 3 : index
    %c0_25 = arith.constant 0 : index
    %c0_26 = arith.constant 0 : index
    %37 = vector.load %arg3[%c3_24, %c0_25, %c0_26] : memref<10x256x256xbf16, #tpu.memory_space<vmem>>, vector<1x32x16xbf16>
    %38 = vector.shape_cast %37 : vector<1x32x16xbf16> to vector<32x16xbf16>
    %c4 = arith.constant 4 : index
    %c0_27 = arith.constant 0 : index
    %39 = vector.load %arg5[%c4, %c0_27] : memref<12x896xf32, #tpu.memory_space<vmem>>, vector<1x16xf32>
    %cst_28 = arith.constant dense<0.000000e+00> : vector<128x16xf32>
    %40 = tpu.matmul %36, %38, %cst_28 {dimension_numbers = #tpu.dot_dimension_numbers<[1], [0], [0], [1], [0, 0, 1, 1], [], []>} : vector<128x32xbf16>, vector<32x16xbf16>, vector<128x16xf32> -> vector<128x16xf32>
    %41 = vector.broadcast %39 : vector<1x16xf32> to vector<128x16xf32>
    %42 = arith.addf %40, %41 : vector<128x16xf32>
    %cst_29 = arith.constant 0.000000e+00 : f32
    %43 = vector.broadcast %cst_29 : f32 to vector<128x16xf32>
    %44 = arith.maximumf %42, %43 : vector<128x16xf32>
    %45 = arith.truncf %44 : vector<128x16xf32> to vector<128x16xbf16>
    %c4_30 = arith.constant 4 : index
    %c0_31 = arith.constant 0 : index
    %c0_32 = arith.constant 0 : index
    %46 = vector.load %arg3[%c4_30, %c0_31, %c0_32] : memref<10x256x256xbf16, #tpu.memory_space<vmem>>, vector<1x16x8xbf16>
    %47 = vector.shape_cast %46 : vector<1x16x8xbf16> to vector<16x8xbf16>
    %c5 = arith.constant 5 : index
    %c0_33 = arith.constant 0 : index
    %48 = vector.load %arg5[%c5, %c0_33] : memref<12x896xf32, #tpu.memory_space<vmem>>, vector<1x8xf32>
    %cst_34 = arith.constant dense<0.000000e+00> : vector<128x8xf32>
    %49 = tpu.matmul %45, %47, %cst_34 {dimension_numbers = #tpu.dot_dimension_numbers<[1], [0], [0], [1], [0, 0, 1, 1], [], []>} : vector<128x16xbf16>, vector<16x8xbf16>, vector<128x8xf32> -> vector<128x8xf32>
    %50 = vector.broadcast %48 : vector<1x8xf32> to vector<128x8xf32>
    %51 = arith.addf %49, %50 : vector<128x8xf32>
    %cst_35 = arith.constant 0.000000e+00 : f32
    %52 = vector.broadcast %cst_35 : f32 to vector<128x8xf32>
    %53 = arith.maximumf %51, %52 : vector<128x8xf32>
    %c0_36 = arith.constant 0 : index
    %c0_37 = arith.constant 0 : index
    %54 = vector.load %arg6[%c0_36, %c0_37] : memref<128x8xf32, #tpu.memory_space<vmem>>, vector<128x8xf32>
    tpu.vector_store %arg6[%c0_36, %c0_37], %53 {strides = array<i32>} : memref<128x8xf32, #tpu.memory_space<vmem>>, vector<128x8xf32>,
    %55 = arith.truncf %53 : vector<128x8xf32> to vector<128x8xbf16>
    %c5_38 = arith.constant 5 : index
    %c0_39 = arith.constant 0 : index
    %c0_40 = arith.constant 0 : index
    %56 = vector.load %arg3[%c5_38, %c0_39, %c0_40] : memref<10x256x256xbf16, #tpu.memory_space<vmem>>, vector<1x8x16xbf16>
    %57 = vector.shape_cast %56 : vector<1x8x16xbf16> to vector<8x16xbf16>
    %c6 = arith.constant 6 : index
    %c0_41 = arith.constant 0 : index
    %58 = vector.load %arg5[%c6, %c0_41] : memref<12x896xf32, #tpu.memory_space<vmem>>, vector<1x16xf32>
    %cst_42 = arith.constant dense<0.000000e+00> : vector<128x16xf32>
    %59 = tpu.matmul %55, %57, %cst_42 {dimension_numbers = #tpu.dot_dimension_numbers<[1], [0], [0], [1], [0, 0, 1, 1], [], []>} : vector<128x8xbf16>, vector<8x16xbf16>, vector<128x16xf32> -> vector<128x16xf32>
    %60 = vector.broadcast %58 : vector<1x16xf32> to vector<128x16xf32>
    %61 = arith.addf %59, %60 : vector<128x16xf32>
    %cst_43 = arith.constant 0.000000e+00 : f32
    %62 = vector.broadcast %cst_43 : f32 to vector<128x16xf32>
    %63 = arith.maximumf %61, %62 : vector<128x16xf32>
    %64 = arith.truncf %63 : vector<128x16xf32> to vector<128x16xbf16>
    %c6_44 = arith.constant 6 : index
    %c0_45 = arith.constant 0 : index
    %c0_46 = arith.constant 0 : index
    %65 = vector.load %arg3[%c6_44, %c0_45, %c0_46] : memref<10x256x256xbf16, #tpu.memory_space<vmem>>, vector<1x16x32xbf16>
    %66 = vector.shape_cast %65 : vector<1x16x32xbf16> to vector<16x32xbf16>
    %c7 = arith.constant 7 : index
    %c0_47 = arith.constant 0 : index
    %67 = vector.load %arg5[%c7, %c0_47] : memref<12x896xf32, #tpu.memory_space<vmem>>, vector<1x32xf32>
    %cst_48 = arith.constant dense<0.000000e+00> : vector<128x32xf32>
    %68 = tpu.matmul %64, %66, %cst_48 {dimension_numbers = #tpu.dot_dimension_numbers<[1], [0], [0], [1], [0, 0, 1, 1], [], []>} : vector<128x16xbf16>, vector<16x32xbf16>, vector<128x32xf32> -> vector<128x32xf32>
    %69 = vector.broadcast %67 : vector<1x32xf32> to vector<128x32xf32>
    %70 = arith.addf %68, %69 : vector<128x32xf32>
    %cst_49 = arith.constant 0.000000e+00 : f32
    %71 = vector.broadcast %cst_49 : f32 to vector<128x32xf32>
    %72 = arith.maximumf %70, %71 : vector<128x32xf32>
    %73 = arith.truncf %72 : vector<128x32xf32> to vector<128x32xbf16>
    %c7_50 = arith.constant 7 : index
    %c0_51 = arith.constant 0 : index
    %c0_52 = arith.constant 0 : index
    %74 = vector.load %arg3[%c7_50, %c0_51, %c0_52] : memref<10x256x256xbf16, #tpu.memory_space<vmem>>, vector<1x32x64xbf16>
    %75 = vector.shape_cast %74 : vector<1x32x64xbf16> to vector<32x64xbf16>
    %c8 = arith.constant 8 : index
    %c0_53 = arith.constant 0 : index
    %76 = vector.load %arg5[%c8, %c0_53] : memref<12x896xf32, #tpu.memory_space<vmem>>, vector<1x64xf32>
    %cst_54 = arith.constant dense<0.000000e+00> : vector<128x64xf32>
    %77 = tpu.matmul %73, %75, %cst_54 {dimension_numbers = #tpu.dot_dimension_numbers<[1], [0], [0], [1], [0, 0, 1, 1], [], []>} : vector<128x32xbf16>, vector<32x64xbf16>, vector<128x64xf32> -> vector<128x64xf32>
    %78 = vector.broadcast %76 : vector<1x64xf32> to vector<128x64xf32>
    %79 = arith.addf %77, %78 : vector<128x64xf32>
    %cst_55 = arith.constant 0.000000e+00 : f32
    %80 = vector.broadcast %cst_55 : f32 to vector<128x64xf32>
    %81 = arith.maximumf %79, %80 : vector<128x64xf32>
    %82 = arith.truncf %81 : vector<128x64xf32> to vector<128x64xbf16>
    %c8_56 = arith.constant 8 : index
    %c0_57 = arith.constant 0 : index
    %c0_58 = arith.constant 0 : index
    %83 = vector.load %arg3[%c8_56, %c0_57, %c0_58] : memref<10x256x256xbf16, #tpu.memory_space<vmem>>, vector<1x64x128xbf16>
    %84 = vector.shape_cast %83 : vector<1x64x128xbf16> to vector<64x128xbf16>
    %c9 = arith.constant 9 : index
    %c0_59 = arith.constant 0 : index
    %85 = vector.load %arg5[%c9, %c0_59] : memref<12x896xf32, #tpu.memory_space<vmem>>, vector<1x128xf32>
    %cst_60 = arith.constant dense<0.000000e+00> : vector<128x128xf32>
    %86 = tpu.matmul %82, %84, %cst_60 {dimension_numbers = #tpu.dot_dimension_numbers<[1], [0], [0], [1], [0, 0, 1, 1], [], []>} : vector<128x64xbf16>, vector<64x128xbf16>, vector<128x128xf32> -> vector<128x128xf32>
    %87 = vector.broadcast %85 : vector<1x128xf32> to vector<128x128xf32>
    %88 = arith.addf %86, %87 : vector<128x128xf32>
    %cst_61 = arith.constant 0.000000e+00 : f32
    %89 = vector.broadcast %cst_61 : f32 to vector<128x128xf32>
    %90 = arith.maximumf %88, %89 : vector<128x128xf32>
    %91 = arith.truncf %90 : vector<128x128xf32> to vector<128x128xbf16>
    %c9_62 = arith.constant 9 : index
    %c0_63 = arith.constant 0 : index
    %c0_64 = arith.constant 0 : index
    %92 = vector.load %arg3[%c9_62, %c0_63, %c0_64] : memref<10x256x256xbf16, #tpu.memory_space<vmem>>, vector<1x128x256xbf16>
    %93 = vector.shape_cast %92 : vector<1x128x256xbf16> to vector<128x256xbf16>
    %c10 = arith.constant 10 : index
    %c0_65 = arith.constant 0 : index
    %94 = vector.load %arg5[%c10, %c0_65] : memref<12x896xf32, #tpu.memory_space<vmem>>, vector<1x256xf32>
    %cst_66 = arith.constant dense<0.000000e+00> : vector<128x256xf32>
    %95 = tpu.matmul %91, %93, %cst_66 {dimension_numbers = #tpu.dot_dimension_numbers<[1], [0], [0], [1], [0, 0, 1, 1], [], []>} : vector<128x128xbf16>, vector<128x256xbf16>, vector<128x256xf32> -> vector<128x256xf32>
    %96 = vector.broadcast %94 : vector<1x256xf32> to vector<128x256xf32>
    %97 = arith.addf %95, %96 : vector<128x256xf32>
    %cst_67 = arith.constant 0.000000e+00 : f32
    %98 = vector.broadcast %cst_67 : f32 to vector<128x256xf32>
    %99 = arith.maximumf %97, %98 : vector<128x256xf32>
    %100 = arith.truncf %99 : vector<128x256xf32> to vector<128x256xbf16>
    %c0_68 = arith.constant 0 : index
    %c0_69 = arith.constant 0 : index
    %101 = vector.load %arg4[%c0_68, %c0_69] : memref<256x784xbf16, #tpu.memory_space<vmem>>, vector<256x784xbf16>
    %c11 = arith.constant 11 : index
    %c0_70 = arith.constant 0 : index
    %102 = vector.load %arg5[%c11, %c0_70] : memref<12x896xf32, #tpu.memory_space<vmem>>, vector<1x784xf32>
    %cst_71 = arith.constant dense<0.000000e+00> : vector<128x784xf32>
    %103 = tpu.matmul %100, %101, %cst_71 {dimension_numbers = #tpu.dot_dimension_numbers<[1], [0], [0], [1], [0, 0, 1, 1], [], []>} : vector<128x256xbf16>, vector<256x784xbf16>, vector<128x784xf32> -> vector<128x784xf32>
    %104 = vector.broadcast %102 : vector<1x784xf32> to vector<128x784xf32>
    %105 = arith.addf %103, %104 : vector<128x784xf32>
    %cst_72 = arith.constant 5.000000e-01 : f32
    %106 = vector.broadcast %cst_72 : f32 to vector<128x784xf32>
    %107 = arith.mulf %106, %105 : vector<128x784xf32>
    %108 = math.tanh %107 : vector<128x784xf32>
    %cst_73 = arith.constant 5.000000e-01 : f32
    %109 = vector.broadcast %cst_73 : f32 to vector<128x784xf32>
    %110 = arith.mulf %109, %108 : vector<128x784xf32>
    %cst_74 = arith.constant 5.000000e-01 : f32
    %111 = vector.broadcast %cst_74 : f32 to vector<128x784xf32>
    %112 = arith.addf %110, %111 : vector<128x784xf32>
    %113 = arith.truncf %112 : vector<128x784xf32> to vector<128x784xbf16>
    %c0_75 = arith.constant 0 : index
    %c0_76 = arith.constant 0 : index
    %114 = vector.load %arg7[%c0_75, %c0_76] : memref<128x784xbf16, #tpu.memory_space<vmem>>, vector<128x784xbf16>
    tpu.vector_store %arg7[%c0_75, %c0_76], %113 {strides = array<i32>} : memref<128x784xbf16, #tpu.memory_space<vmem>>, vector<128x784xbf16>,
    return
  }
  func.func @transform_0(%arg0: i32) -> (i32, i32) {
    %c0_i32 = arith.constant 0 : i32
    %c0_i32_0 = arith.constant 0 : i32
    return %arg0, %c0_i32 : i32, i32
  }
  func.func @transform_1(%arg0: i32) -> (i32, i32) {
    %c0_i32 = arith.constant 0 : i32
    %c0_i32_0 = arith.constant 0 : i32
    %c0_i32_1 = arith.constant 0 : i32
    return %c0_i32, %c0_i32_0 : i32, i32
  }
  func.func @transform_2(%arg0: i32) -> (i32, i32, i32) {
    %c0_i32 = arith.constant 0 : i32
    %c0_i32_0 = arith.constant 0 : i32
    %c0_i32_1 = arith.constant 0 : i32
    %c0_i32_2 = arith.constant 0 : i32
    return %c0_i32, %c0_i32_0, %c0_i32_1 : i32, i32, i32
  }
  func.func @transform_3(%arg0: i32) -> (i32, i32) {
    %c0_i32 = arith.constant 0 : i32
    %c0_i32_0 = arith.constant 0 : i32
    %c0_i32_1 = arith.constant 0 : i32
    return %c0_i32, %c0_i32_0 : i32, i32
  }
  func.func @transform_4(%arg0: i32) -> (i32, i32) {
    %c0_i32 = arith.constant 0 : i32
    %c0_i32_0 = arith.constant 0 : i32
    %c0_i32_1 = arith.constant 0 : i32
    return %c0_i32, %c0_i32_0 : i32, i32
  }
  func.func @transform_5(%arg0: i32) -> (i32, i32) {
    %c0_i32 = arith.constant 0 : i32
    %c0_i32_0 = arith.constant 0 : i32
    return %arg0, %c0_i32 : i32, i32
  }
  func.func @transform_6(%arg0: i32) -> (i32, i32) {
    %c0_i32 = arith.constant 0 : i32
    %c0_i32_0 = arith.constant 0 : i32
    return %arg0, %c0_i32 : i32, i32
  }
}

</mosaic_0001>

<bundles_post_ra>
// kernel: dae_forward.1
= control target key start
LH: loop header
LB: loop body
LE: loop exit
PB: predicated region body
PF: predicated region fallthrough
CT: control target
= control target key end

     0   :  { %12 = vsyncpa [#allocation3], 0  ;;  %s6913_s21 = smov [#allocation2]   ;;  %s9096_s0 = inlined_call_operand.vmem [shape: f32[128,784], index: 0, kind: input, shape index: {}]   ;;  %s9097_s1 = inlined_call_operand.vmem [shape: bf16[784,256], index: 1, kind: input, shape index: {}]   ;;  %s9098_s2 = inlined_call_operand.vmem [shape: bf16[10,256,256], index: 2, kind: input, shape index: {}]   ;;  %s9099_s3 = inlined_call_operand.vmem [shape: bf16[256,784], index: 3, kind: input, shape index: {}]   ;;  %s9100_s4 = inlined_call_operand.hbm [shape: f32[12,896], index: 4, kind: input, shape index: {}]   ;;  %s9101_s5 = inlined_call_operand.vmem [shape: f32[128,8], index: 5, kind: output, shape index: {0}]   ;;  %s9102_s6 = inlined_call_operand.vmem [shape: bf16[128,784], index: 6, kind: output, shape index: {1}]  }
   0x1   :  { %s26_s22 = sshll.u32 %s6913_s21, 4  ;;  %s6889_s25 = scalar_lea.hbm %s9100_s4, 1792  ;;  %s27_s22 = int_to_ptr.vmem [resolvable:$true] %s26_s22 }
   0x2   :  { %p6890_p0 = scmp.ne.s32.totalorder %s9100_s4, %s6889_s25  ;;  %p6893_p1 = scmp.lt.u32.totalorder %s6889_s25, %s9100_s4 }
   0x4   :  { %p6895_p2 = pnand %p6893_p1, %p6890_p0 }
   0x6   :  { %6898 = shalt.err (!%p6895_p2)
}
   0x7   :  { %s6899_s30 = scalar_lea.vmem %s27_s22, 1792  ;;  %p6904_p4 = scmp.lt.s32.totalorder %s27_s22, %s27_s22 }
   0x8   :  { %p6900_p3 = scmp.ne.s32.totalorder %s27_s22, %s6899_s30  ;;  %p6905_p5 = scmp.lt.s32.totalorder %s6899_s30, %s6899_s30 }
   0xa   :  { %p6906_p6 = por %p6905_p5, %p6904_p4 }
   0xc   :  { %p6907_p7 = pnand %p6906_p6, %p6900_p3 }
   0xe   :  { %6910 = shalt.err (!%p6907_p7)
}
   0xf   :  { %s6914_s7 = smov 896   ;;  %s6915_s8 = smov 56  }
  0x10   :  { %32 = dma.hbm_to_vmem [thread:$0]  %s9100_s4, 1792, %s27_s22, [#allocation3], %s6914_s7, %s6914_s7, %s6915_s8  }
  0x11   :  { %6911 = dma.done.wait [#allocation3], 1792  }
  0x12   :  { %6912 = vsyncadd [#allocation3], 4294965504  ;;  %v6296_v0 = vld [vmem:[%s9097_s1 + $0x4] ss:$8 sps:$4 sm:$0xff]   ;;  %v6298_v1 = vld [vmem:[%s9097_s1] ss:$8 sps:$4 sm:$0xff]  }
  0x13   :  { %830 = vmatprep.subr.bf16.mxu0 %v6296_v0  ;;  %v6299_v2 = vld [vmem:[%s9097_s1 + $0x14] ss:$8 sps:$4 sm:$0xff]   ;;  %v6301_v3 = vld [vmem:[%s9097_s1 + $0x10] ss:$8 sps:$4 sm:$0xff]   ;;  %v6302_v4 = vld [vmem:[%s9097_s1 + $0x24] ss:$8 sps:$4 sm:$0xff]  }
  0x14   :  { %831 = vmatpush1.bf16.msra.mxu0 %v6298_v1  ;;  %v6304_v5 = vld [vmem:[%s9097_s1 + $0x20] ss:$8 sps:$4 sm:$0xff]   ;;  %v6305_v6 = vld [vmem:[%s9097_s1 + $0x34] ss:$8 sps:$4 sm:$0xff]   ;;  %v6307_v7 = vld [vmem:[%s9097_s1 + $0x30] ss:$8 sps:$4 sm:$0xff]  }
  0x15   :  { %832 = vmatprep.subr.bf16.mxu0 %v6299_v2  ;;  %v6308_v8 = vld [vmem:[%s9097_s1 + $0x44] ss:$8 sps:$4 sm:$0xff]   ;;  %v6310_v9 = vld [vmem:[%s9097_s1 + $0x40] ss:$8 sps:$4 sm:$0xff]   ;;  %v6311_v10 = vld [vmem:[%s9097_s1 + $0x54] ss:$8 sps:$4 sm:$0xff]  }
  0x16   :  { %v6313_v11 = vld [vmem:[%s9097_s1 + $0x50] ss:$8 sps:$4 sm:$0xff]   ;;  %v6314_v12 = vld [vmem:[%s9097_s1 + $0x64] ss:$8 sps:$4 sm:$0xff]   ;;  %v6316_v16 = vld [vmem:[%s9097_s1 + $0x60] ss:$8 sps:$4 sm:$0xff]  }
  0x17   :  { %v38_v13 = vld [vmem:[%s9096_s0 + $0x8] sm:$0xff]  ;;  %v45_v14 = vld [vmem:[%s9096_s0 + $0x40] sm:$0xff]  ;;  %v6317_v17 = vld [vmem:[%s9097_s1 + $0x74] ss:$8 sps:$4 sm:$0xff]   ;;  %vm805_vm0 = vcmask 130048   ;;  %vm1801_vm1 = vcmask 523264  }
  0x18   :  { %833 = vmatpush1.bf16.msra.mxu0 %v6301_v3  ;;  %v150_v15 = vpack.c.bf16 %v45_v14, %v38_v13  ;;  %v6319_v18 = vld [vmem:[%s9097_s1 + $0x70] ss:$8 sps:$4 sm:$0xff]   ;;  %v6320_v19 = vld [vmem:[%s9097_s1 + $0x84] ss:$8 sps:$4 sm:$0xff]   ;;  %v6322_v20 = vld [vmem:[%s9097_s1 + $0x80] ss:$8 sps:$4 sm:$0xff]  }
  0x19   :  { %834 = vmatprep.subr.bf16.mxu0 %v6302_v4  ;;  %v6323_v21 = vld [vmem:[%s9097_s1 + $0x94] ss:$8 sps:$4 sm:$0xff]   ;;  %v6325_v22 = vld [vmem:[%s9097_s1 + $0x90] ss:$8 sps:$4 sm:$0xff]   ;;  %v6326_v23 = vld [vmem:[%s9097_s1 + $0xa4] ss:$8 sps:$4 sm:$0xff]  }
  0x1a   :  { %862 = vmatprep.mubr.bf16.mxu0 %v150_v15  ;;  %v6328_v24 = vld [vmem:[%s9097_s1 + $0xa0] ss:$8 sps:$4 sm:$0xff]   ;;  %v6329_v25 = vld [vmem:[%s9097_s1 + $0xb4] ss:$8 sps:$4 sm:$0xff]   ;;  %v6331_v26 = vld [vmem:[%s9097_s1 + $0xb0] ss:$8 sps:$4 sm:$0xff]  }
  0x1b   :  { %v6332_v27 = vld [vmem:[%s9097_s1 + $0xc4] ss:$8 sps:$4 sm:$0xff]   ;;  %v6334_v28 = vld [vmem:[%s9097_s1 + $0xc0] ss:$8 sps:$4 sm:$0xff]   ;;  %v6335_v29 = vld [vmem:[%s9097_s1 + $0xd4] ss:$8 sps:$4 sm:$0xff]  }
  0x1c   :  { %835 = vmatpush1.bf16.msra.mxu0 %v6304_v5  ;;  %v6337_v30 = vld [vmem:[%s9097_s1 + $0xd0] ss:$8 sps:$4 sm:$0xff]   ;;  %v6338_v31 = vld [vmem:[%s9097_s1 + $0xe4] ss:$8 sps:$4 sm:$0xff]   ;;  %v6340_v32 = vld [vmem:[%s9097_s1 + $0xe0] ss:$8 sps:$4 sm:$0xff]  }
  0x1d   :  { %836 = vmatprep.subr.bf16.mxu0 %v6305_v6  ;;  %v6341_v33 = vld [vmem:[%s9097_s1 + $0xf4] ss:$8 sps:$4 sm:$0xff]   ;;  %v6343_v34 = vld [vmem:[%s9097_s1 + $0xf0] ss:$8 sps:$4 sm:$0xff]   ;;  %v37_v35 = vld [vmem:[%s9096_s0] sm:$0xff]  ;;  %vm1965_vm2 = vcmask 261120  }
  0x1e   :  { %v44_v36 = vld [vmem:[%s9096_s0 + $0x38] sm:$0xff]  ;;  %v6346_v37 = vld [vmem:[%s9097_s1 + $0x104] ss:$8 sps:$4 sm:$0xff]   ;;  %v59_v39 = vld [vmem:[%s9096_s0 + $0xb0] sm:$0xff]  ;;  %vm2310_vm3 = vcmask 1043456   ;;  %vm2258_vm4 = vcmask 64512  }
  0x1f   :  { %v52_v38 = vld [vmem:[%s9096_s0 + $0x78] sm:$0xff]  ;;  %v149_v40 = vpack.c.bf16 %v44_v36, %v37_v35  ;;  %v6344_v41 = vld [vmem:[%s9097_s1 + $0x100] ss:$8 sps:$4 sm:$0xff]   ;;  %v51_v45 = vld [vmem:[%s9096_s0 + $0x70] sm:$0xff]  ;;  %vm5186_vm5 = vcmask 125952  }
  0x20   :  { %837 = vmatpush1.bf16.msra.mxu0 %v6307_v7  ;;  %v157_v42 = vpack.c.bf16 %v59_v39, %v52_v38  ;;  %v6349_v43 = vld [vmem:[%s9097_s1 + $0x114] ss:$8 sps:$4 sm:$0xff]   ;;  %v6347_v44 = vld [vmem:[%s9097_s1 + $0x110] ss:$8 sps:$4 sm:$0xff]   ;;  %v58_v46 = vld [vmem:[%s9096_s0 + $0xa8] sm:$0xff] }
  0x21   :  { %838 = vmatprep.subr.bf16.mxu0 %v6308_v8  ;;  %v6352_v47 = vld [vmem:[%s9097_s1 + $0x124] ss:$8 sps:$4 sm:$0xff]   ;;  %v156_v50 = vpack.c.bf16 %v58_v46, %v51_v45  ;;  %v6350_v51 = vld [vmem:[%s9097_s1 + $0x120] ss:$8 sps:$4 sm:$0xff]   ;;  %v6355_v53 = vld [vmem:[%s9097_s1 + $0x134] ss:$8 sps:$4 sm:$0xff]  }
  0x22   :  { %v66_v48 = vld [vmem:[%s9096_s0 + $0xe8] sm:$0xff]  ;;  %v73_v49 = vld [vmem:[%s9096_s0 + $0x120] sm:$0xff]  ;;  %v6353_v54 = vld [vmem:[%s9097_s1 + $0x130] ss:$8 sps:$4 sm:$0xff]  }
  0x23   :  { %v164_v52 = vpack.c.bf16 %v73_v49, %v66_v48  ;;  %v65_v55 = vld [vmem:[%s9096_s0 + $0xe0] sm:$0xff]  ;;  %v72_v56 = vld [vmem:[%s9096_s0 + $0x118] sm:$0xff]  ;;  %v87_v59 = vld [vmem:[%s9096_s0 + $0x190] sm:$0xff] }
  0x24   :  { %839 = vmatpush1.bf16.msra.mxu0 %v6310_v9  ;;  %v6358_v57 = vld [vmem:[%s9097_s1 + $0x144] ss:$8 sps:$4 sm:$0xff]   ;;  %v80_v58 = vld [vmem:[%s9096_s0 + $0x158] sm:$0xff]  ;;  %v163_v60 = vpack.c.bf16 %v72_v56, %v65_v55  ;;  %v6356_v61 = vld [vmem:[%s9097_s1 + $0x140] ss:$8 sps:$4 sm:$0xff]  }
  0x25   :  { %840 = vmatprep.subr.bf16.mxu0 %v6311_v10  ;;  %v171_v62 = vpack.c.bf16 %v87_v59, %v80_v58  ;;  %v6361_v63 = vld [vmem:[%s9097_s1 + $0x154] ss:$8 sps:$4 sm:$0xff]   ;;  %v6359_v0 = vld [vmem:[%s9097_s1 + $0x150] ss:$8 sps:$4 sm:$0xff]   ;;  %v86_v2 = vld [vmem:[%s9096_s0 + $0x188] sm:$0xff] }
  0x26   :  { %v79_v1 = vld [vmem:[%s9096_s0 + $0x150] sm:$0xff]  ;;  %v6364_v3 = vld [vmem:[%s9097_s1 + $0x164] ss:$8 sps:$4 sm:$0xff]   ;;  %v6362_v7 = vld [vmem:[%s9097_s1 + $0x160] ss:$8 sps:$4 sm:$0xff]  }
  0x27   :  { %v94_v4 = vld [vmem:[%s9096_s0 + $0x1c8] sm:$0xff]  ;;  %v101_v5 = vld [vmem:[%s9096_s0 + $0x200] sm:$0xff]  ;;  %v170_v6 = vpack.c.bf16 %v86_v2, %v79_v1  ;;  %v6367_v9 = vld [vmem:[%s9097_s1 + $0x174] ss:$8 sps:$4 sm:$0xff]  }
  0x28   :  { %841 = vmatpush1.bf16.msra.mxu0 %v6313_v11  ;;  %v178_v8 = vpack.c.bf16 %v101_v5, %v94_v4  ;;  %v6365_v10 = vld [vmem:[%s9097_s1 + $0x170] ss:$8 sps:$4 sm:$0xff]   ;;  %v93_v11 = vld [vmem:[%s9096_s0 + $0x1c0] sm:$0xff]  ;;  %v6385_v38 = vld [vmem:[%s9097_s1 + $0x1d4] ss:$8 sps:$4 sm:$0xff]  }
  0x29   :  { %842 = vmatprep.subr.bf16.mxu0 %v6314_v12  ;;  %v100_v12 = vld [vmem:[%s9096_s0 + $0x1f8] sm:$0xff]  ;;  %v6370_v13 = vld [vmem:[%s9097_s1 + $0x184] ss:$8 sps:$4 sm:$0xff]   ;;  %v115_v15 = vld [vmem:[%s9096_s0 + $0x270] sm:$0xff] }
  0x2a   :  { %v108_v14 = vld [vmem:[%s9096_s0 + $0x238] sm:$0xff]  ;;  %v143_v35 = vld [vmem:[%s9096_s0 + $0x350] sm:$0xff]  ;;  %v6380_v36 = vld [vmem:[%s9097_s1 + $0x1c0] ss:$8 sps:$4 sm:$0xff]  }
  0x2b   :  { %v47_v45 = vld [vmem:[%s9096_s0 + $0x50] sm:$0xff]  ;;  %v6386_v46 = vld [vmem:[%s9097_s1 + $0x1e0] ss:$8 sps:$4 sm:$0xff]  }
  0x2c   :  { %843 = vmatpush1.bf16.msra.mxu0 %v6316_v16  ;;  %v6368_v16 = vld [vmem:[%s9097_s1 + $0x180] ss:$8 sps:$4 sm:$0xff]   ;;  %v6391_v48 = vld [vmem:[%s9097_s1 + $0x1f4] ss:$8 sps:$4 sm:$0xff]  }
  0x2d   :  { %844 = vmatprep.subr.bf16.mxu0 %v6317_v17  ;;  %v177_v17 = vpack.c.bf16 %v100_v12, %v93_v11  ;;  %v61_v55 = vld [vmem:[%s9096_s0 + $0xc0] sm:$0xff]  ;;  %v6397_v58 = vld [vmem:[%s9097_s1 + $0x214] ss:$8 sps:$4 sm:$0xff]  }
  0x2e   :  { %v6392_v56 = vld [vmem:[%s9097_s1 + $0x200] ss:$8 sps:$4 sm:$0xff]   ;;  %v75_v1 = vld [vmem:[%s9096_s0 + $0x130] sm:$0xff] }
  0x2f   :  { %v6398_v2 = vld [vmem:[%s9097_s1 + $0x220] ss:$8 sps:$4 sm:$0xff]   ;;  %v6403_v4 = vld [vmem:[%s9097_s1 + $0x234] ss:$8 sps:$4 sm:$0xff]  }
  0x30   :  { %845 = vmatpush1.bf16.msra.mxu0 %v6319_v18  ;;  %v6373_v18 = vld [vmem:[%s9097_s1 + $0x194] ss:$8 sps:$4 sm:$0xff]   ;;  %v89_v11 = vld [vmem:[%s9096_s0 + $0x1a0] sm:$0xff] }
  0x31   :  { %846 = vmatprep.subr.bf16.mxu0 %v6320_v19  ;;  %v185_v19 = vpack.c.bf16 %v115_v15, %v108_v14  ;;  %v6404_v12 = vld [vmem:[%s9097_s1 + $0x240] ss:$8 sps:$4 sm:$0xff]   ;;  %v6409_v14 = vld [vmem:[%s9097_s1 + $0x254] ss:$8 sps:$4 sm:$0xff]  }
  0x34   :  { %847 = vmatpush1.bf16.msra.mxu0 %v6322_v20  ;;  %v6371_v20 = vld [vmem:[%s9097_s1 + $0x190] ss:$8 sps:$4 sm:$0xff]  }
  0x35   :  { %848 = vmatprep.subr.bf16.mxu0 %v6323_v21  ;;  %v107_v21 = vld [vmem:[%s9096_s0 + $0x230] sm:$0xff] }
  0x38   :  { %849 = vmatpush1.bf16.msra.mxu0 %v6325_v22  ;;  %v114_v22 = vld [vmem:[%s9096_s0 + $0x268] sm:$0xff] }
  0x39   :  { %850 = vmatprep.subr.bf16.mxu0 %v6326_v23  ;;  %v6376_v23 = vld [vmem:[%s9097_s1 + $0x1a4] ss:$8 sps:$4 sm:$0xff]  }
  0x3c   :  { %851 = vmatpush1.bf16.msra.mxu0 %v6328_v24  ;;  %v122_v24 = vld [vmem:[%s9096_s0 + $0x2a8] sm:$0xff] }
  0x3d   :  { %852 = vmatprep.subr.bf16.mxu0 %v6329_v25  ;;  %v129_v25 = vld [vmem:[%s9096_s0 + $0x2e0] sm:$0xff] }
  0x40   :  { %853 = vmatpush1.bf16.msra.mxu0 %v6331_v26  ;;  %v6374_v26 = vld [vmem:[%s9097_s1 + $0x1a0] ss:$8 sps:$4 sm:$0xff]  }
  0x41   :  { %854 = vmatprep.subr.bf16.mxu0 %v6332_v27  ;;  %v184_v27 = vpack.c.bf16 %v114_v22, %v107_v21  ;;  %v103_v21 = vld [vmem:[%s9096_s0 + $0x210] sm:$0xff]  ;;  %v6410_v22 = vld [vmem:[%s9097_s1 + $0x260] ss:$8 sps:$4 sm:$0xff]  }
  0x44   :  { %855 = vmatpush1.bf16.msra.mxu0 %v6334_v28  ;;  %v6379_v28 = vld [vmem:[%s9097_s1 + $0x1b4] ss:$8 sps:$4 sm:$0xff]  }
  0x45   :  { %856 = vmatprep.subr.bf16.mxu0 %v6335_v29  ;;  %v192_v29 = vpack.c.bf16 %v129_v25, %v122_v24  ;;  %v6415_v24 = vld [vmem:[%s9097_s1 + $0x274] ss:$8 sps:$4 sm:$0xff]  }
  0x48   :  { %857 = vmatpush1.bf16.msra.mxu0 %v6337_v30  ;;  %v6377_v30 = vld [vmem:[%s9097_s1 + $0x1b0] ss:$8 sps:$4 sm:$0xff]  }
  0x49   :  { %858 = vmatprep.subr.bf16.mxu0 %v6338_v31  ;;  %v121_v31 = vld [vmem:[%s9096_s0 + $0x2a0] sm:$0xff] }
  0x4c   :  { %859 = vmatpush1.bf16.msra.mxu0 %v6340_v32  ;;  %v128_v32 = vld [vmem:[%s9096_s0 + $0x2d8] sm:$0xff] }
  0x4d   :  { %860 = vmatprep.subr.bf16.mxu0 %v6341_v33  ;;  %v6382_v33 = vld [vmem:[%s9097_s1 + $0x1c4] ss:$8 sps:$4 sm:$0xff]  }
  0x50   :  { %861 = vmatpush1.bf16.msra.mxu0 %v6343_v34  ;;  %v136_v34 = vld [vmem:[%s9096_s0 + $0x318] sm:$0xff] }
  0x51   :  { %943 = vmatprep.subr.bf16.mxu0 %v6346_v37  ;;  %v191_v37 = vpack.c.bf16 %v128_v32, %v121_v31  ;;  %v199_v39 = vpack.c.bf16 %v143_v35, %v136_v34  ;;  %v117_v31 = vld [vmem:[%s9096_s0 + $0x280] sm:$0xff]  ;;  %v6421_v34 = vld [vmem:[%s9097_s1 + $0x294] ss:$8 sps:$4 sm:$0xff]  }
  0x52   :  { %v6416_v32 = vld [vmem:[%s9097_s1 + $0x280] ss:$8 sps:$4 sm:$0xff]  }
  0x53   :  { %863 = vmatmul.mubr.bf16.vlgmr.msra.gmra.mrb[0].mxu0 %v149_v40  ;;  %v6383_v40 = vld [vmem:[%s9097_s1 + $0x1d0] ss:$8 sps:$4 sm:$0xff]  }
  0x54   :  { %944 = vmatpush1.bf16.msra.mxu0 %v6344_v41  ;;  %872 = vmatprep.mubr.bf16.mxu0 %v157_v42  ;;  %v135_v41 = vld [vmem:[%s9096_s0 + $0x310] sm:$0xff]  ;;  %v142_v42 = vld [vmem:[%s9096_s0 + $0x348] sm:$0xff] }
  0x55   :  { %945 = vmatprep.subr.bf16.mxu0 %v6349_v43  ;;  %v6388_v43 = vld [vmem:[%s9097_s1 + $0x1e4] ss:$8 sps:$4 sm:$0xff]  }
  0x58   :  { %946 = vmatpush1.bf16.msra.mxu0 %v6347_v44  ;;  %v40_v44 = vld [vmem:[%s9096_s0 + $0x18] sm:$0xff] }
  0x59   :  { %947 = vmatprep.subr.bf16.mxu0 %v6352_v47  ;;  %v198_v47 = vpack.c.bf16 %v142_v42, %v135_v41  ;;  %v152_v49 = vpack.c.bf16 %v47_v45, %v40_v44  ;;  %v131_v41 = vld [vmem:[%s9096_s0 + $0x2f0] sm:$0xff]  ;;  %v6422_v42 = vld [vmem:[%s9097_s1 + $0x2a0] ss:$8 sps:$4 sm:$0xff]  }
  0x5a   :  { %v6427_v44 = vld [vmem:[%s9097_s1 + $0x2b4] ss:$8 sps:$4 sm:$0xff]  }
  0x5b   :  { %873 = vmatmul.mubr.bf16.gmra.mrb[4].mxu0 %v156_v50  ;;  %v6389_v50 = vld [vmem:[%s9097_s1 + $0x1f0] ss:$8 sps:$4 sm:$0xff]  }
  0x5c   :  { %948 = vmatpush1.bf16.msra.mxu0 %v6350_v51  ;;  %882 = vmatprep.mubr.bf16.mxu0 %v164_v52  ;;  %v39_v51 = vld [vmem:[%s9096_s0 + $0x10] sm:$0xff]  ;;  %v46_v52 = vld [vmem:[%s9096_s0 + $0x48] sm:$0xff] }
  0x5d   :  { %949 = vmatprep.subr.bf16.mxu0 %v6355_v53  ;;  %v6394_v53 = vld [vmem:[%s9097_s1 + $0x204] ss:$8 sps:$4 sm:$0xff]  }
  0x60   :  { %950 = vmatpush1.bf16.msra.mxu0 %v6353_v54  ;;  %v54_v54 = vld [vmem:[%s9096_s0 + $0x88] sm:$0xff] }
  0x61   :  { %951 = vmatprep.subr.bf16.mxu0 %v6358_v57  ;;  %v151_v57 = vpack.c.bf16 %v46_v52, %v39_v51  ;;  %v159_v59 = vpack.c.bf16 %v61_v55, %v54_v54  ;;  %v145_v51 = vld [vmem:[%s9096_s0 + $0x360] sm:$0xff]  ;;  %v6433_v55 = vld [vmem:[%s9097_s1 + $0x2d4] ss:$8 sps:$4 sm:$0xff]  }
  0x63   :  { %883 = vmatmul.mubr.bf16.gmra.mrb[8].mxu0 %v163_v60  ;;  %v6395_v60 = vld [vmem:[%s9097_s1 + $0x210] ss:$8 sps:$4 sm:$0xff]  }
  0x64   :  { %952 = vmatpush1.bf16.msra.mxu0 %v6356_v61  ;;  %892 = vmatprep.mubr.bf16.mxu0 %v171_v62  ;;  %v53_v61 = vld [vmem:[%s9096_s0 + $0x80] sm:$0xff]  ;;  %v60_v62 = vld [vmem:[%s9096_s0 + $0xb8] sm:$0xff] }
  0x65   :  { %953 = vmatprep.subr.bf16.mxu0 %v6361_v63  ;;  %v6400_v63 = vld [vmem:[%s9097_s1 + $0x224] ss:$8 sps:$4 sm:$0xff]  }
  0x68   :  { %954 = vmatpush1.bf16.msra.mxu0 %v6359_v0  ;;  %v68_v0 = vld [vmem:[%s9096_s0 + $0xf8] sm:$0xff] }
  0x69   :  { %955 = vmatprep.subr.bf16.mxu0 %v6364_v3  ;;  %v158_v3 = vpack.c.bf16 %v60_v62, %v53_v61  ;;  %v166_v5 = vpack.c.bf16 %v75_v1, %v68_v0  ;;  %v49_v61 = vld [vmem:[%s9096_s0 + $0x60] sm:$0xff]  ;;  %v6439_v1 = vld [vmem:[%s9097_s1 + $0x2f4] ss:$8 sps:$4 sm:$0xff]  }
  0x6b   :  { %893 = vmatmul.mubr.bf16.gmra.mrb[12].mxu0 %v170_v6  ;;  %v6401_v6 = vld [vmem:[%s9097_s1 + $0x230] ss:$8 sps:$4 sm:$0xff]  }
  0x6c   :  { %956 = vmatpush1.bf16.msra.mxu0 %v6362_v7  ;;  %902 = vmatprep.mubr.bf16.mxu0 %v178_v8  ;;  %v67_v7 = vld [vmem:[%s9096_s0 + $0xf0] sm:$0xff]  ;;  %v74_v8 = vld [vmem:[%s9096_s0 + $0x128] sm:$0xff] }
  0x6d   :  { %957 = vmatprep.subr.bf16.mxu0 %v6367_v9  ;;  %v6406_v9 = vld [vmem:[%s9097_s1 + $0x244] ss:$8 sps:$4 sm:$0xff]  }
  0x70   :  { %958 = vmatpush1.bf16.msra.mxu0 %v6365_v10  ;;  %v82_v10 = vld [vmem:[%s9096_s0 + $0x168] sm:$0xff] }
  0x71   :  { %959 = vmatprep.subr.bf16.mxu0 %v6370_v13  ;;  %v165_v13 = vpack.c.bf16 %v74_v8, %v67_v7  ;;  %v173_v15 = vpack.c.bf16 %v89_v11, %v82_v10  ;;  %v48_v7 = vld [vmem:[%s9096_s0 + $0x58] sm:$0xff]  ;;  %v6442_v8 = vld [vmem:[%s9097_s1 + $0x304] ss:$8 sps:$4 sm:$0xff]   ;;  %v63_v10 = vld [vmem:[%s9096_s0 + $0xd0] sm:$0xff] }
  0x72   :  { %v6446_v11 = vld [vmem:[%s9098_s2 + $0x10] ss:$8 sps:$4 sm:$0xff]  }
  0x73   :  { %903 = vmatmul.mubr.bf16.gmra.mrb[16].mxu0 %v177_v17  ;;  %v81_v17 = vld [vmem:[%s9096_s0 + $0x160] sm:$0xff] }
  0x74   :  { %960 = vmatpush1.bf16.msra.mxu0 %v6368_v16  ;;  %912 = vmatprep.mubr.bf16.mxu0 %v185_v19  ;;  %v6407_v16 = vld [vmem:[%s9097_s1 + $0x250] ss:$8 sps:$4 sm:$0xff]   ;;  %v6412_v19 = vld [vmem:[%s9097_s1 + $0x264] ss:$8 sps:$4 sm:$0xff]  }
  0x75   :  { %961 = vmatprep.subr.bf16.mxu0 %v6373_v18  ;;  %v88_v18 = vld [vmem:[%s9096_s0 + $0x198] sm:$0xff] }
  0x78   :  { %962 = vmatpush1.bf16.msra.mxu0 %v6371_v20  ;;  %v96_v20 = vld [vmem:[%s9096_s0 + $0x1d8] sm:$0xff] }
  0x79   :  { %963 = vmatprep.subr.bf16.mxu0 %v6376_v23  ;;  %v172_v23 = vpack.c.bf16 %v88_v18, %v81_v17  ;;  %v180_v25 = vpack.c.bf16 %v103_v21, %v96_v20  ;;  %v6449_v17 = vld [vmem:[%s9098_s2 + $0xb0] ss:$8 sps:$4 sm:$0xff]   ;;  %v70_v20 = vld [vmem:[%s9096_s0 + $0x108] sm:$0xff]  ;;  %v77_v21 = vld [vmem:[%s9096_s0 + $0x140] sm:$0xff] }
  0x7a   :  { %v55_v18 = vld [vmem:[%s9096_s0 + $0x90] sm:$0xff] }
  0x7b   :  { %913 = vmatmul.mubr.bf16.gmra.mrb[20].mxu0 %v184_v27  ;;  %v95_v27 = vld [vmem:[%s9096_s0 + $0x1d0] sm:$0xff] }
  0x7c   :  { %964 = vmatpush1.bf16.msra.mxu0 %v6374_v26  ;;  %922 = vmatprep.mubr.bf16.mxu0 %v192_v29  ;;  %v6413_v26 = vld [vmem:[%s9097_s1 + $0x270] ss:$8 sps:$4 sm:$0xff]   ;;  %v6418_v29 = vld [vmem:[%s9097_s1 + $0x284] ss:$8 sps:$4 sm:$0xff]  }
  0x7d   :  { %965 = vmatprep.subr.bf16.mxu0 %v6379_v28  ;;  %v102_v28 = vld [vmem:[%s9096_s0 + $0x208] sm:$0xff] }
  0x80   :  { %966 = vmatpush1.bf16.msra.mxu0 %v6377_v30  ;;  %v110_v30 = vld [vmem:[%s9096_s0 + $0x248] sm:$0xff] }
  0x81   :  { %967 = vmatprep.subr.bf16.mxu0 %v6382_v33  ;;  %v179_v33 = vpack.c.bf16 %v102_v28, %v95_v27  ;;  %v187_v35 = vpack.c.bf16 %v117_v31, %v110_v30  ;;  %v6453_v27 = vld [vmem:[%s9098_s2 + $0xd0] ss:$8 sps:$4 sm:$0xff]   ;;  %v69_v28 = vld [vmem:[%s9096_s0 + $0x100] sm:$0xff] }
  0x82   :  { %v84_v30 = vld [vmem:[%s9096_s0 + $0x178] sm:$0xff]  ;;  %v91_v31 = vld [vmem:[%s9096_s0 + $0x1b0] sm:$0xff] }
  0x83   :  { %923 = vmatmul.mubr.bf16.gmra.mrb[24].mxu0 %v191_v37  ;;  %v109_v37 = vld [vmem:[%s9096_s0 + $0x240] sm:$0xff] }
  0x84   :  { %968 = vmatpush1.bf16.msra.mxu0 %v6380_v36  ;;  %932 = vmatprep.mubr.bf16.mxu0 %v199_v39  ;;  %v6419_v36 = vld [vmem:[%s9097_s1 + $0x290] ss:$8 sps:$4 sm:$0xff]   ;;  %v6424_v39 = vld [vmem:[%s9097_s1 + $0x2a4] ss:$8 sps:$4 sm:$0xff]  }
  0x85   :  { %969 = vmatprep.subr.bf16.mxu0 %v6385_v38  ;;  %v116_v38 = vld [vmem:[%s9096_s0 + $0x278] sm:$0xff] }
  0x88   :  { %970 = vmatpush1.bf16.msra.mxu0 %v6383_v40  ;;  %v124_v40 = vld [vmem:[%s9096_s0 + $0x2b8] sm:$0xff] }
  0x89   :  { %971 = vmatprep.subr.bf16.mxu0 %v6388_v43  ;;  %v186_v43 = vpack.c.bf16 %v116_v38, %v109_v37  ;;  %v194_v45 = vpack.c.bf16 %v131_v41, %v124_v40  ;;  %v105_v37 = vld [vmem:[%s9096_s0 + $0x220] sm:$0xff]  ;;  %v104_v41 = vld [vmem:[%s9096_s0 + $0x218] sm:$0xff] }
  0x8a   :  { %v97_v40 = vld [vmem:[%s9096_s0 + $0x1e0] sm:$0xff] }
  0x8b   :  { %933 = vmatmul.mubr.bf16.gmra.mrb[28].mxu0 %v198_v47  ;;  %v123_v47 = vld [vmem:[%s9096_s0 + $0x2b0] sm:$0xff] }
  0x8c   :  { %972 = vmatpush1.bf16.msra.mxu0 %v6386_v46  ;;  %975 = vmatprep.mubr.bf16.mxu0 %v152_v49  ;;  %v6425_v46 = vld [vmem:[%s9097_s1 + $0x2b0] ss:$8 sps:$4 sm:$0xff]   ;;  %v6430_v49 = vld [vmem:[%s9097_s1 + $0x2c4] ss:$8 sps:$4 sm:$0xff]  }
  0x8d   :  { %973 = vmatprep.subr.bf16.mxu0 %v6391_v48  ;;  %v130_v48 = vld [vmem:[%s9096_s0 + $0x2e8] sm:$0xff] }
  0x8e   :  { %v193_v52 = vpack.c.bf16 %v130_v48, %v123_v47  ;;  %v118_v47 = vld [vmem:[%s9096_s0 + $0x288] sm:$0xff] }
  0x8f   :  { %v126_v48 = vld [vmem:[%s9096_s0 + $0x2c8] sm:$0xff] }
  0x90   :  { %974 = vmatpush1.bf16.msra.mxu0 %v6389_v50  ;;  %v138_v50 = vld [vmem:[%s9096_s0 + $0x328] sm:$0xff] }
  0x91   :  { %1056 = vmatprep.subr.bf16.mxu0 %v6394_v53  ;;  %v6428_v53 = vld [vmem:[%s9097_s1 + $0x2c0] ss:$8 sps:$4 sm:$0xff]   ;;  %v201_v54 = vpack.c.bf16 %v145_v51, %v138_v50 }
  0x93   :  { %976 = vmatmul.mubr.bf16.vlgmr.msra.gmra.mrb[0].mxu0 %v151_v57  ;;  %v137_v57 = vld [vmem:[%s9096_s0 + $0x320] sm:$0xff] }
  0x94   :  { %1057 = vmatpush1.bf16.msra.mxu0 %v6392_v56  ;;  %985 = vmatprep.mubr.bf16.mxu0 %v159_v59  ;;  %v6431_v56 = vld [vmem:[%s9097_s1 + $0x2d0] ss:$8 sps:$4 sm:$0xff]   ;;  %v6436_v59 = vld [vmem:[%s9097_s1 + $0x2e4] ss:$8 sps:$4 sm:$0xff]  }
  0x95   :  { %1058 = vmatprep.subr.bf16.mxu0 %v6397_v58  ;;  %v144_v58 = vld [vmem:[%s9096_s0 + $0x358] sm:$0xff] }
  0x96   :  { %v200_v62 = vpack.c.bf16 %v144_v58, %v137_v57  ;;  %v139_v58 = vld [vmem:[%s9096_s0 + $0x330] sm:$0xff] }
  0x98   :  { %1059 = vmatpush1.bf16.msra.mxu0 %v6395_v60  ;;  %v42_v60 = vld [vmem:[%s9096_s0 + $0x28] sm:$0xff] }
  0x99   :  { %1060 = vmatprep.subr.bf16.mxu0 %v6400_v63  ;;  %v6434_v63 = vld [vmem:[%s9097_s1 + $0x2e0] ss:$8 sps:$4 sm:$0xff]   ;;  %v154_v0 = vpack.c.bf16 %v49_v61, %v42_v60  ;;  %v6916_v61 = vmov 0  }
  0x9b   :  { %986 = vmatmul.mubr.bf16.gmra.mrb[4].mxu0 %v158_v3  ;;  %v6444_v3 = vld [vmem:[%s9098_s2] ss:$8 sps:$4 sm:$0xff]  }
  0x9c   :  { %1061 = vmatpush1.bf16.msra.mxu0 %v6398_v2  ;;  %995 = vmatprep.mubr.bf16.mxu0 %v166_v5  ;;  %v6443_v2 = vld [vmem:[%s9098_s2 + $0x80] ss:$8 sps:$4 sm:$0xff]   ;;  %v6437_v5 = vld [vmem:[%s9097_s1 + $0x2f0] ss:$8 sps:$4 sm:$0xff]  }
  0x9d   :  { %1062 = vmatprep.subr.bf16.mxu0 %v6403_v4  ;;  %v6445_v4 = vld [vmem:[%s9098_s2 + $0x90] ss:$8 sps:$4 sm:$0xff]   ;;  %5774 = vmatprep.subr.bf16.mxu1 %v6443_v2 }
  0x9e   :  { %5775 = vmatpush3.bf16.msra.mxu1 %v6444_v3  ;;  %v64_v2 = vld [vmem:[%s9096_s0 + $0xd8] sm:$0xff] }
  0x9f   :  { %5776 = vmatprep.subr.bf16.mxu1 %v6445_v4  ;;  %v71_v4 = vld [vmem:[%s9096_s0 + $0x110] sm:$0xff] }
  0xa0   :  { %1063 = vmatpush1.bf16.msra.mxu0 %v6401_v6  ;;  %v41_v6 = vld [vmem:[%s9096_s0 + $0x20] sm:$0xff] }
  0xa1   :  { %1064 = vmatprep.subr.bf16.mxu0 %v6406_v9  ;;  %v56_v9 = vld [vmem:[%s9096_s0 + $0x98] sm:$0xff] }
  0xa2   :  { %5777 = vmatpush3.bf16.msra.mxu1 %v6446_v11  ;;  %v106_v11 = vld [vmem:[%s9096_s0 + $0x228] sm:$0xff] }
  0xa3   :  { %996 = vmatmul.mubr.bf16.gmra.mrb[8].mxu0 %v165_v13  ;;  %v6447_v13 = vld [vmem:[%s9098_s2 + $0xa0] ss:$8 sps:$4 sm:$0xff]  }
  0xa4   :  { %1065 = vmatpush1.bf16.msra.mxu0 %v6404_v12  ;;  %1005 = vmatprep.mubr.bf16.mxu0 %v173_v15  ;;  %v153_v12 = vpack.c.bf16 %v48_v7, %v41_v6  ;;  %v161_v15 = vpack.c.bf16 %v63_v10, %v56_v9  ;;  %v85_v7 = vld [vmem:[%s9096_s0 + $0x180] sm:$0xff]  ;;  %v99_v10 = vld [vmem:[%s9096_s0 + $0x1f0] sm:$0xff] }
  0xa5   :  { %1066 = vmatprep.subr.bf16.mxu0 %v6409_v14  ;;  %v6440_v14 = vld [vmem:[%s9097_s1 + $0x300] ss:$8 sps:$4 sm:$0xff]   ;;  %5778 = vmatprep.subr.bf16.mxu1 %v6447_v13 }
  0xa6   :  { %v113_v13 = vld [vmem:[%s9096_s0 + $0x260] sm:$0xff] }
  0xa8   :  { %1067 = vmatpush1.bf16.msra.mxu0 %v6407_v16  ;;  %v6448_v16 = vld [vmem:[%s9098_s2 + $0x20] ss:$8 sps:$4 sm:$0xff]  }
  0xa9   :  { %1068 = vmatprep.subr.bf16.mxu0 %v6412_v19  ;;  %v62_v19 = vld [vmem:[%s9096_s0 + $0xc8] sm:$0xff]  ;;  %5779 = vmatpush3.bf16.msra.mxu1 %v6448_v16  ;;  %v127_v16 = vld [vmem:[%s9096_s0 + $0x2d0] sm:$0xff] }
  0xaa   :  { %5780 = vmatprep.subr.bf16.mxu1 %v6449_v17  ;;  %v134_v17 = vld [vmem:[%s9096_s0 + $0x308] sm:$0xff] }
  0xab   :  { %1006 = vmatmul.mubr.bf16.gmra.mrb[12].mxu0 %v172_v23  ;;  %v160_v23 = vpack.c.bf16 %v62_v19, %v55_v18  ;;  %v197_v18 = vpack.c.bf16 %v134_v17, %v127_v16  ;;  %v141_v19 = vld [vmem:[%s9096_s0 + $0x340] sm:$0xff] }
  0xac   :  { %1069 = vmatpush1.bf16.msra.mxu0 %v6410_v22  ;;  %1015 = vmatprep.mubr.bf16.mxu0 %v180_v25  ;;  %v6450_v22 = vld [vmem:[%s9098_s2 + $0x30] ss:$8 sps:$4 sm:$0xff]   ;;  %v168_v25 = vpack.c.bf16 %v77_v21, %v70_v20 }
  0xad   :  { %1070 = vmatprep.subr.bf16.mxu0 %v6415_v24  ;;  %v6451_v24 = vld [vmem:[%s9098_s2 + $0xc0] ss:$8 sps:$4 sm:$0xff]   ;;  %5781 = vmatpush3.bf16.msra.mxu1 %v6450_v22  ;;  %v148_v20 = vld [vmem:[%s9096_s0 + $0x378] sm:$0xff] }
  0xae   :  { %5782 = vmatprep.subr.bf16.mxu1 %v6451_v24  ;;  %v204_v21 = vpack.c.bf16 %v148_v20, %v141_v19  ;;  %v6454_v22 = vld [vmem:[%s9098_s2 + $0x50] ss:$8 sps:$4 sm:$0xff]   ;;  %v6456_v24 = vld [vmem:[%s9098_s2 + $0x60] ss:$8 sps:$4 sm:$0xff]  }
  0xb0   :  { %1071 = vmatpush1.bf16.msra.mxu0 %v6413_v26  ;;  %v6452_v26 = vld [vmem:[%s9098_s2 + $0x40] ss:$8 sps:$4 sm:$0xff]  }
  0xb1   :  { %1072 = vmatprep.subr.bf16.mxu0 %v6418_v29  ;;  %v76_v29 = vld [vmem:[%s9096_s0 + $0x138] sm:$0xff]  ;;  %5783 = vmatpush3.bf16.msra.mxu1 %v6452_v26 }
  0xb2   :  { %5784 = vmatprep.subr.bf16.mxu1 %v6453_v27  ;;  %v6458_v26 = vld [vmem:[%s9098_s2 + $0x70] ss:$8 sps:$4 sm:$0xff]   ;;  %v6459_v27 = vld [vmem:[%s9098_s2 + $0x100] ss:$8 sps:$4 sm:$0xff]  }
  0xb3   :  { %1016 = vmatmul.mubr.bf16.gmra.mrb[16].mxu0 %v179_v33  ;;  %v175_v33 = vpack.c.bf16 %v91_v31, %v84_v30  ;;  %v303_v31 = vld [vmem:[#allocation2] ss:$8 sm:$0x3] }
  0xb4   :  { %1073 = vmatpush1.bf16.msra.mxu0 %v6416_v32  ;;  %1025 = vmatprep.mubr.bf16.mxu0 %v187_v35  ;;  %v167_v32 = vpack.c.bf16 %v76_v29, %v69_v28  ;;  %v90_v35 = vld [vmem:[%s9096_s0 + $0x1a8] sm:$0xff]  ;;  %v305_v28 = vlaneseq }
  0xb5   :  { %1074 = vmatprep.subr.bf16.mxu0 %v6421_v34  ;;  %v83_v34 = vld [vmem:[%s9096_s0 + $0x170] sm:$0xff]  ;;  %5785 = vmatpush3.bf16.msra.mxu1 %v6454_v22 }
  0xb6   :  { %v174_v38 = vpack.c.bf16 %v90_v35, %v83_v34  ;;  %v7661_v29 = vshrl.u32 %v305_v28, 7 }
  0xb8   :  { %1075 = vmatpush1.bf16.msra.mxu0 %v6419_v36  ;;  %v98_v36 = vld [vmem:[%s9096_s0 + $0x1e8] sm:$0xff]  ;;  %v7664_v30 = vsub.s32 0, %v7661_v29 }
  0xb9   :  { %1076 = vmatprep.subr.bf16.mxu0 %v6424_v39  ;;  %v182_v39 = vpack.c.bf16 %v105_v37, %v98_v36 }
  0xbb   :  { %1026 = vmatmul.mubr.bf16.gmra.mrb[20].mxu0 %v186_v43  ;;  %v119_v43 = vld [vmem:[%s9096_s0 + $0x290] sm:$0xff] }
  0xbc   :  { %1077 = vmatpush1.bf16.msra.mxu0 %v6422_v42  ;;  %1035 = vmatprep.mubr.bf16.mxu0 %v194_v45  ;;  %v112_v42 = vld [vmem:[%s9096_s0 + $0x258] sm:$0xff] }
  0xbd   :  { %1078 = vmatprep.subr.bf16.mxu0 %v6427_v44  ;;  %v181_v44 = vpack.c.bf16 %v104_v41, %v97_v40  ;;  %v189_v45 = vpack.c.bf16 %v119_v43, %v112_v42 }
  0xc0   :  { %1079 = vmatpush1.bf16.msra.mxu0 %v6425_v46  ;;  %v111_v46 = vld [vmem:[%s9096_s0 + $0x250] sm:$0xff] }
  0xc1   :  { %1080 = vmatprep.subr.bf16.mxu0 %v6430_v49  ;;  %v133_v49 = vld [vmem:[%s9096_s0 + $0x300] sm:$0xff]  ;;  %v188_v50 = vpack.c.bf16 %v118_v47, %v111_v46 }
  0xc2   :  { %v196_v51 = vpack.c.bf16 %v133_v49, %v126_v48 }
  0xc3   :  { %1036 = vmatmul.mubr.bf16.gmra.mrb[24].mxu0 %v193_v52  ;;  %v125_v52 = vld [vmem:[%s9096_s0 + $0x2c0] sm:$0xff] }
  0xc4   :  { %1081 = vmatpush1.bf16.msra.mxu0 %v6428_v53  ;;  %1045 = vmatprep.mubr.bf16.mxu0 %v201_v54  ;;  %v132_v53 = vld [vmem:[%s9096_s0 + $0x2f8] sm:$0xff] }
  0xc5   :  { %1082 = vmatprep.subr.bf16.mxu0 %v6433_v55  ;;  %v140_v54 = vld [vmem:[%s9096_s0 + $0x338] sm:$0xff]  ;;  %v147_v55 = vld [vmem:[%s9096_s0 + $0x370] sm:$0xff] }
  0xc6   :  { %v203_v57 = vpack.c.bf16 %v147_v55, %v140_v54 }
  0xc8   :  { %1083 = vmatpush1.bf16.msra.mxu0 %v6431_v56  ;;  %v195_v56 = vpack.c.bf16 %v132_v53, %v125_v52  ;;  %v6460_v52 = vld [vmem:[%s9098_s2 + $0x110] ss:$8 sps:$4 sm:$0xff]  }
  0xc9   :  { %1084 = vmatprep.subr.bf16.mxu0 %v6436_v59  ;;  %v146_v59 = vld [vmem:[%s9096_s0 + $0x368] sm:$0xff] }
  0xca   :  { %v202_v60 = vpack.c.bf16 %v146_v59, %v139_v58 }
  0xcb   :  { %1046 = vmatmul.mubr.bf16.gmra.mrb[28].mxu0 %v200_v62  ;;  %v43_v62 = vld [vmem:[%s9096_s0 + $0x30] sm:$0xff] }
  0xcc   :  { %1085 = vmatpush1.bf16.msra.mxu0 %v6434_v63  ;;  %1088 = vmatprep.mubr.bf16.mxu0 %v154_v0  ;;  %v50_v63 = vld [vmem:[%s9096_s0 + $0x68] sm:$0xff] }
  0xcd   :  { %1086 = vmatprep.subr.bf16.mxu0 %v6439_v1  ;;  %v155_v0 = vpack.c.bf16 %v50_v63, %v43_v62  ;;  %v57_v1 = vld [vmem:[%s9096_s0 + $0xa0] sm:$0xff] }
  0xce   :  { %v162_v3 = vpack.c.bf16 %v64_v2, %v57_v1 }
  0xd0   :  { %1087 = vmatpush1.bf16.msra.mxu0 %v6437_v5  ;;  %v78_v5 = vld [vmem:[%s9096_s0 + $0x148] sm:$0xff] }
  0xd1   :  { %1169 = vmatprep.subr.bf16.mxu0 %v6442_v8  ;;  %v169_v6 = vpack.c.bf16 %v78_v5, %v71_v4  ;;  %v92_v8 = vld [vmem:[%s9096_s0 + $0x1b8] sm:$0xff] }
  0xd2   :  { %v176_v9 = vpack.c.bf16 %v92_v8, %v85_v7  ;;  %v6462_v5 = vld [vmem:[%s9098_s2 + $0x130] ss:$8 sps:$4 sm:$0xff]  }
  0xd3   :  { %1089 = vmatmul.mubr.bf16.vlgmr.msra.gmra.mrb[0].mxu0 %v153_v12  ;;  %v183_v12 = vpack.c.bf16 %v106_v11, %v99_v10 }
  0xd4   :  { %1170 = vmatpush1.bf16.msra.mxu0 %v6440_v14  ;;  %1098 = vmatprep.mubr.bf16.mxu0 %v161_v15  ;;  %v120_v14 = vld [vmem:[%s9096_s0 + $0x298] sm:$0xff] }
  0xd5   :  { %v190_v15 = vpack.c.bf16 %v120_v14, %v113_v13  ;;  %v6463_v13 = vld [vmem:[%s9098_s2 + $0x140] ss:$8 sps:$4 sm:$0xff]  }
  0xdb   :  { %1099 = vmatmul.mubr.bf16.gmra.mrb[4].mxu0 %v160_v23  ;;  %v6455_v23 = vld [vmem:[%s9098_s2 + $0xe0] ss:$8 sps:$4 sm:$0xff]  }
  0xdc   :  { %1108 = vmatprep.mubr.bf16.mxu0 %v168_v25  ;;  %5786 = vmatprep.subr.bf16.mxu1 %v6455_v23  ;;  %v6457_v25 = vld [vmem:[%s9098_s2 + $0xf0] ss:$8 sps:$4 sm:$0xff]  }
  0xdd   :  { %5787 = vmatpush3.bf16.msra.mxu1 %v6456_v24 }
  0xde   :  { %5788 = vmatprep.subr.bf16.mxu1 %v6457_v25 }
  0xe1   :  { %5789 = vmatpush3.bf16.msra.mxu1 %v6458_v26 }
  0xe2   :  { %5989 = vmatprep.subr.bf16.mxu1 %v6459_v27 }
  0xe3   :  { %1109 = vmatmul.mubr.bf16.gmra.mrb[8].mxu0 %v167_v32  ;;  %v7667_v32 = vsub.s32 1, %v7661_v29 }
  0xe4   :  { %1118 = vmatprep.mubr.bf16.mxu0 %v175_v33  ;;  %v7670_v33 = vrot.slane %v303_v31, %v7664_v30 }
  0xe5   :  { %v7673_v34 = vrot.slane %v303_v31, %v7667_v32 }
  0xeb   :  { %1119 = vmatmul.mubr.bf16.gmra.mrb[12].mxu0 %v174_v38 }
  0xec   :  { %1128 = vmatprep.mubr.bf16.mxu0 %v182_v39 }
  0xf3   :  { %1129 = vmatmul.mubr.bf16.gmra.mrb[16].mxu0 %v181_v44 }
  0xf4   :  { %1138 = vmatprep.mubr.bf16.mxu0 %v189_v45 }
  0xfb   :  { %1139 = vmatmul.mubr.bf16.gmra.mrb[20].mxu0 %v188_v50 }
  0xfc   :  { %1148 = vmatprep.mubr.bf16.mxu0 %v196_v51 }
 0x103   :  { %1149 = vmatmul.mubr.bf16.gmra.mrb[24].mxu0 %v195_v56 }
 0x104   :  { %1158 = vmatprep.mubr.bf16.mxu0 %v203_v57 }
 0x10b   :  { %1159 = vmatmul.mubr.bf16.gmra.mrb[28].mxu0 %v202_v60  ;;  %v6461_v60 = vld [vmem:[%s9098_s2 + $0x120] ss:$8 sps:$4 sm:$0xff]  }
 0x10c   :  { %1201 = vmatprep.mubr.bf16.mxu0 %v6916_v61 }
 0x113   :  { %5355 = vmatmul.mubr.msk.bf16.vlgmr.msra.gmra.mrb[0].mxu0 %vm805_vm0, %v155_v0 }
 0x114   :  { %1211 = vmatprep.mubr.bf16.mxu0 %v6916_v61 }
 0x11b   :  { %5356 = vmatmul.mubr.msk.bf16.gmra.mrb[4].mxu0 %vm805_vm0, %v162_v3 }
 0x11c   :  { %1221 = vmatprep.mubr.bf16.mxu0 %v6916_v61 }
 0x123   :  { %5357 = vmatmul.mubr.msk.bf16.gmra.mrb[8].mxu0 %vm805_vm0, %v169_v6 }
 0x124   :  { %1231 = vmatprep.mubr.bf16.mxu0 %v6916_v61 }
 0x12b   :  { %5358 = vmatmul.mubr.msk.bf16.gmra.mrb[12].mxu0 %vm805_vm0, %v176_v9 }
 0x12c   :  { %1241 = vmatprep.mubr.bf16.mxu0 %v6916_v61 }
 0x133   :  { %5359 = vmatmul.mubr.msk.bf16.gmra.mrb[16].mxu0 %vm805_vm0, %v183_v12 }
 0x134   :  { %1251 = vmatprep.mubr.bf16.mxu0 %v6916_v61 }
 0x13b   :  { %5360 = vmatmul.mubr.msk.bf16.gmra.mrb[20].mxu0 %vm805_vm0, %v190_v15 }
 0x13c   :  { %1261 = vmatprep.mubr.bf16.mxu0 %v6916_v61 }
 0x143   :  { %5361 = vmatmul.mubr.msk.bf16.gmra.mrb[24].mxu0 %vm805_vm0, %v197_v18 }
 0x144   :  { %1271 = vmatprep.mubr.bf16.mxu0 %v6916_v61 }
 0x14b   :  { %5362 = vmatmul.mubr.msk.bf16.gmra.mrb[28].mxu0 %vm805_vm0, %v204_v21  ;;  %v6464_v21 = vld [vmem:[%s9098_s2 + $0x150] ss:$8 sps:$4 sm:$0xff]  }
 0x1e6   :  { %v1203_v35 = vpop.f32.mrb[0].mxu0 }
 0x1e7   :  { %v6163_v36 = vadd.f32 %v1203_v35, %v7670_v33  ;;  %v1205_v37 = vpop.f32.mrb[1].mxu0 }
 0x1e8   :  { %v6164_v38 = vadd.f32 %v1205_v37, %v7673_v34  ;;  %v1207_v39 = vpop.f32.mrb[2].mxu0 }
 0x1e9   :  { %v6165_v40 = vadd.f32 %v1207_v39, %v7670_v33  ;;  %v1209_v41 = vpop.f32.mrb[3].mxu0  ;;  %v1282_v43 = vmax.f32 %v6163_v36, 0.0 }
 0x1ea   :  { %v6166_v42 = vadd.f32 %v1209_v41, %v7673_v34  ;;  %v1283_v45 = vmax.f32 %v6164_v38, 0.0 }
 0x1eb   :  { %v1284_v44 = vmax.f32 %v6165_v40, 0.0 }
 0x1ec   :  { %v1285_v46 = vmax.f32 %v6166_v42, 0.0 }
 0x1ed   :  { %v1314_v47 = vpack.c.bf16 %v1284_v44, %v1282_v43 }
 0x1ee   :  { %v1213_v48 = vpop.f32.mrb[4].mxu0  ;;  %v1315_v49 = vpack.c.bf16 %v1285_v46, %v1283_v45 }
 0x1ef   :  { %v6167_v50 = vadd.f32 %v1213_v48, %v7670_v33  ;;  %v1215_v51 = vpop.f32.mrb[5].mxu0 }
 0x1f0   :  { %v6168_v53 = vadd.f32 %v1215_v51, %v7673_v34  ;;  %v1217_v54 = vpop.f32.mrb[6].mxu0  ;;  %1491 = vmatprep.mubr.bf16.mxu1 %v1315_v49 }
 0x1f1   :  { %v6169_v55 = vadd.f32 %v1217_v54, %v7670_v33  ;;  %v1219_v56 = vpop.f32.mrb[7].mxu0  ;;  %1492 = vmatmul.mubr.bf16.vlgmr.msra.gmra.mrb[0].mxu1 %v1314_v47  ;;  %v1286_v58 = vmax.f32 %v6167_v50, 0.0 }
 0x1f2   :  { %v6170_v57 = vadd.f32 %v1219_v56, %v7673_v34  ;;  %5990 = vmatpush3.bf16.msra.mxu1 %v6459_v27  ;;  %v1287_v62 = vmax.f32 %v6168_v53, 0.0 }
 0x1f3   :  { %v1288_v59 = vmax.f32 %v6169_v55, 0.0  ;;  %5991 = vmatprep.subr.bf16.mxu1 %v6460_v52 }
 0x1f4   :  { %v1289_v63 = vmax.f32 %v6170_v57, 0.0 }
 0x1f5   :  { %v1316_v0 = vpack.c.bf16 %v1288_v59, %v1286_v58 }
 0x1f6   :  { %v1317_v1 = vpack.c.bf16 %v1289_v63, %v1287_v62  ;;  %v1223_v2 = vpop.f32.mrb[8].mxu0  ;;  %5992 = vmatpush3.bf16.msra.mxu1 %v6460_v52 }
 0x1f7   :  { %v6171_v3 = vadd.f32 %v1223_v2, %v7670_v33  ;;  %v1225_v4 = vpop.f32.mrb[9].mxu0  ;;  %5993 = vmatprep.subr.bf16.mxu1 %v6461_v60 }
 0x1f8   :  { %v6172_v6 = vadd.f32 %v1225_v4, %v7673_v34  ;;  %v1227_v7 = vpop.f32.mrb[10].mxu0  ;;  %1499 = vmatprep.mubr.bf16.mxu1 %v1317_v1 }
 0x1f9   :  { %v6173_v8 = vadd.f32 %v1227_v7, %v7670_v33  ;;  %v1229_v9 = vpop.f32.mrb[11].mxu0  ;;  %1500 = vmatmul.mubr.bf16.gmra.mrb[4].mxu1 %v1316_v0  ;;  %v1290_v11 = vmax.f32 %v6171_v3, 0.0 }
 0x1fa   :  { %v6174_v10 = vadd.f32 %v1229_v9, %v7673_v34  ;;  %5994 = vmatpush3.bf16.msra.mxu1 %v6461_v60  ;;  %v1291_v14 = vmax.f32 %v6172_v6, 0.0 }
 0x1fb   :  { %v1292_v12 = vmax.f32 %v6173_v8, 0.0  ;;  %5995 = vmatprep.subr.bf16.mxu1 %v6462_v5 }
 0x1fc   :  { %v1293_v15 = vmax.f32 %v6174_v10, 0.0 }
 0x1fd   :  { %v1318_v16 = vpack.c.bf16 %v1292_v12, %v1290_v11 }
 0x1fe   :  { %v1319_v17 = vpack.c.bf16 %v1293_v15, %v1291_v14  ;;  %v1233_v18 = vpop.f32.mrb[12].mxu0  ;;  %5996 = vmatpush3.bf16.msra.mxu1 %v6462_v5 }
 0x1ff   :  { %v6175_v19 = vadd.f32 %v1233_v18, %v7670_v33  ;;  %v1235_v20 = vpop.f32.mrb[13].mxu0  ;;  %5997 = vmatprep.subr.bf16.mxu1 %v6463_v13 }
 0x200   :  { %v6176_v22 = vadd.f32 %v1235_v20, %v7673_v34  ;;  %v1237_v23 = vpop.f32.mrb[14].mxu0  ;;  %1507 = vmatprep.mubr.bf16.mxu1 %v1319_v17 }
 0x201   :  { %v6177_v24 = vadd.f32 %v1237_v23, %v7670_v33  ;;  %v1239_v25 = vpop.f32.mrb[15].mxu0  ;;  %1508 = vmatmul.mubr.bf16.gmra.mrb[8].mxu1 %v1318_v16  ;;  %v1294_v27 = vmax.f32 %v6175_v19, 0.0 }
 0x202   :  { %v6178_v26 = vadd.f32 %v1239_v25, %v7673_v34  ;;  %5998 = vmatpush3.bf16.msra.mxu1 %v6463_v13  ;;  %v1295_v31 = vmax.f32 %v6176_v22, 0.0 }
 0x203   :  { %v1296_v28 = vmax.f32 %v6177_v24, 0.0  ;;  %5999 = vmatprep.subr.bf16.mxu1 %v6464_v21 }
 0x204   :  { %v1297_v35 = vmax.f32 %v6178_v26, 0.0 }
 0x205   :  { %v1320_v36 = vpack.c.bf16 %v1296_v28, %v1294_v27 }
 0x206   :  { %v1321_v37 = vpack.c.bf16 %v1297_v35, %v1295_v31  ;;  %v1243_v38 = vpop.f32.mrb[16].mxu0  ;;  %6000 = vmatpush3.bf16.msra.mxu1 %v6464_v21 }
 0x207   :  { %v6179_v39 = vadd.f32 %v1243_v38, %v7670_v33  ;;  %v1245_v40 = vpop.f32.mrb[17].mxu0  ;;  %v7731_v38 = vld [vmem:[#allocation2 + $0x1] ss:$0 sm:$0xff] }
 0x208   :  { %v6180_v41 = vadd.f32 %v1245_v40, %v7673_v34  ;;  %v1247_v42 = vpop.f32.mrb[18].mxu0  ;;  %1515 = vmatprep.mubr.bf16.mxu1 %v1321_v37 }
 0x209   :  { %v6181_v43 = vadd.f32 %v1247_v42, %v7670_v33  ;;  %v1249_v44 = vpop.f32.mrb[19].mxu0  ;;  %1516 = vmatmul.mubr.bf16.gmra.mrb[12].mxu1 %v1320_v36  ;;  %v1298_v46 = vmax.f32 %v6179_v39, 0.0  ;;  %v6465_v36 = vld [vmem:[%s9098_s2 + $0x160] ss:$8 sps:$4 sm:$0xff]  }
 0x20a   :  { %v6182_v45 = vadd.f32 %v1249_v44, %v7673_v34  ;;  %v1299_v48 = vmax.f32 %v6180_v41, 0.0  ;;  %6001 = vmatprep.subr.bf16.mxu1 %v6465_v36 }
 0x20b   :  { %v1300_v47 = vmax.f32 %v6181_v43, 0.0  ;;  %6002 = vmatpush3.bf16.msra.mxu1 %v6465_v36 }
 0x20c   :  { %v1301_v49 = vmax.f32 %v6182_v45, 0.0 }
 0x20d   :  { %v1322_v50 = vpack.c.bf16 %v1300_v47, %v1298_v46 }
 0x20e   :  { %v1323_v51 = vpack.c.bf16 %v1301_v49, %v1299_v48  ;;  %v1253_v52 = vpop.f32.mrb[20].mxu0 }
 0x20f   :  { %v6183_v53 = vadd.f32 %v1253_v52, %v7670_v33  ;;  %v1255_v54 = vpop.f32.mrb[21].mxu0 }
 0x210   :  { %v6184_v55 = vadd.f32 %v1255_v54, %v7673_v34  ;;  %v1257_v56 = vpop.f32.mrb[22].mxu0  ;;  %1523 = vmatprep.mubr.bf16.mxu1 %v1323_v51 }
 0x211   :  { %v6185_v57 = vadd.f32 %v1257_v56, %v7670_v33  ;;  %v1259_v58 = vpop.f32.mrb[23].mxu0  ;;  %1524 = vmatmul.mubr.bf16.gmra.mrb[16].mxu1 %v1322_v50  ;;  %v1302_v60 = vmax.f32 %v6183_v53, 0.0 }
 0x212   :  { %v6186_v59 = vadd.f32 %v1259_v58, %v7673_v34  ;;  %v1303_v63 = vmax.f32 %v6184_v55, 0.0 }
 0x213   :  { %v1304_v62 = vmax.f32 %v6185_v57, 0.0 }
 0x214   :  { %v1305_v0 = vmax.f32 %v6186_v59, 0.0 }
 0x215   :  { %v1324_v1 = vpack.c.bf16 %v1304_v62, %v1302_v60 }
 0x216   :  { %v1325_v2 = vpack.c.bf16 %v1305_v0, %v1303_v63  ;;  %v1263_v3 = vpop.f32.mrb[24].mxu0 }
 0x217   :  { %v6187_v4 = vadd.f32 %v1263_v3, %v7670_v33  ;;  %v1265_v5 = vpop.f32.mrb[25].mxu0 }
 0x218   :  { %v6188_v6 = vadd.f32 %v1265_v5, %v7673_v34  ;;  %v1267_v7 = vpop.f32.mrb[26].mxu0  ;;  %1531 = vmatprep.mubr.bf16.mxu1 %v1325_v2 }
 0x219   :  { %v6189_v8 = vadd.f32 %v1267_v7, %v7670_v33  ;;  %v1269_v9 = vpop.f32.mrb[27].mxu0  ;;  %1532 = vmatmul.mubr.bf16.gmra.mrb[20].mxu1 %v1324_v1  ;;  %v1306_v11 = vmax.f32 %v6187_v4, 0.0  ;;  %v6468_v1 = vld [vmem:[%s9098_s2 + $0x210] ss:$8 sps:$4 sm:$0xff]  }
 0x21a   :  { %v6190_v10 = vadd.f32 %v1269_v9, %v7673_v34  ;;  %v1307_v13 = vmax.f32 %v6188_v6, 0.0  ;;  %v6469_v6 = vld [vmem:[%s9098_s2 + $0x220] ss:$8 sps:$4 sm:$0xff]  }
 0x21b   :  { %v1308_v12 = vmax.f32 %v6189_v8, 0.0 }
 0x21c   :  { %v1309_v14 = vmax.f32 %v6190_v10, 0.0 }
 0x21d   :  { %v1326_v15 = vpack.c.bf16 %v1308_v12, %v1306_v11 }
 0x21e   :  { %v1327_v16 = vpack.c.bf16 %v1309_v14, %v1307_v13  ;;  %v1273_v17 = vpop.f32.mrb[28].mxu0 }
 0x21f   :  { %v6191_v18 = vadd.f32 %v1273_v17, %v7670_v33  ;;  %v1275_v19 = vpop.f32.mrb[29].mxu0 }
 0x220   :  { %v6192_v20 = vadd.f32 %v1275_v19, %v7673_v34  ;;  %v1277_v21 = vpop.f32.mrb[30].mxu0  ;;  %1539 = vmatprep.mubr.bf16.mxu1 %v1327_v16 }
 0x221   :  { %v6193_v22 = vadd.f32 %v1277_v21, %v7670_v33  ;;  %v1279_v23 = vpop.f32.mrb[31].mxu0  ;;  %1540 = vmatmul.mubr.bf16.gmra.mrb[24].mxu1 %v1326_v15  ;;  %v1310_v25 = vmax.f32 %v6191_v18, 0.0  ;;  %v6466_v33 = vld [vmem:[%s9098_s2 + $0x170] ss:$8 sps:$4 sm:$0xff]  }
 0x222   :  { %v6194_v24 = vadd.f32 %v1279_v23, %v7673_v34  ;;  %v1311_v27 = vmax.f32 %v6192_v20, 0.0  ;;  %6003 = vmatprep.subr.bf16.mxu1 %v6466_v33  ;;  %v6467_v34 = vld [vmem:[%s9098_s2 + $0x200] ss:$8 sps:$4 sm:$0xff]  }
 0x223   :  { %v1312_v26 = vmax.f32 %v6193_v22, 0.0  ;;  %6004 = vmatpush3.bf16.msra.mxu1 %v6466_v33 }
 0x224   :  { %v1313_v28 = vmax.f32 %v6194_v24, 0.0  ;;  %6021 = vmatprep.subr.bf16.mxu1 %v6467_v34 }
 0x225   :  { %v1328_v31 = vpack.c.bf16 %v1312_v26, %v1310_v25 }
 0x226   :  { %v1329_v35 = vpack.c.bf16 %v1313_v28, %v1311_v27 }
 0x228   :  { %1547 = vmatprep.mubr.bf16.mxu1 %v1329_v35 }
 0x229   :  { %1548 = vmatmul.mubr.bf16.gmra.mrb[28].mxu1 %v1328_v31 }
 0x2c4   :  { %v5790_v37 = vpop.f32.mrb[0].mxu1 }
 0x2c5   :  { %v5791_v39 = vpop.f32.mrb[1].mxu1 }
 0x2c6   :  { %v5792_v40 = vadd.f32 %v5791_v39, %v5790_v37  ;;  %v5793_v41 = vpop.f32.mrb[2].mxu1 }
 0x2c7   :  { %v5794_v42 = vpop.f32.mrb[3].mxu1 }
 0x2c8   :  { %v1494_v43 = vadd.f32 %v5792_v40, %v7731_v38  ;;  %v5795_v44 = vadd.f32 %v5794_v42, %v5793_v41 }
 0x2ca   :  { %v1497_v45 = vadd.f32 %v5795_v44, %v7731_v38  ;;  %v1556_v46 = vmax.f32 %v1494_v43, 0.0 }
 0x2cc   :  { %v1557_v47 = vmax.f32 %v1497_v45, 0.0  ;;  %v5796_v48 = vpop.f32.mrb[4].mxu1 }
 0x2cd   :  { %v5797_v49 = vpop.f32.mrb[5].mxu1 }
 0x2ce   :  { %v5798_v50 = vadd.f32 %v5797_v49, %v5796_v48  ;;  %v5799_v51 = vpop.f32.mrb[6].mxu1  ;;  %v1572_v52 = vpack.c.bf16 %v1557_v47, %v1556_v46 }
 0x2cf   :  { %v5800_v53 = vpop.f32.mrb[7].mxu1 }
 0x2d0   :  { %v1502_v54 = vadd.f32 %v5798_v50, %v7731_v38  ;;  %v5801_v55 = vadd.f32 %v5800_v53, %v5799_v51  ;;  %6005 = vmatprep.mubr.bf16.mxu1 %v1572_v52 }
 0x2d2   :  { %v1505_v56 = vadd.f32 %v5801_v55, %v7731_v38  ;;  %v1558_v57 = vmax.f32 %v1502_v54, 0.0 }
 0x2d4   :  { %v1559_v58 = vmax.f32 %v1505_v56, 0.0  ;;  %v5802_v59 = vpop.f32.mrb[8].mxu1 }
 0x2d5   :  { %v5803_v60 = vpop.f32.mrb[9].mxu1 }
 0x2d6   :  { %v1573_v62 = vpack.c.bf16 %v1559_v58, %v1558_v57  ;;  %v5804_v63 = vadd.f32 %v5803_v60, %v5802_v59  ;;  %v5805_v0 = vpop.f32.mrb[10].mxu1 }
 0x2d7   :  { %v5806_v2 = vpop.f32.mrb[11].mxu1 }
 0x2d8   :  { %v1510_v3 = vadd.f32 %v5804_v63, %v7731_v38  ;;  %v5807_v4 = vadd.f32 %v5806_v2, %v5805_v0  ;;  %6006 = vmatmul.mubr.bf16.vlgmr.msra.gmra.mrb[32].mxu1 %v1573_v62 }
 0x2d9   :  { %6022 = vmatpush3.bf16.msra.mxu1 %v6467_v34 }
 0x2da   :  { %v1513_v5 = vadd.f32 %v5807_v4, %v7731_v38  ;;  %6023 = vmatprep.subr.bf16.mxu1 %v6468_v1  ;;  %v1560_v7 = vmax.f32 %v1510_v3, 0.0 }
 0x2dc   :  { %v1561_v8 = vmax.f32 %v1513_v5, 0.0  ;;  %v5808_v9 = vpop.f32.mrb[12].mxu1 }
 0x2dd   :  { %v5809_v10 = vpop.f32.mrb[13].mxu1  ;;  %6024 = vmatpush3.bf16.msra.mxu1 %v6468_v1 }
 0x2de   :  { %v5810_v11 = vadd.f32 %v5809_v10, %v5808_v9  ;;  %v5811_v12 = vpop.f32.mrb[14].mxu1  ;;  %v1574_v13 = vpack.c.bf16 %v1561_v8, %v1560_v7  ;;  %6025 = vmatprep.subr.bf16.mxu1 %v6469_v6  ;;  %v6471_v7 = vld [vmem:[%s9098_s2 + $0x300] ss:$8 sps:$4 sm:$0xff]  }
 0x2df   :  { %v5812_v14 = vpop.f32.mrb[15].mxu1  ;;  %v1597_v8 = vld [vmem:[#allocation2 + $0x2] ss:$0 sm:$0xff] }
 0x2e0   :  { %v1518_v15 = vadd.f32 %v5810_v11, %v7731_v38  ;;  %v5813_v16 = vadd.f32 %v5812_v14, %v5811_v12  ;;  %6009 = vmatprep.mubr.bf16.mxu1 %v1574_v13 }
 0x2e1   :  { %6026 = vmatpush3.bf16.msra.mxu1 %v6469_v6  ;;  %v6470_v6 = vld [vmem:[%s9098_s2 + $0x230] ss:$8 sps:$4 sm:$0xff]  }
 0x2e2   :  { %v1521_v17 = vadd.f32 %v5813_v16, %v7731_v38  ;;  %v1562_v18 = vmax.f32 %v1518_v15, 0.0  ;;  %6027 = vmatprep.subr.bf16.mxu1 %v6470_v6 }
 0x2e4   :  { %v1563_v19 = vmax.f32 %v1521_v17, 0.0  ;;  %v5814_v20 = vpop.f32.mrb[16].mxu1 }
 0x2e5   :  { %v5815_v21 = vpop.f32.mrb[17].mxu1  ;;  %6028 = vmatpush3.bf16.msra.mxu1 %v6470_v6  ;;  %v6473_v6 = vld [vmem:[%s9098_s2 + $0x400] ss:$8 sps:$4 sm:$0xff]  }
 0x2e6   :  { %v5816_v22 = vadd.f32 %v5815_v21, %v5814_v20  ;;  %v5817_v23 = vpop.f32.mrb[18].mxu1  ;;  %v1575_v24 = vpack.c.bf16 %v1563_v19, %v1562_v18  ;;  %6045 = vmatprep.subr.bf16.mxu1 %v6471_v7 }
 0x2e7   :  { %v5818_v25 = vpop.f32.mrb[19].mxu1 }
 0x2e8   :  { %v1526_v26 = vadd.f32 %v5816_v22, %v7731_v38  ;;  %v5819_v27 = vadd.f32 %v5818_v25, %v5817_v23  ;;  %6010 = vmatmul.mubr.bf16.gmra.mrb[36].mxu1 %v1575_v24  ;;  %v6472_v22 = vld [vmem:[%s9098_s2 + $0x310] ss:$8 sps:$4 sm:$0xff]  }
 0x2ea   :  { %v1529_v28 = vadd.f32 %v5819_v27, %v7731_v38  ;;  %v1564_v31 = vmax.f32 %v1526_v26, 0.0 }
 0x2ec   :  { %v1565_v35 = vmax.f32 %v1529_v28, 0.0  ;;  %v5820_v36 = vpop.f32.mrb[20].mxu1 }
 0x2ed   :  { %v5821_v33 = vpop.f32.mrb[21].mxu1 }
 0x2ee   :  { %v5822_v34 = vadd.f32 %v5821_v33, %v5820_v36  ;;  %v5823_v37 = vpop.f32.mrb[22].mxu1  ;;  %v1576_v39 = vpack.c.bf16 %v1565_v35, %v1564_v31 }
 0x2ef   :  { %v5824_v40 = vpop.f32.mrb[23].mxu1 }
 0x2f0   :  { %v1534_v41 = vadd.f32 %v5822_v34, %v7731_v38  ;;  %v5825_v42 = vadd.f32 %v5824_v40, %v5823_v37  ;;  %6013 = vmatprep.mubr.bf16.mxu1 %v1576_v39 }
 0x2f2   :  { %v1537_v43 = vadd.f32 %v5825_v42, %v7731_v38  ;;  %v1566_v44 = vmax.f32 %v1534_v41, 0.0 }
 0x2f4   :  { %v1567_v45 = vmax.f32 %v1537_v43, 0.0  ;;  %v5826_v46 = vpop.f32.mrb[24].mxu1 }
 0x2f5   :  { %v5827_v47 = vpop.f32.mrb[25].mxu1 }
 0x2f6   :  { %v5828_v48 = vadd.f32 %v5827_v47, %v5826_v46  ;;  %v5829_v49 = vpop.f32.mrb[26].mxu1  ;;  %v1577_v50 = vpack.c.bf16 %v1567_v45, %v1566_v44 }
 0x2f7   :  { %v5830_v51 = vpop.f32.mrb[27].mxu1 }
 0x2f8   :  { %v1542_v52 = vadd.f32 %v5828_v48, %v7731_v38  ;;  %v5831_v53 = vadd.f32 %v5830_v51, %v5829_v49  ;;  %6014 = vmatmul.mubr.bf16.gmra.mrb[40].mxu1 %v1577_v50 }
 0x2fa   :  { %v1545_v54 = vadd.f32 %v5831_v53, %v7731_v38  ;;  %v1568_v55 = vmax.f32 %v1542_v52, 0.0 }
 0x2fc   :  { %v1569_v56 = vmax.f32 %v1545_v54, 0.0  ;;  %v5832_v57 = vpop.f32.mrb[28].mxu1 }
 0x2fd   :  { %v5833_v58 = vpop.f32.mrb[29].mxu1 }
 0x2fe   :  { %v5834_v59 = vadd.f32 %v5833_v58, %v5832_v57  ;;  %v5835_v60 = vpop.f32.mrb[30].mxu1  ;;  %v1578_v62 = vpack.c.bf16 %v1569_v56, %v1568_v55 }
 0x2ff   :  { %v5836_v63 = vpop.f32.mrb[31].mxu1 }
 0x300   :  { %v1550_v0 = vadd.f32 %v5834_v59, %v7731_v38  ;;  %v5837_v1 = vadd.f32 %v5836_v63, %v5835_v60  ;;  %6017 = vmatprep.mubr.bf16.mxu1 %v1578_v62 }
 0x302   :  { %v1553_v2 = vadd.f32 %v5837_v1, %v7731_v38  ;;  %v1570_v3 = vmax.f32 %v1550_v0, 0.0 }
 0x304   :  { %v1571_v4 = vmax.f32 %v1553_v2, 0.0 }
 0x306   :  { %v1579_v5 = vpack.c.bf16 %v1571_v4, %v1570_v3 }
 0x308   :  { %6018 = vmatmul.mubr.bf16.gmra.mrb[44].mxu1 %v1579_v5 }
 0x3ab   :  { %v6007_v9 = vpop.f32.mrb[32].mxu1 }
 0x3ac   :  { %v1689_v10 = vadd.f32 %v6007_v9, %v1597_v8  ;;  %v1680_v11 = vpop.f32.mrb[33].mxu1 }
 0x3ad   :  { %v1681_v38 = vadd.f32 %v1680_v11, %v1597_v8  ;;  %v6008_v12 = vpop.f32.mrb[34].mxu1 }
 0x3ae   :  { %v1692_v13 = vadd.f32 %v6008_v12, %v1597_v8  ;;  %v1683_v14 = vpop.f32.mrb[35].mxu1  ;;  %v1745_v16 = vmax.f32 %v1689_v10, 0.0 }
 0x3af   :  { %v1684_v15 = vadd.f32 %v1683_v14, %v1597_v8  ;;  %v1743_v18 = vmax.f32 %v1681_v38, 0.0 }
 0x3b0   :  { %v1746_v17 = vmax.f32 %v1692_v13, 0.0 }
 0x3b1   :  { %v1744_v19 = vmax.f32 %v1684_v15, 0.0 }
 0x3b2   :  { %v1760_v20 = vpack.c.bf16 %v1746_v17, %v1745_v16 }
 0x3b3   :  { %v1759_v21 = vpack.c.bf16 %v1744_v19, %v1743_v18 }
 0x3b5   :  { %6029 = vmatprep.mubr.msk.bf16.mxu1 %vm1801_vm1, %v1759_v21 }
 0x3b6   :  { %6030 = vmatmul.mubr.msk.bf16.vlgmr.msra.gmra.mrb[48].mxu1 %vm1801_vm1, %v1760_v20 }
 0x3b7   :  { %6046 = vmatpush3.bf16.msra.mxu1 %v6471_v7  ;;  %v1776_v7 = vld [vmem:[#allocation2 + $0x3] ss:$0 sm:$0xff] }
 0x3b8   :  { %6047 = vmatprep.subr.bf16.mxu1 %v6472_v22 }
 0x3bb   :  { %v6011_v23 = vpop.f32.mrb[36].mxu1  ;;  %6048 = vmatpush3.bf16.msra.mxu1 %v6472_v22 }
 0x3bc   :  { %v1705_v24 = vadd.f32 %v6011_v23, %v1597_v8  ;;  %v1696_v25 = vpop.f32.mrb[37].mxu1  ;;  %6065 = vmatprep.subr.bf16.mxu1 %v6473_v6 }
 0x3bd   :  { %v1697_v26 = vadd.f32 %v1696_v25, %v1597_v8  ;;  %v6012_v27 = vpop.f32.mrb[38].mxu1 }
 0x3be   :  { %v1708_v28 = vadd.f32 %v6012_v27, %v1597_v8  ;;  %v1699_v31 = vpop.f32.mrb[39].mxu1  ;;  %v1749_v36 = vmax.f32 %v1705_v24, 0.0 }
 0x3bf   :  { %v1700_v35 = vadd.f32 %v1699_v31, %v1597_v8  ;;  %v1747_v34 = vmax.f32 %v1697_v26, 0.0 }
 0x3c0   :  { %v1750_v33 = vmax.f32 %v1708_v28, 0.0 }
 0x3c1   :  { %v1748_v37 = vmax.f32 %v1700_v35, 0.0 }
 0x3c2   :  { %v1762_v39 = vpack.c.bf16 %v1750_v33, %v1749_v36 }
 0x3c3   :  { %v1761_v40 = vpack.c.bf16 %v1748_v37, %v1747_v34 }
 0x3c5   :  { %6033 = vmatprep.mubr.msk.bf16.mxu1 %vm1801_vm1, %v1761_v40 }
 0x3c6   :  { %6034 = vmatmul.mubr.msk.bf16.gmra.mrb[52].mxu1 %vm1801_vm1, %v1762_v39 }
 0x3cb   :  { %v6015_v41 = vpop.f32.mrb[40].mxu1 }
 0x3cc   :  { %v1721_v42 = vadd.f32 %v6015_v41, %v1597_v8  ;;  %v1712_v43 = vpop.f32.mrb[41].mxu1 }
 0x3cd   :  { %v1713_v44 = vadd.f32 %v1712_v43, %v1597_v8  ;;  %v6016_v45 = vpop.f32.mrb[42].mxu1 }
 0x3ce   :  { %v1724_v46 = vadd.f32 %v6016_v45, %v1597_v8  ;;  %v1715_v47 = vpop.f32.mrb[43].mxu1  ;;  %v1753_v49 = vmax.f32 %v1721_v42, 0.0 }
 0x3cf   :  { %v1716_v48 = vadd.f32 %v1715_v47, %v1597_v8  ;;  %v1751_v51 = vmax.f32 %v1713_v44, 0.0 }
 0x3d0   :  { %v1754_v50 = vmax.f32 %v1724_v46, 0.0 }
 0x3d1   :  { %v1752_v52 = vmax.f32 %v1716_v48, 0.0 }
 0x3d2   :  { %v1764_v53 = vpack.c.bf16 %v1754_v50, %v1753_v49 }
 0x3d3   :  { %v1763_v54 = vpack.c.bf16 %v1752_v52, %v1751_v51 }
 0x3d5   :  { %6037 = vmatprep.mubr.msk.bf16.mxu1 %vm1801_vm1, %v1763_v54 }
 0x3d6   :  { %6038 = vmatmul.mubr.msk.bf16.gmra.mrb[56].mxu1 %vm1801_vm1, %v1764_v53 }
 0x3db   :  { %v6019_v55 = vpop.f32.mrb[44].mxu1 }
 0x3dc   :  { %v1737_v56 = vadd.f32 %v6019_v55, %v1597_v8  ;;  %v1728_v57 = vpop.f32.mrb[45].mxu1 }
 0x3dd   :  { %v1729_v58 = vadd.f32 %v1728_v57, %v1597_v8  ;;  %v6020_v59 = vpop.f32.mrb[46].mxu1 }
 0x3de   :  { %v1740_v60 = vadd.f32 %v6020_v59, %v1597_v8  ;;  %v1731_v62 = vpop.f32.mrb[47].mxu1  ;;  %v1757_v0 = vmax.f32 %v1737_v56, 0.0 }
 0x3df   :  { %v1732_v63 = vadd.f32 %v1731_v62, %v1597_v8  ;;  %v1755_v2 = vmax.f32 %v1729_v58, 0.0 }
 0x3e0   :  { %v1758_v1 = vmax.f32 %v1740_v60, 0.0 }
 0x3e1   :  { %v1756_v3 = vmax.f32 %v1732_v63, 0.0 }
 0x3e2   :  { %v1766_v4 = vpack.c.bf16 %v1758_v1, %v1757_v0 }
 0x3e3   :  { %v1765_v5 = vpack.c.bf16 %v1756_v3, %v1755_v2 }
 0x3e5   :  { %6041 = vmatprep.mubr.msk.bf16.mxu1 %vm1801_vm1, %v1765_v5 }
 0x3e6   :  { %6042 = vmatmul.mubr.msk.bf16.gmra.mrb[60].mxu1 %vm1801_vm1, %v1766_v4  ;;  %v5448_v4 = vld [vmem:[%s9098_s2 + $0x500] sm:$0xf] }
 0x3e7   :  { %v2312_v5 = vsel %vm2310_vm3, %v5448_v4, 0 }
 0x489   :  { %v6031_v9 = vpop.f32.mrb[48].mxu1 }
 0x48a   :  { %v1869_v10 = vadd.f32 %v6031_v9, %v1776_v7  ;;  %v1860_v11 = vpop.f32.mrb[49].mxu1 }
 0x48b   :  { %v1861_v8 = vadd.f32 %v1860_v11, %v1776_v7  ;;  %v6032_v38 = vpop.f32.mrb[50].mxu1 }
 0x48c   :  { %v1872_v12 = vadd.f32 %v6032_v38, %v1776_v7  ;;  %v1863_v13 = vpop.f32.mrb[51].mxu1  ;;  %v1925_v15 = vmax.f32 %v1869_v10, 0.0 }
 0x48d   :  { %v1864_v14 = vadd.f32 %v1863_v13, %v1776_v7  ;;  %v1923_v17 = vmax.f32 %v1861_v8, 0.0 }
 0x48e   :  { %v1926_v16 = vmax.f32 %v1872_v12, 0.0 }
 0x48f   :  { %v1924_v18 = vmax.f32 %v1864_v14, 0.0 }
 0x490   :  { %v1940_v19 = vpack.c.bf16 %v1926_v16, %v1925_v15 }
 0x491   :  { %v1939_v20 = vpack.c.bf16 %v1924_v18, %v1923_v17 }
 0x493   :  { %6049 = vmatprep.mubr.msk.bf16.mxu1 %vm1965_vm2, %v1939_v20 }
 0x494   :  { %6050 = vmatmul.mubr.msk.bf16.vlgmr.msra.gmra.mrb[64].mxu1 %vm1965_vm2, %v1940_v19 }
 0x495   :  { %6066 = vmatpush3.bf16.msra.mxu1 %v6473_v6  ;;  %v1952_v6 = vld [vmem:[#allocation2 + $0x4] ss:$0 sm:$0xff] }
 0x496   :  { %6291 = vmatprep.subr.msk.bf16.mxu1 %vm2310_vm3, %v5448_v4  ;;  %v7797_v4 = vld [vmem:[#allocation2 + $0x5] ss:$0 sm:$0xff] }
 0x499   :  { %v6035_v21 = vpop.f32.mrb[52].mxu1 }
 0x49a   :  { %v1885_v22 = vadd.f32 %v6035_v21, %v1776_v7  ;;  %v1876_v23 = vpop.f32.mrb[53].mxu1 }
 0x49b   :  { %v1877_v24 = vadd.f32 %v1876_v23, %v1776_v7  ;;  %v6036_v25 = vpop.f32.mrb[54].mxu1 }
 0x49c   :  { %v1888_v26 = vadd.f32 %v6036_v25, %v1776_v7  ;;  %v1879_v27 = vpop.f32.mrb[55].mxu1  ;;  %v1929_v31 = vmax.f32 %v1885_v22, 0.0 }
 0x49d   :  { %v1880_v28 = vadd.f32 %v1879_v27, %v1776_v7  ;;  %v1927_v36 = vmax.f32 %v1877_v24, 0.0 }
 0x49e   :  { %v1930_v35 = vmax.f32 %v1888_v26, 0.0 }
 0x49f   :  { %v1928_v33 = vmax.f32 %v1880_v28, 0.0 }
 0x4a0   :  { %v1942_v34 = vpack.c.bf16 %v1930_v35, %v1929_v31 }
 0x4a1   :  { %v1941_v37 = vpack.c.bf16 %v1928_v33, %v1927_v36 }
 0x4a3   :  { %6053 = vmatprep.mubr.msk.bf16.mxu1 %vm1965_vm2, %v1941_v37 }
 0x4a4   :  { %6054 = vmatmul.mubr.msk.bf16.gmra.mrb[68].mxu1 %vm1965_vm2, %v1942_v34 }
 0x4a9   :  { %v6039_v39 = vpop.f32.mrb[56].mxu1 }
 0x4aa   :  { %v1901_v40 = vadd.f32 %v6039_v39, %v1776_v7  ;;  %v1892_v41 = vpop.f32.mrb[57].mxu1 }
 0x4ab   :  { %v1893_v42 = vadd.f32 %v1892_v41, %v1776_v7  ;;  %v6040_v43 = vpop.f32.mrb[58].mxu1 }
 0x4ac   :  { %v1904_v44 = vadd.f32 %v6040_v43, %v1776_v7  ;;  %v1895_v45 = vpop.f32.mrb[59].mxu1  ;;  %v1933_v47 = vmax.f32 %v1901_v40, 0.0 }
 0x4ad   :  { %v1896_v46 = vadd.f32 %v1895_v45, %v1776_v7  ;;  %v1931_v49 = vmax.f32 %v1893_v42, 0.0 }
 0x4ae   :  { %v1934_v48 = vmax.f32 %v1904_v44, 0.0 }
 0x4af   :  { %v1932_v50 = vmax.f32 %v1896_v46, 0.0 }
 0x4b0   :  { %v1944_v51 = vpack.c.bf16 %v1934_v48, %v1933_v47 }
 0x4b1   :  { %v1943_v52 = vpack.c.bf16 %v1932_v50, %v1931_v49 }
 0x4b3   :  { %6057 = vmatprep.mubr.msk.bf16.mxu1 %vm1965_vm2, %v1943_v52 }
 0x4b4   :  { %6058 = vmatmul.mubr.msk.bf16.gmra.mrb[72].mxu1 %vm1965_vm2, %v1944_v51 }
 0x4b9   :  { %v6043_v53 = vpop.f32.mrb[60].mxu1 }
 0x4ba   :  { %v1917_v54 = vadd.f32 %v6043_v53, %v1776_v7  ;;  %v1908_v55 = vpop.f32.mrb[61].mxu1 }
 0x4bb   :  { %v1909_v56 = vadd.f32 %v1908_v55, %v1776_v7  ;;  %v6044_v57 = vpop.f32.mrb[62].mxu1 }
 0x4bc   :  { %v1920_v58 = vadd.f32 %v6044_v57, %v1776_v7  ;;  %v1911_v59 = vpop.f32.mrb[63].mxu1  ;;  %v1937_v62 = vmax.f32 %v1917_v54, 0.0 }
 0x4bd   :  { %v1912_v60 = vadd.f32 %v1911_v59, %v1776_v7  ;;  %v1935_v0 = vmax.f32 %v1909_v56, 0.0 }
 0x4be   :  { %v1938_v63 = vmax.f32 %v1920_v58, 0.0 }
 0x4bf   :  { %v1936_v1 = vmax.f32 %v1912_v60, 0.0 }
 0x4c0   :  { %v1946_v2 = vpack.c.bf16 %v1938_v63, %v1937_v62 }
 0x4c1   :  { %v1945_v3 = vpack.c.bf16 %v1936_v1, %v1935_v0 }
 0x4c3   :  { %6061 = vmatprep.mubr.msk.bf16.mxu1 %vm1965_vm2, %v1945_v3  ;;  %v6474_v3 = vld [vmem:[%s9098_s2 + $0x600] ss:$8 sps:$4 sm:$0xff]  }
 0x4c4   :  { %6062 = vmatmul.mubr.msk.bf16.gmra.mrb[76].mxu1 %vm1965_vm2, %v1946_v2 }
 0x567   :  { %v6051_v9 = vpop.f32.mrb[64].mxu1 }
 0x568   :  { %v2033_v7 = vadd.f32 %v6051_v9, %v1952_v6  ;;  %v2024_v10 = vpop.f32.mrb[65].mxu1 }
 0x569   :  { %v2025_v11 = vadd.f32 %v2024_v10, %v1952_v6  ;;  %v6052_v8 = vpop.f32.mrb[66].mxu1 }
 0x56a   :  { %v2036_v38 = vadd.f32 %v6052_v8, %v1952_v6  ;;  %v2027_v12 = vpop.f32.mrb[67].mxu1  ;;  %v2089_v14 = vmax.f32 %v2033_v7, 0.0 }
 0x56b   :  { %v2028_v13 = vadd.f32 %v2027_v12, %v1952_v6  ;;  %v2087_v16 = vmax.f32 %v2025_v11, 0.0 }
 0x56c   :  { %v2090_v15 = vmax.f32 %v2036_v38, 0.0 }
 0x56d   :  { %v2088_v17 = vmax.f32 %v2028_v13, 0.0 }
 0x56e   :  { %v2104_v18 = vpack.c.bf16 %v2090_v15, %v2089_v14 }
 0x56f   :  { %v2103_v19 = vpack.c.bf16 %v2088_v17, %v2087_v16 }
 0x571   :  { %6067 = vmatprep.mubr.msk.bf16.mxu1 %vm805_vm0, %v2103_v19 }
 0x572   :  { %6068 = vmatmul.mubr.msk.bf16.vlgmr.msra.gmra.mrb[80].mxu1 %vm805_vm0, %v2104_v18 }
 0x573   :  { %6084 = vmatpush3.bf16.msra.mxu1 %v2312_v5 }
 0x574   :  { %6101 = vmatprep.subr.bf16.mxu1 %v6474_v3 }
 0x577   :  { %v6055_v20 = vpop.f32.mrb[68].mxu1 }
 0x578   :  { %v2049_v21 = vadd.f32 %v6055_v20, %v1952_v6  ;;  %v2040_v22 = vpop.f32.mrb[69].mxu1 }
 0x579   :  { %v2041_v23 = vadd.f32 %v2040_v22, %v1952_v6  ;;  %v6056_v24 = vpop.f32.mrb[70].mxu1 }
 0x57a   :  { %v2052_v25 = vadd.f32 %v6056_v24, %v1952_v6  ;;  %v2043_v26 = vpop.f32.mrb[71].mxu1  ;;  %v2093_v28 = vmax.f32 %v2049_v21, 0.0 }
 0x57b   :  { %v2044_v27 = vadd.f32 %v2043_v26, %v1952_v6  ;;  %v2091_v35 = vmax.f32 %v2041_v23, 0.0 }
 0x57c   :  { %v2094_v31 = vmax.f32 %v2052_v25, 0.0 }
 0x57d   :  { %v2092_v36 = vmax.f32 %v2044_v27, 0.0 }
 0x57e   :  { %v2106_v33 = vpack.c.bf16 %v2094_v31, %v2093_v28 }
 0x57f   :  { %v2105_v34 = vpack.c.bf16 %v2092_v36, %v2091_v35 }
 0x581   :  { %6071 = vmatprep.mubr.msk.bf16.mxu1 %vm805_vm0, %v2105_v34 }
 0x582   :  { %6072 = vmatmul.mubr.msk.bf16.gmra.mrb[84].mxu1 %vm805_vm0, %v2106_v33 }
 0x587   :  { %v6059_v37 = vpop.f32.mrb[72].mxu1 }
 0x588   :  { %v2065_v39 = vadd.f32 %v6059_v37, %v1952_v6  ;;  %v2056_v40 = vpop.f32.mrb[73].mxu1 }
 0x589   :  { %v2057_v41 = vadd.f32 %v2056_v40, %v1952_v6  ;;  %v6060_v42 = vpop.f32.mrb[74].mxu1 }
 0x58a   :  { %v2068_v43 = vadd.f32 %v6060_v42, %v1952_v6  ;;  %v2059_v44 = vpop.f32.mrb[75].mxu1  ;;  %v2097_v46 = vmax.f32 %v2065_v39, 0.0 }
 0x58b   :  { %v2060_v45 = vadd.f32 %v2059_v44, %v1952_v6  ;;  %v2095_v48 = vmax.f32 %v2057_v41, 0.0 }
 0x58c   :  { %v2098_v47 = vmax.f32 %v2068_v43, 0.0 }
 0x58d   :  { %v2096_v49 = vmax.f32 %v2060_v45, 0.0 }
 0x58e   :  { %v2108_v50 = vpack.c.bf16 %v2098_v47, %v2097_v46 }
 0x58f   :  { %v2107_v51 = vpack.c.bf16 %v2096_v49, %v2095_v48 }
 0x591   :  { %6075 = vmatprep.mubr.msk.bf16.mxu1 %vm805_vm0, %v2107_v51 }
 0x592   :  { %6076 = vmatmul.mubr.msk.bf16.gmra.mrb[88].mxu1 %vm805_vm0, %v2108_v50 }
 0x597   :  { %v6063_v52 = vpop.f32.mrb[76].mxu1 }
 0x598   :  { %v2081_v53 = vadd.f32 %v6063_v52, %v1952_v6  ;;  %v2072_v54 = vpop.f32.mrb[77].mxu1 }
 0x599   :  { %v2073_v55 = vadd.f32 %v2072_v54, %v1952_v6  ;;  %v6064_v56 = vpop.f32.mrb[78].mxu1 }
 0x59a   :  { %v2084_v57 = vadd.f32 %v6064_v56, %v1952_v6  ;;  %v2075_v58 = vpop.f32.mrb[79].mxu1  ;;  %v2101_v60 = vmax.f32 %v2081_v53, 0.0 }
 0x59b   :  { %v2076_v59 = vadd.f32 %v2075_v58, %v1952_v6  ;;  %v2099_v63 = vmax.f32 %v2073_v55, 0.0 }
 0x59c   :  { %v2102_v62 = vmax.f32 %v2084_v57, 0.0 }
 0x59d   :  { %v2100_v0 = vmax.f32 %v2076_v59, 0.0 }
 0x59e   :  { %v2110_v1 = vpack.c.bf16 %v2102_v62, %v2101_v60 }
 0x59f   :  { %v2109_v2 = vpack.c.bf16 %v2100_v0, %v2099_v63 }
 0x5a1   :  { %6079 = vmatprep.mubr.msk.bf16.mxu1 %vm805_vm0, %v2109_v2  ;;  %v2285_v2 = vld [vmem:[#allocation2 + $0x6] ss:$0 sm:$0xff] }
 0x5a2   :  { %6080 = vmatmul.mubr.msk.bf16.gmra.mrb[92].mxu1 %vm805_vm0, %v2110_v1  ;;  %v6475_v1 = vld [vmem:[%s9098_s2 + $0x700] ss:$8 sps:$4 sm:$0xff]  }
 0x645   :  { %v6069_v5 = vpop.f32.mrb[80].mxu1 }
 0x646   :  { %v2188_v6 = vadd.f32 %v6069_v5, %v7797_v4  ;;  %v2179_v9 = vpop.f32.mrb[81].mxu1 }
 0x647   :  { %v2180_v7 = vadd.f32 %v2179_v9, %v7797_v4  ;;  %v6070_v10 = vpop.f32.mrb[82].mxu1 }
 0x648   :  { %v2244_v11 = vmax.f32 %v2188_v6, 0.0  ;;  %v2191_v8 = vadd.f32 %v6070_v10, %v7797_v4  ;;  %v2182_v38 = vpop.f32.mrb[83].mxu1 }
 0x649   :  { %v2242_v12 = vmax.f32 %v2180_v7, 0.0  ;;  %v2183_v13 = vadd.f32 %v2182_v38, %v7797_v4 }
 0x64a   :  { %2261 = vst.msk [vmem:[%s9101_s5 + $0x10] sm:$0xff] %vm2258_vm4, %v2244_v11  ;;  %v2245_v14 = vmax.f32 %v2191_v8, 0.0 }
 0x64b   :  { %2259 = vst.msk [vmem:[%s9101_s5] sm:$0xff] %vm2258_vm4, %v2242_v12  ;;  %v2243_v15 = vmax.f32 %v2183_v13, 0.0 }
 0x64c   :  { %2262 = vst.msk [vmem:[%s9101_s5 + $0x18] sm:$0xff] %vm2258_vm4, %v2245_v14  ;;  %v2276_v16 = vpack.c.bf16 %v2245_v14, %v2244_v11 }
 0x64d   :  { %2260 = vst.msk [vmem:[%s9101_s5 + $0x8] sm:$0xff] %vm2258_vm4, %v2243_v15  ;;  %v2275_v17 = vpack.c.bf16 %v2243_v15, %v2242_v12 }
 0x64f   :  { %6085 = vmatprep.mubr.msk.bf16.mxu1 %vm2258_vm4, %v2275_v17 }
 0x650   :  { %6086 = vmatmul.mubr.msk.bf16.vlgmr.msra.gmra.mrb[96].mxu1 %vm2258_vm4, %v2276_v16  ;;  %v6476_v16 = vld [vmem:[%s9098_s2 + $0x710] ss:$8 sps:$4 sm:$0xff]  }
 0x651   :  { %6102 = vmatpush3.bf16.msra.mxu1 %v6474_v3 }
 0x652   :  { %6119 = vmatprep.subr.bf16.mxu1 %v6475_v1 }
 0x655   :  { %v6073_v18 = vpop.f32.mrb[84].mxu1 }
 0x656   :  { %v2204_v19 = vadd.f32 %v6073_v18, %v7797_v4  ;;  %v2195_v20 = vpop.f32.mrb[85].mxu1 }
 0x657   :  { %v2196_v21 = vadd.f32 %v2195_v20, %v7797_v4  ;;  %v6074_v22 = vpop.f32.mrb[86].mxu1 }
 0x658   :  { %v2248_v23 = vmax.f32 %v2204_v19, 0.0  ;;  %v2207_v24 = vadd.f32 %v6074_v22, %v7797_v4  ;;  %v2198_v25 = vpop.f32.mrb[87].mxu1 }
 0x659   :  { %v2246_v26 = vmax.f32 %v2196_v21, 0.0  ;;  %v2199_v27 = vadd.f32 %v2198_v25, %v7797_v4 }
 0x65a   :  { %2265 = vst.msk [vmem:[%s9101_s5 + $0x30] sm:$0xff] %vm2258_vm4, %v2248_v23  ;;  %v2249_v28 = vmax.f32 %v2207_v24, 0.0 }
 0x65b   :  { %2263 = vst.msk [vmem:[%s9101_s5 + $0x20] sm:$0xff] %vm2258_vm4, %v2246_v26  ;;  %v2247_v31 = vmax.f32 %v2199_v27, 0.0 }
 0x65c   :  { %2266 = vst.msk [vmem:[%s9101_s5 + $0x38] sm:$0xff] %vm2258_vm4, %v2249_v28  ;;  %v2278_v35 = vpack.c.bf16 %v2249_v28, %v2248_v23 }
 0x65d   :  { %2264 = vst.msk [vmem:[%s9101_s5 + $0x28] sm:$0xff] %vm2258_vm4, %v2247_v31  ;;  %v2277_v36 = vpack.c.bf16 %v2247_v31, %v2246_v26 }
 0x65f   :  { %6089 = vmatprep.mubr.msk.bf16.mxu1 %vm2258_vm4, %v2277_v36 }
 0x660   :  { %6090 = vmatmul.mubr.msk.bf16.gmra.mrb[100].mxu1 %vm2258_vm4, %v2278_v35 }
 0x665   :  { %v6077_v33 = vpop.f32.mrb[88].mxu1 }
 0x666   :  { %v2220_v34 = vadd.f32 %v6077_v33, %v7797_v4  ;;  %v2211_v37 = vpop.f32.mrb[89].mxu1 }
 0x667   :  { %v2212_v39 = vadd.f32 %v2211_v37, %v7797_v4  ;;  %v6078_v40 = vpop.f32.mrb[90].mxu1 }
 0x668   :  { %v2252_v41 = vmax.f32 %v2220_v34, 0.0  ;;  %v2223_v42 = vadd.f32 %v6078_v40, %v7797_v4  ;;  %v2214_v43 = vpop.f32.mrb[91].mxu1 }
 0x669   :  { %v2250_v44 = vmax.f32 %v2212_v39, 0.0  ;;  %v2215_v45 = vadd.f32 %v2214_v43, %v7797_v4 }
 0x66a   :  { %2269 = vst.msk [vmem:[%s9101_s5 + $0x50] sm:$0xff] %vm2258_vm4, %v2252_v41  ;;  %v2253_v46 = vmax.f32 %v2223_v42, 0.0 }
 0x66b   :  { %2267 = vst.msk [vmem:[%s9101_s5 + $0x40] sm:$0xff] %vm2258_vm4, %v2250_v44  ;;  %v2251_v47 = vmax.f32 %v2215_v45, 0.0 }
 0x66c   :  { %2270 = vst.msk [vmem:[%s9101_s5 + $0x58] sm:$0xff] %vm2258_vm4, %v2253_v46  ;;  %v2280_v48 = vpack.c.bf16 %v2253_v46, %v2252_v41 }
 0x66d   :  { %2268 = vst.msk [vmem:[%s9101_s5 + $0x48] sm:$0xff] %vm2258_vm4, %v2251_v47  ;;  %v2279_v49 = vpack.c.bf16 %v2251_v47, %v2250_v44 }
 0x66f   :  { %6093 = vmatprep.mubr.msk.bf16.mxu1 %vm2258_vm4, %v2279_v49 }
 0x670   :  { %6094 = vmatmul.mubr.msk.bf16.gmra.mrb[104].mxu1 %vm2258_vm4, %v2280_v48 }
 0x675   :  { %v6081_v50 = vpop.f32.mrb[92].mxu1 }
 0x676   :  { %v2236_v51 = vadd.f32 %v6081_v50, %v7797_v4  ;;  %v2227_v52 = vpop.f32.mrb[93].mxu1 }
 0x677   :  { %v2228_v53 = vadd.f32 %v2227_v52, %v7797_v4  ;;  %v6082_v54 = vpop.f32.mrb[94].mxu1 }
 0x678   :  { %v2256_v55 = vmax.f32 %v2236_v51, 0.0  ;;  %v2239_v56 = vadd.f32 %v6082_v54, %v7797_v4  ;;  %v2230_v57 = vpop.f32.mrb[95].mxu1 }
 0x679   :  { %v2254_v58 = vmax.f32 %v2228_v53, 0.0  ;;  %v2231_v59 = vadd.f32 %v2230_v57, %v7797_v4 }
 0x67a   :  { %2273 = vst.msk [vmem:[%s9101_s5 + $0x70] sm:$0xff] %vm2258_vm4, %v2256_v55  ;;  %v2257_v60 = vmax.f32 %v2239_v56, 0.0 }
 0x67b   :  { %2271 = vst.msk [vmem:[%s9101_s5 + $0x60] sm:$0xff] %vm2258_vm4, %v2254_v58  ;;  %v2255_v62 = vmax.f32 %v2231_v59, 0.0 }
 0x67c   :  { %2274 = vst.msk [vmem:[%s9101_s5 + $0x78] sm:$0xff] %vm2258_vm4, %v2257_v60  ;;  %v2282_v63 = vpack.c.bf16 %v2257_v60, %v2256_v55 }
 0x67d   :  { %2272 = vst.msk [vmem:[%s9101_s5 + $0x68] sm:$0xff] %vm2258_vm4, %v2255_v62  ;;  %v2281_v0 = vpack.c.bf16 %v2255_v62, %v2254_v58 }
 0x67f   :  { %6097 = vmatprep.mubr.msk.bf16.mxu1 %vm2258_vm4, %v2281_v0  ;;  %v6477_v0 = vld [vmem:[%s9098_s2 + $0x800] ss:$8 sps:$4 sm:$0xff]  }
 0x680   :  { %6098 = vmatmul.mubr.msk.bf16.gmra.mrb[108].mxu1 %vm2258_vm4, %v2282_v63  ;;  %6139 = vmatprep.subr.bf16.mxu0 %v6477_v0 }
 0x681   :  { %6140 = vmatpush3.bf16.msra.mxu0 %v6477_v0 }
 0x723   :  { %v6087_v3 = vpop.f32.mrb[96].mxu1 }
 0x724   :  { %v2357_v4 = vadd.f32 %v6087_v3, %v2285_v2  ;;  %v2348_v5 = vpop.f32.mrb[97].mxu1  ;;  %v6480_v3 = vld [vmem:[%s9098_s2 + $0x830] ss:$8 sps:$4 sm:$0xff]  }
 0x725   :  { %v2349_v6 = vadd.f32 %v2348_v5, %v2285_v2  ;;  %v6088_v9 = vpop.f32.mrb[98].mxu1 }
 0x726   :  { %v2360_v7 = vadd.f32 %v6088_v9, %v2285_v2  ;;  %v2351_v10 = vpop.f32.mrb[99].mxu1  ;;  %v2413_v8 = vmax.f32 %v2357_v4, 0.0  ;;  %v2438_v4 = vld [vmem:[#allocation2 + $0x7] ss:$0 sm:$0xff] }
 0x727   :  { %v2352_v11 = vadd.f32 %v2351_v10, %v2285_v2  ;;  %v2411_v12 = vmax.f32 %v2349_v6, 0.0 }
 0x728   :  { %v2414_v38 = vmax.f32 %v2360_v7, 0.0 }
 0x729   :  { %v2412_v13 = vmax.f32 %v2352_v11, 0.0 }
 0x72a   :  { %v2428_v14 = vpack.c.bf16 %v2414_v38, %v2413_v8 }
 0x72b   :  { %v2427_v15 = vpack.c.bf16 %v2412_v13, %v2411_v12 }
 0x72d   :  { %6103 = vmatprep.mubr.msk.bf16.mxu1 %vm805_vm0, %v2427_v15 }
 0x72e   :  { %6104 = vmatmul.mubr.msk.bf16.vlgmr.msra.gmra.mrb[112].mxu1 %vm805_vm0, %v2428_v14 }
 0x72f   :  { %6120 = vmatpush3.bf16.msra.mxu1 %v6475_v1  ;;  %v6478_v1 = vld [vmem:[%s9098_s2 + $0x810] ss:$8 sps:$4 sm:$0xff]  }
 0x730   :  { %6121 = vmatprep.subr.bf16.mxu1 %v6476_v16  ;;  %6141 = vmatprep.subr.bf16.mxu0 %v6478_v1 }
 0x731   :  { %6142 = vmatpush3.bf16.msra.mxu0 %v6478_v1  ;;  %v6481_v1 = vld [vmem:[%s9098_s2 + $0x900] ss:$8 sps:$4 sm:$0xff]  }
 0x733   :  { %v6091_v17 = vpop.f32.mrb[100].mxu1  ;;  %6122 = vmatpush3.bf16.msra.mxu1 %v6476_v16 }
 0x734   :  { %v2373_v18 = vadd.f32 %v6091_v17, %v2285_v2  ;;  %v2364_v19 = vpop.f32.mrb[101].mxu1 }
 0x735   :  { %v2365_v20 = vadd.f32 %v2364_v19, %v2285_v2  ;;  %v6092_v21 = vpop.f32.mrb[102].mxu1 }
 0x736   :  { %v2376_v22 = vadd.f32 %v6092_v21, %v2285_v2  ;;  %v2367_v23 = vpop.f32.mrb[103].mxu1  ;;  %v2417_v25 = vmax.f32 %v2373_v18, 0.0 }
 0x737   :  { %v2368_v24 = vadd.f32 %v2367_v23, %v2285_v2  ;;  %v2415_v27 = vmax.f32 %v2365_v20, 0.0 }
 0x738   :  { %v2418_v26 = vmax.f32 %v2376_v22, 0.0 }
 0x739   :  { %v2416_v28 = vmax.f32 %v2368_v24, 0.0 }
 0x73a   :  { %v2430_v31 = vpack.c.bf16 %v2418_v26, %v2417_v25 }
 0x73b   :  { %v2429_v35 = vpack.c.bf16 %v2416_v28, %v2415_v27 }
 0x73d   :  { %6107 = vmatprep.mubr.msk.bf16.mxu1 %vm805_vm0, %v2429_v35 }
 0x73e   :  { %6108 = vmatmul.mubr.msk.bf16.gmra.mrb[116].mxu1 %vm805_vm0, %v2430_v31 }
 0x743   :  { %v6095_v36 = vpop.f32.mrb[104].mxu1 }
 0x744   :  { %v2389_v33 = vadd.f32 %v6095_v36, %v2285_v2  ;;  %v2380_v34 = vpop.f32.mrb[105].mxu1 }
 0x745   :  { %v2381_v37 = vadd.f32 %v2380_v34, %v2285_v2  ;;  %v6096_v39 = vpop.f32.mrb[106].mxu1 }
 0x746   :  { %v2392_v40 = vadd.f32 %v6096_v39, %v2285_v2  ;;  %v2383_v41 = vpop.f32.mrb[107].mxu1  ;;  %v2421_v43 = vmax.f32 %v2389_v33, 0.0 }
 0x747   :  { %v2384_v42 = vadd.f32 %v2383_v41, %v2285_v2  ;;  %v2419_v45 = vmax.f32 %v2381_v37, 0.0 }
 0x748   :  { %v2422_v44 = vmax.f32 %v2392_v40, 0.0 }
 0x749   :  { %v2420_v46 = vmax.f32 %v2384_v42, 0.0 }
 0x74a   :  { %v2432_v47 = vpack.c.bf16 %v2422_v44, %v2421_v43 }
 0x74b   :  { %v2431_v48 = vpack.c.bf16 %v2420_v46, %v2419_v45 }
 0x74d   :  { %6111 = vmatprep.mubr.msk.bf16.mxu1 %vm805_vm0, %v2431_v48 }
 0x74e   :  { %6112 = vmatmul.mubr.msk.bf16.gmra.mrb[120].mxu1 %vm805_vm0, %v2432_v47 }
 0x753   :  { %v6099_v49 = vpop.f32.mrb[108].mxu1 }
 0x754   :  { %v2405_v50 = vadd.f32 %v6099_v49, %v2285_v2  ;;  %v2396_v51 = vpop.f32.mrb[109].mxu1 }
 0x755   :  { %v2397_v52 = vadd.f32 %v2396_v51, %v2285_v2  ;;  %v6100_v53 = vpop.f32.mrb[110].mxu1 }
 0x756   :  { %v2408_v54 = vadd.f32 %v6100_v53, %v2285_v2  ;;  %v2399_v55 = vpop.f32.mrb[111].mxu1  ;;  %v2425_v57 = vmax.f32 %v2405_v50, 0.0 }
 0x757   :  { %v2400_v56 = vadd.f32 %v2399_v55, %v2285_v2  ;;  %v2423_v59 = vmax.f32 %v2397_v52, 0.0  ;;  %v6479_v2 = vld [vmem:[%s9098_s2 + $0x820] ss:$8 sps:$4 sm:$0xff]  }
 0x758   :  { %v2426_v58 = vmax.f32 %v2408_v54, 0.0  ;;  %6143 = vmatprep.subr.bf16.mxu0 %v6479_v2 }
 0x759   :  { %v2424_v60 = vmax.f32 %v2400_v56, 0.0  ;;  %6144 = vmatpush3.bf16.msra.mxu0 %v6479_v2  ;;  %v6483_v2 = vld [vmem:[%s9098_s2 + $0x904] ss:$8 sps:$4 sm:$0xff]  }
 0x75a   :  { %v2434_v62 = vpack.c.bf16 %v2426_v58, %v2425_v57  ;;  %6145 = vmatprep.subr.bf16.mxu0 %v6480_v3  ;;  %3042 = vmatprep.subr.bf16.mxu1 %v6483_v2 }
 0x75b   :  { %v2433_v63 = vpack.c.bf16 %v2424_v60, %v2423_v59 }
 0x75d   :  { %6115 = vmatprep.mubr.msk.bf16.mxu1 %vm805_vm0, %v2433_v63  ;;  %6146 = vmatpush3.bf16.msra.mxu0 %v6480_v3  ;;  %v6486_v3 = vld [vmem:[%s9098_s2 + $0x914] ss:$8 sps:$4 sm:$0xff]  }
 0x75e   :  { %6116 = vmatmul.mubr.msk.bf16.gmra.mrb[124].mxu1 %vm805_vm0, %v2434_v62 }
 0x801   :  { %v6105_v5 = vpop.f32.mrb[112].mxu1 }
 0x802   :  { %v2512_v6 = vadd.f32 %v6105_v5, %v2438_v4  ;;  %v2503_v9 = vpop.f32.mrb[113].mxu1  ;;  %v6489_v5 = vld [vmem:[%s9098_s2 + $0x924] ss:$8 sps:$4 sm:$0xff]  }
 0x803   :  { %v2504_v7 = vadd.f32 %v2503_v9, %v2438_v4  ;;  %v6106_v10 = vpop.f32.mrb[114].mxu1  ;;  %v6492_v9 = vld [vmem:[%s9098_s2 + $0x934] ss:$8 sps:$4 sm:$0xff]  }
 0x804   :  { %v2515_v11 = vadd.f32 %v6106_v10, %v2438_v4  ;;  %v2506_v8 = vpop.f32.mrb[115].mxu1  ;;  %v2568_v12 = vmax.f32 %v2512_v6, 0.0  ;;  %v6487_v6 = vld [vmem:[%s9098_s2 + $0x920] ss:$8 sps:$4 sm:$0xff]   ;;  %v6495_v10 = vld [vmem:[%s9098_s2 + $0x944] ss:$8 sps:$4 sm:$0xff]  }
 0x805   :  { %v2507_v38 = vadd.f32 %v2506_v8, %v2438_v4  ;;  %v2566_v14 = vmax.f32 %v2504_v7, 0.0  ;;  %v6490_v7 = vld [vmem:[%s9098_s2 + $0x930] ss:$8 sps:$4 sm:$0xff]   ;;  %v6498_v8 = vld [vmem:[%s9098_s2 + $0x954] ss:$8 sps:$4 sm:$0xff]  }
 0x806   :  { %v2569_v13 = vmax.f32 %v2515_v11, 0.0  ;;  %v6493_v11 = vld [vmem:[%s9098_s2 + $0x940] ss:$8 sps:$4 sm:$0xff]  }
 0x807   :  { %v2567_v15 = vmax.f32 %v2507_v38, 0.0  ;;  %v6496_v38 = vld [vmem:[%s9098_s2 + $0x950] ss:$8 sps:$4 sm:$0xff]  }
 0x808   :  { %v2583_v16 = vpack.c.bf16 %v2569_v13, %v2568_v12  ;;  %v2595_v12 = vld [vmem:[#allocation2 + $0x38] ss:$0 sm:$0xff] }
 0x809   :  { %v2582_v17 = vpack.c.bf16 %v2567_v15, %v2566_v14 }
 0x80b   :  { %6123 = vmatprep.mubr.msk.bf16.mxu1 %vm1965_vm2, %v2582_v17 }
 0x80c   :  { %6124 = vmatmul.mubr.msk.bf16.vlgmr.msra.gmra.mrb[128].mxu1 %vm1965_vm2, %v2583_v16 }
 0x80d   :  { %3043 = vmatpush1.bf16.msra.mxu1 %v6481_v1 }
 0x80e   :  { %3044 = vmatprep.subr.bf16.mxu1 %v6486_v3 }
 0x811   :  { %v6109_v18 = vpop.f32.mrb[116].mxu1 }
 0x812   :  { %v2528_v19 = vadd.f32 %v6109_v18, %v2438_v4  ;;  %v2519_v20 = vpop.f32.mrb[117].mxu1 }
 0x813   :  { %v2520_v21 = vadd.f32 %v2519_v20, %v2438_v4  ;;  %v6110_v22 = vpop.f32.mrb[118].mxu1 }
 0x814   :  { %v2531_v23 = vadd.f32 %v6110_v22, %v2438_v4  ;;  %v2522_v24 = vpop.f32.mrb[119].mxu1  ;;  %v2572_v26 = vmax.f32 %v2528_v19, 0.0 }
 0x815   :  { %v2523_v25 = vadd.f32 %v2522_v24, %v2438_v4  ;;  %v2570_v28 = vmax.f32 %v2520_v21, 0.0 }
 0x816   :  { %v2573_v27 = vmax.f32 %v2531_v23, 0.0 }
 0x817   :  { %v2571_v31 = vmax.f32 %v2523_v25, 0.0 }
 0x818   :  { %v2585_v35 = vpack.c.bf16 %v2573_v27, %v2572_v26 }
 0x819   :  { %v2584_v36 = vpack.c.bf16 %v2571_v31, %v2570_v28 }
 0x81b   :  { %6127 = vmatprep.mubr.msk.bf16.mxu1 %vm1965_vm2, %v2584_v36 }
 0x81c   :  { %6128 = vmatmul.mubr.msk.bf16.gmra.mrb[132].mxu1 %vm1965_vm2, %v2585_v35 }
 0x821   :  { %v6113_v33 = vpop.f32.mrb[120].mxu1 }
 0x822   :  { %v2544_v34 = vadd.f32 %v6113_v33, %v2438_v4  ;;  %v2535_v37 = vpop.f32.mrb[121].mxu1 }
 0x823   :  { %v2536_v39 = vadd.f32 %v2535_v37, %v2438_v4  ;;  %v6114_v40 = vpop.f32.mrb[122].mxu1 }
 0x824   :  { %v2547_v41 = vadd.f32 %v6114_v40, %v2438_v4  ;;  %v2538_v42 = vpop.f32.mrb[123].mxu1  ;;  %v2576_v44 = vmax.f32 %v2544_v34, 0.0 }
 0x825   :  { %v2539_v43 = vadd.f32 %v2538_v42, %v2438_v4  ;;  %v2574_v46 = vmax.f32 %v2536_v39, 0.0 }
 0x826   :  { %v2577_v45 = vmax.f32 %v2547_v41, 0.0 }
 0x827   :  { %v2575_v47 = vmax.f32 %v2539_v43, 0.0 }
 0x828   :  { %v2587_v48 = vpack.c.bf16 %v2577_v45, %v2576_v44 }
 0x829   :  { %v2586_v49 = vpack.c.bf16 %v2575_v47, %v2574_v46 }
 0x82b   :  { %6131 = vmatprep.mubr.msk.bf16.mxu1 %vm1965_vm2, %v2586_v49 }
 0x82c   :  { %6132 = vmatmul.mubr.msk.bf16.gmra.mrb[136].mxu1 %vm1965_vm2, %v2587_v48 }
 0x831   :  { %v6117_v50 = vpop.f32.mrb[124].mxu1 }
 0x832   :  { %v2560_v51 = vadd.f32 %v6117_v50, %v2438_v4  ;;  %v2551_v52 = vpop.f32.mrb[125].mxu1 }
 0x833   :  { %v2552_v53 = vadd.f32 %v2551_v52, %v2438_v4  ;;  %v6118_v54 = vpop.f32.mrb[126].mxu1 }
 0x834   :  { %v2563_v55 = vadd.f32 %v6118_v54, %v2438_v4  ;;  %v2554_v56 = vpop.f32.mrb[127].mxu1  ;;  %v2580_v58 = vmax.f32 %v2560_v51, 0.0 }
 0x835   :  { %v2555_v57 = vadd.f32 %v2554_v56, %v2438_v4  ;;  %v2578_v60 = vmax.f32 %v2552_v53, 0.0  ;;  %v6484_v4 = vld [vmem:[%s9098_s2 + $0x910] ss:$8 sps:$4 sm:$0xff]  }
 0x836   :  { %v2581_v59 = vmax.f32 %v2563_v55, 0.0  ;;  %3045 = vmatpush1.bf16.msra.mxu1 %v6484_v4 }
 0x837   :  { %v2579_v62 = vmax.f32 %v2555_v57, 0.0  ;;  %3046 = vmatprep.subr.bf16.mxu1 %v6489_v5 }
 0x838   :  { %v2589_v63 = vpack.c.bf16 %v2581_v59, %v2580_v58 }
 0x839   :  { %v2588_v0 = vpack.c.bf16 %v2579_v62, %v2578_v60 }
 0x83a   :  { %3047 = vmatpush1.bf16.msra.mxu1 %v6487_v6 }
 0x83b   :  { %6135 = vmatprep.mubr.msk.bf16.mxu1 %vm1965_vm2, %v2588_v0  ;;  %3048 = vmatprep.subr.bf16.mxu1 %v6492_v9 }
 0x83c   :  { %6136 = vmatmul.mubr.msk.bf16.gmra.mrb[140].mxu1 %vm1965_vm2, %v2589_v63 }
 0x83d   :  { %3074 = vmatprep.mubr.bf16.mxu1 %v6916_v61 }
 0x83e   :  { %3049 = vmatpush1.bf16.msra.mxu1 %v6490_v7 }
 0x83f   :  { %3050 = vmatprep.subr.bf16.mxu1 %v6495_v10 }
 0x842   :  { %3051 = vmatpush1.bf16.msra.mxu1 %v6493_v11  ;;  %v6501_v11 = vld [vmem:[%s9098_s2 + $0x964] ss:$8 sps:$4 sm:$0xff]  }
 0x843   :  { %3052 = vmatprep.subr.bf16.mxu1 %v6498_v8  ;;  %v6499_v8 = vld [vmem:[%s9098_s2 + $0x960] ss:$8 sps:$4 sm:$0xff]  }
 0x846   :  { %3053 = vmatpush1.bf16.msra.mxu1 %v6496_v38  ;;  %v6504_v38 = vld [vmem:[%s9098_s2 + $0x974] ss:$8 sps:$4 sm:$0xff]  }
 0x847   :  { %3054 = vmatprep.subr.bf16.mxu1 %v6501_v11 }
 0x84a   :  { %3055 = vmatpush1.bf16.msra.mxu1 %v6499_v8  ;;  %v6526_v8 = vld [vmem:[%s9099_s3 + $0xb0] ss:$28 sps:$4 sm:$0xff]  }
 0x84b   :  { %3056 = vmatprep.subr.bf16.mxu1 %v6504_v38 }
 0x8df   :  { %v6125_v13 = vpop.f32.mrb[128].mxu1 }
 0x8e0   :  { %v2675_v14 = vadd.f32 %v6125_v13, %v2595_v12  ;;  %v2666_v15 = vpop.f32.mrb[129].mxu1  ;;  %v6505_v13 = vld [vmem:[%s9099_s3] ss:$28 sps:$4 sm:$0xff]  }
 0x8e1   :  { %v2667_v16 = vadd.f32 %v2666_v15, %v2595_v12  ;;  %v6126_v17 = vpop.f32.mrb[130].mxu1  ;;  %v6510_v15 = vld [vmem:[%s9099_s3 + $0xc] ss:$28 sps:$4 sm:$0xff]  }
 0x8e2   :  { %v2678_v18 = vadd.f32 %v6126_v17, %v2595_v12  ;;  %v2669_v19 = vpop.f32.mrb[131].mxu1  ;;  %v2731_v21 = vmax.f32 %v2675_v14, 0.0  ;;  %v6507_v14 = vld [vmem:[%s9099_s3 + $0x4] ss:$28 sps:$4 sm:$0xff]   ;;  %v6511_v17 = vld [vmem:[%s9099_s3 + $0x38] ss:$28 sps:$4 sm:$0xff]  }
 0x8e3   :  { %v2670_v20 = vadd.f32 %v2669_v19, %v2595_v12  ;;  %v2729_v23 = vmax.f32 %v2667_v16, 0.0  ;;  %v6513_v16 = vld [vmem:[%s9099_s3 + $0x3c] ss:$28 sps:$4 sm:$0xff]   ;;  %3947 = vmatprep.subr.bf16.mxu0 %v6507_v14  ;;  %v6517_v19 = vld [vmem:[%s9099_s3 + $0x70] ss:$28 sps:$4 sm:$0xff]  }
 0x8e4   :  { %v2732_v22 = vmax.f32 %v2678_v18, 0.0  ;;  %v6519_v18 = vld [vmem:[%s9099_s3 + $0x74] ss:$28 sps:$4 sm:$0xff]  }
 0x8e5   :  { %v2730_v24 = vmax.f32 %v2670_v20, 0.0  ;;  %v6525_v20 = vld [vmem:[%s9099_s3 + $0xac] ss:$28 sps:$4 sm:$0xff]  }
 0x8e6   :  { %v2746_v25 = vpack.c.bf16 %v2732_v22, %v2731_v21  ;;  %v6523_v21 = vld [vmem:[%s9099_s3 + $0xa8] ss:$28 sps:$4 sm:$0xff]  }
 0x8e7   :  { %v2745_v26 = vpack.c.bf16 %v2730_v24, %v2729_v23  ;;  %v6531_v22 = vld [vmem:[%s9099_s3 + $0xe4] ss:$28 sps:$4 sm:$0xff]   ;;  %v6537_v24 = vld [vmem:[%s9099_s3 + $0x11c] ss:$28 sps:$4 sm:$0xff]  }
 0x8e8   :  { %v6529_v23 = vld [vmem:[%s9099_s3 + $0xe0] ss:$28 sps:$4 sm:$0xff]  }
 0x8e9   :  { %6147 = vmatprep.mubr.msk.bf16.mxu0 %vm1801_vm1, %v2745_v26  ;;  %v6543_v26 = vld [vmem:[%s9099_s3 + $0x154] ss:$28 sps:$4 sm:$0xff]  }
 0x8ea   :  { %6148 = vmatmul.mubr.msk.bf16.vlgmr.msra.gmra.mrb[32].mxu0 %vm1801_vm1, %v2746_v25  ;;  %v6535_v25 = vld [vmem:[%s9099_s3 + $0x118] ss:$28 sps:$4 sm:$0xff]  }
 0x8eb   :  { %3948 = vmatpush1.bf16.msra.mxu0 %v6505_v13 }
 0x8ec   :  { %3949 = vmatprep.subr.bf16.mxu0 %v6513_v16 }
 0x8ef   :  { %v6129_v27 = vpop.f32.mrb[132].mxu1  ;;  %3950 = vmatpush1.bf16.msra.mxu0 %v6511_v17 }
 0x8f0   :  { %v2691_v28 = vadd.f32 %v6129_v27, %v2595_v12  ;;  %v2682_v31 = vpop.f32.mrb[133].mxu1  ;;  %3951 = vmatprep.subr.bf16.mxu0 %v6519_v18  ;;  %v6541_v27 = vld [vmem:[%s9099_s3 + $0x150] ss:$28 sps:$4 sm:$0xff]   ;;  %v6532_v18 = vld [vmem:[%s9099_s3 + $0xe8] ss:$28 sps:$4 sm:$0xff]  }
 0x8f1   :  { %v2683_v35 = vadd.f32 %v2682_v31, %v2595_v12  ;;  %v6130_v36 = vpop.f32.mrb[134].mxu1  ;;  %v6547_v31 = vld [vmem:[%s9099_s3 + $0x188] ss:$28 sps:$4 sm:$0xff]  }
 0x8f2   :  { %v2694_v33 = vadd.f32 %v6130_v36, %v2595_v12  ;;  %v2685_v34 = vpop.f32.mrb[135].mxu1  ;;  %v2735_v39 = vmax.f32 %v2691_v28, 0.0  ;;  %v6549_v28 = vld [vmem:[%s9099_s3 + $0x18c] ss:$28 sps:$4 sm:$0xff]   ;;  %v6553_v36 = vld [vmem:[%s9099_s3 + $0x1c0] ss:$28 sps:$4 sm:$0xff]  }
 0x8f3   :  { %v2686_v37 = vadd.f32 %v2685_v34, %v2595_v12  ;;  %v2733_v41 = vmax.f32 %v2683_v35, 0.0  ;;  %3952 = vmatpush1.bf16.msra.mxu0 %v6517_v19  ;;  %v6555_v35 = vld [vmem:[%s9099_s3 + $0x1c4] ss:$28 sps:$4 sm:$0xff]   ;;  %v6559_v34 = vld [vmem:[%s9099_s3 + $0x1f8] ss:$28 sps:$4 sm:$0xff]  }
 0x8f4   :  { %v2736_v40 = vmax.f32 %v2694_v33, 0.0  ;;  %3953 = vmatprep.subr.bf16.mxu0 %v6525_v20  ;;  %v6561_v33 = vld [vmem:[%s9099_s3 + $0x1fc] ss:$28 sps:$4 sm:$0xff]   ;;  %v6540_v20 = vld [vmem:[%s9099_s3 + $0x124] ss:$28 sps:$4 sm:$0xff]  }
 0x8f5   :  { %v2734_v42 = vmax.f32 %v2686_v37, 0.0  ;;  %v6567_v37 = vld [vmem:[%s9099_s3 + $0x234] ss:$28 sps:$4 sm:$0xff]  }
 0x8f6   :  { %v2748_v43 = vpack.c.bf16 %v2736_v40, %v2735_v39  ;;  %v6565_v39 = vld [vmem:[%s9099_s3 + $0x230] ss:$28 sps:$4 sm:$0xff]  }
 0x8f7   :  { %v2747_v44 = vpack.c.bf16 %v2734_v42, %v2733_v41  ;;  %3954 = vmatpush1.bf16.msra.mxu0 %v6523_v21  ;;  %v6573_v40 = vld [vmem:[%s9099_s3 + $0x26c] ss:$28 sps:$4 sm:$0xff]   ;;  %v6579_v42 = vld [vmem:[%s9099_s3 + $0x2a4] ss:$28 sps:$4 sm:$0xff]  }
 0x8f8   :  { %3955 = vmatprep.subr.bf16.mxu0 %v6531_v22  ;;  %v6571_v41 = vld [vmem:[%s9099_s3 + $0x268] ss:$28 sps:$4 sm:$0xff]   ;;  %v6538_v21 = vld [vmem:[%s9099_s3 + $0x120] ss:$28 sps:$4 sm:$0xff]  }
 0x8f9   :  { %6151 = vmatprep.mubr.msk.bf16.mxu0 %vm1801_vm1, %v2747_v44  ;;  %v6585_v44 = vld [vmem:[%s9099_s3 + $0x2dc] ss:$28 sps:$4 sm:$0xff]  }
 0x8fa   :  { %6152 = vmatmul.mubr.msk.bf16.gmra.mrb[36].mxu0 %vm1801_vm1, %v2748_v43  ;;  %v6577_v43 = vld [vmem:[%s9099_s3 + $0x2a0] ss:$28 sps:$4 sm:$0xff]  }
 0x8fb   :  { %3956 = vmatpush1.bf16.msra.mxu0 %v6529_v23  ;;  %v6546_v22 = vld [vmem:[%s9099_s3 + $0x15c] ss:$28 sps:$4 sm:$0xff]  }
 0x8fc   :  { %3957 = vmatprep.subr.bf16.mxu0 %v6537_v24  ;;  %v6544_v23 = vld [vmem:[%s9099_s3 + $0x158] ss:$28 sps:$4 sm:$0xff]  }
 0x8ff   :  { %v6133_v45 = vpop.f32.mrb[136].mxu1  ;;  %3958 = vmatpush1.bf16.msra.mxu0 %v6535_v25  ;;  %v6552_v25 = vld [vmem:[%s9099_s3 + $0x194] ss:$28 sps:$4 sm:$0xff]  }
 0x900   :  { %v2707_v46 = vadd.f32 %v6133_v45, %v2595_v12  ;;  %v2698_v47 = vpop.f32.mrb[137].mxu1  ;;  %3959 = vmatprep.subr.bf16.mxu0 %v6543_v26  ;;  %v6583_v45 = vld [vmem:[%s9099_s3 + $0x2d8] ss:$28 sps:$4 sm:$0xff]  }
 0x901   :  { %v2699_v48 = vadd.f32 %v2698_v47, %v2595_v12  ;;  %v6134_v49 = vpop.f32.mrb[138].mxu1 }
 0x902   :  { %v2710_v50 = vadd.f32 %v6134_v49, %v2595_v12  ;;  %v2701_v51 = vpop.f32.mrb[139].mxu1  ;;  %v2739_v53 = vmax.f32 %v2707_v46, 0.0  ;;  %v8065_v46 = vld [vmem:[#allocation2 + $0x39] ss:$0 sm:$0xff] }
 0x903   :  { %v2702_v52 = vadd.f32 %v2701_v51, %v2595_v12  ;;  %v2737_v55 = vmax.f32 %v2699_v48, 0.0  ;;  %3960 = vmatpush1.bf16.msra.mxu0 %v6541_v27 }
 0x904   :  { %v2740_v54 = vmax.f32 %v2710_v50, 0.0  ;;  %3961 = vmatprep.subr.bf16.mxu0 %v6549_v28 }
 0x905   :  { %v2738_v56 = vmax.f32 %v2702_v52, 0.0 }
 0x906   :  { %v2750_v57 = vpack.c.bf16 %v2740_v54, %v2739_v53 }
 0x907   :  { %v2749_v58 = vpack.c.bf16 %v2738_v56, %v2737_v55  ;;  %3962 = vmatpush1.bf16.msra.mxu0 %v6547_v31 }
 0x908   :  { %3963 = vmatprep.subr.bf16.mxu0 %v6555_v35 }
 0x909   :  { %6155 = vmatprep.mubr.msk.bf16.mxu0 %vm1801_vm1, %v2749_v58 }
 0x90a   :  { %6156 = vmatmul.mubr.msk.bf16.gmra.mrb[40].mxu0 %vm1801_vm1, %v2750_v57 }
 0x90b   :  { %3964 = vmatpush1.bf16.msra.mxu0 %v6553_v36 }
 0x90c   :  { %3965 = vmatprep.subr.bf16.mxu0 %v6561_v33  ;;  %v6550_v33 = vld [vmem:[%s9099_s3 + $0x190] ss:$28 sps:$4 sm:$0xff]  }
 0x90f   :  { %v6137_v59 = vpop.f32.mrb[140].mxu1  ;;  %3966 = vmatpush1.bf16.msra.mxu0 %v6559_v34 }
 0x910   :  { %v2723_v60 = vadd.f32 %v6137_v59, %v2595_v12  ;;  %v2714_v62 = vpop.f32.mrb[141].mxu1  ;;  %3967 = vmatprep.subr.bf16.mxu0 %v6567_v37  ;;  %v6558_v37 = vld [vmem:[%s9099_s3 + $0x1cc] ss:$28 sps:$4 sm:$0xff]  }
 0x911   :  { %v2715_v63 = vadd.f32 %v2714_v62, %v2595_v12  ;;  %v6138_v0 = vpop.f32.mrb[142].mxu1 }
 0x912   :  { %v2726_v1 = vadd.f32 %v6138_v0, %v2595_v12  ;;  %v2717_v2 = vpop.f32.mrb[143].mxu1  ;;  %v2743_v4 = vmax.f32 %v2723_v60, 0.0  ;;  %v6508_v60 = vld [vmem:[%s9099_s3 + $0x8] ss:$28 sps:$4 sm:$0xff]   ;;  %v6514_v0 = vld [vmem:[%s9099_s3 + $0x40] ss:$28 sps:$4 sm:$0xff]  }
 0x913   :  { %v2718_v3 = vadd.f32 %v2717_v2, %v2595_v12  ;;  %v2741_v6 = vmax.f32 %v2715_v63, 0.0  ;;  %v6502_v12 = vld [vmem:[%s9098_s2 + $0x970] ss:$8 sps:$4 sm:$0xff]   ;;  %3968 = vmatpush1.bf16.msra.mxu0 %v6565_v39  ;;  %v6516_v63 = vld [vmem:[%s9099_s3 + $0x44] ss:$28 sps:$4 sm:$0xff]  }
 0x914   :  { %v2744_v5 = vmax.f32 %v2726_v1, 0.0  ;;  %3057 = vmatpush1.bf16.msra.mxu1 %v6502_v12  ;;  %3969 = vmatprep.subr.bf16.mxu0 %v6573_v40  ;;  %v6522_v1 = vld [vmem:[%s9099_s3 + $0x7c] ss:$28 sps:$4 sm:$0xff]   ;;  %v6534_v12 = vld [vmem:[%s9099_s3 + $0xec] ss:$28 sps:$4 sm:$0xff]  }
 0x915   :  { %v2742_v9 = vmax.f32 %v2718_v3, 0.0  ;;  %4060 = vmatprep.subr.bf16.mxu1 %v6510_v15  ;;  %v6520_v2 = vld [vmem:[%s9099_s3 + $0x78] ss:$28 sps:$4 sm:$0xff]  }
 0x916   :  { %v2752_v7 = vpack.c.bf16 %v2744_v5, %v2743_v4  ;;  %v6528_v4 = vld [vmem:[%s9099_s3 + $0xb4] ss:$28 sps:$4 sm:$0xff]  }
 0x917   :  { %v2751_v10 = vpack.c.bf16 %v2742_v9, %v2741_v6  ;;  %3970 = vmatpush1.bf16.msra.mxu0 %v6571_v41 }
 0x918   :  { %3971 = vmatprep.subr.bf16.mxu0 %v6579_v42 }
 0x919   :  { %6159 = vmatprep.mubr.msk.bf16.mxu0 %vm1801_vm1, %v2751_v10 }
 0x91a   :  { %6160 = vmatmul.mubr.msk.bf16.gmra.mrb[44].mxu0 %vm1801_vm1, %v2752_v7 }
 0x91b   :  { %3972 = vmatpush1.bf16.msra.mxu0 %v6577_v43 }
 0x91c   :  { %3973 = vmatprep.subr.bf16.mxu0 %v6585_v44  ;;  %v6556_v44 = vld [vmem:[%s9099_s3 + $0x1c8] ss:$28 sps:$4 sm:$0xff]  }
 0x91f   :  { %3974 = vmatpush1.bf16.msra.mxu0 %v6583_v45 }
 0x9bd   :  { %v6149_v47 = vpop.f32.mrb[32].mxu0 }
 0x9be   :  { %v2854_v48 = vadd.f32 %v6149_v47, %v8065_v46  ;;  %v2845_v49 = vpop.f32.mrb[33].mxu0  ;;  %v6564_v47 = vld [vmem:[%s9099_s3 + $0x204] ss:$28 sps:$4 sm:$0xff]  }
 0x9bf   :  { %v2846_v50 = vadd.f32 %v2845_v49, %v8065_v46  ;;  %v6150_v51 = vpop.f32.mrb[34].mxu0  ;;  %v6570_v49 = vld [vmem:[%s9099_s3 + $0x23c] ss:$28 sps:$4 sm:$0xff]  }
 0x9c0   :  { %v2857_v52 = vadd.f32 %v6150_v51, %v8065_v46  ;;  %v2848_v53 = vpop.f32.mrb[35].mxu0  ;;  %v2910_v55 = vmax.f32 %v2854_v48, 0.0  ;;  %v6562_v48 = vld [vmem:[%s9099_s3 + $0x200] ss:$28 sps:$4 sm:$0xff]  }
 0x9c1   :  { %v2849_v54 = vadd.f32 %v2848_v53, %v8065_v46  ;;  %v2908_v57 = vmax.f32 %v2846_v50, 0.0  ;;  %v6568_v50 = vld [vmem:[%s9099_s3 + $0x238] ss:$28 sps:$4 sm:$0xff]  }
 0x9c2   :  { %v2911_v56 = vmax.f32 %v2857_v52, 0.0  ;;  %v6576_v52 = vld [vmem:[%s9099_s3 + $0x274] ss:$28 sps:$4 sm:$0xff]  }
 0x9c3   :  { %v2909_v58 = vmax.f32 %v2849_v54, 0.0 }
 0x9c4   :  { %v2925_v59 = vpack.c.bf16 %v2911_v56, %v2910_v55 }
 0x9c5   :  { %v2924_v62 = vpack.c.bf16 %v2909_v58, %v2908_v57 }
 0x9c7   :  { %3075 = vmatmul.mubr.bf16.vlgmr.msra.gmra.mrb[144].mxu1 %v2924_v62  ;;  %v6582_v62 = vld [vmem:[%s9099_s3 + $0x2ac] ss:$28 sps:$4 sm:$0xff]  }
 0x9c8   :  { %3084 = vmatprep.mubr.bf16.mxu1 %v6916_v61  ;;  %4061 = vmatpush1.bf16.msra.mxu1 %v6508_v60 }
 0x9c9   :  { %4062 = vmatprep.subr.bf16.mxu1 %v6516_v63 }
 0x9cc   :  { %4063 = vmatpush1.bf16.msra.mxu1 %v6514_v0 }
 0x9cd   :  { %v6153_v3 = vpop.f32.mrb[36].mxu0  ;;  %4064 = vmatprep.subr.bf16.mxu1 %v6522_v1 }
 0x9ce   :  { %v2870_v5 = vadd.f32 %v6153_v3, %v8065_v46  ;;  %v2861_v6 = vpop.f32.mrb[37].mxu0 }
 0x9cf   :  { %v2862_v9 = vadd.f32 %v2861_v6, %v8065_v46  ;;  %v6154_v7 = vpop.f32.mrb[38].mxu0  ;;  %3085 = vmatmul.mubr.bf16.gmra.mrb[148].mxu1 %v2925_v59  ;;  %v6574_v59 = vld [vmem:[%s9099_s3 + $0x270] ss:$28 sps:$4 sm:$0xff]   ;;  %v6586_v6 = vld [vmem:[%s9099_s3 + $0x2e0] ss:$28 sps:$4 sm:$0xff]  }
 0x9d0   :  { %v2873_v10 = vadd.f32 %v6154_v7, %v8065_v46  ;;  %v2864_v11 = vpop.f32.mrb[39].mxu0  ;;  %3094 = vmatprep.mubr.bf16.mxu1 %v6916_v61  ;;  %4065 = vmatpush1.bf16.msra.mxu1 %v6520_v2  ;;  %v2914_v13 = vmax.f32 %v2870_v5, 0.0  ;;  %v6594_v7 = vld [vmem:[%s9099_s3 + $0x31c] ss:$28 sps:$4 sm:$0xff]  }
 0x9d1   :  { %v2865_v38 = vadd.f32 %v2864_v11, %v8065_v46  ;;  %4066 = vmatprep.subr.bf16.mxu1 %v6528_v4  ;;  %v2912_v15 = vmax.f32 %v2862_v9, 0.0  ;;  %v6580_v4 = vld [vmem:[%s9099_s3 + $0x2a8] ss:$28 sps:$4 sm:$0xff]   ;;  %v6591_v9 = vld [vmem:[%s9099_s3 + $0x314] ss:$28 sps:$4 sm:$0xff]  }
 0x9d2   :  { %v2915_v14 = vmax.f32 %v2873_v10, 0.0  ;;  %v6592_v10 = vld [vmem:[%s9099_s3 + $0x318] ss:$28 sps:$4 sm:$0xff]   ;;  %3975 = vmatprep.subr.bf16.mxu0 %v6591_v9  ;;  %v6597_v11 = vld [vmem:[%s9099_s3 + $0x34c] ss:$28 sps:$4 sm:$0xff]  }
 0x9d3   :  { %v2913_v16 = vmax.f32 %v2865_v38, 0.0  ;;  %v6595_v38 = vld [vmem:[%s9099_s3 + $0x348] ss:$28 sps:$4 sm:$0xff]   ;;  %v6614_v9 = vld [vmem:[%s9099_s3 + $0xb8] ss:$28 sps:$4 sm:$0xff]  }
 0x9d4   :  { %v2927_v17 = vpack.c.bf16 %v2915_v14, %v2914_v13  ;;  %4067 = vmatpush1.bf16.msra.mxu1 %v6526_v8  ;;  %v6600_v8 = vld [vmem:[%s9099_s3 + $0x354] ss:$28 sps:$4 sm:$0xff]  }
 0x9d5   :  { %v2926_v19 = vpack.c.bf16 %v2913_v16, %v2912_v15  ;;  %4068 = vmatprep.subr.bf16.mxu1 %v6534_v12  ;;  %v6598_v12 = vld [vmem:[%s9099_s3 + $0x350] ss:$28 sps:$4 sm:$0xff]   ;;  %v6604_v14 = vld [vmem:[%s9099_s3 + $0x1d8] ss:$28 sps:$4 sm:$0xff]  }
 0x9d6   :  { %v6603_v13 = vld [vmem:[%s9099_s3 + $0x14] ss:$28 sps:$4 sm:$0xff]   ;;  %v2950_v15 = vld [vmem:[#allocation2 + $0x3a] ss:$8 sm:$0x3] }
 0x9d7   :  { %3095 = vmatmul.mubr.bf16.gmra.mrb[152].mxu1 %v2926_v19  ;;  %v8202_v16 = vrot.slane %v2950_v15, %v7664_v30 }
 0x9d8   :  { %3104 = vmatprep.mubr.bf16.mxu1 %v6916_v61  ;;  %4069 = vmatpush1.bf16.msra.mxu1 %v6532_v18 }
 0x9d9   :  { %4070 = vmatprep.subr.bf16.mxu1 %v6540_v20 }
 0x9dc   :  { %4071 = vmatpush1.bf16.msra.mxu1 %v6538_v21 }
 0x9dd   :  { %v6157_v24 = vpop.f32.mrb[40].mxu0  ;;  %4072 = vmatprep.subr.bf16.mxu1 %v6546_v22 }
 0x9de   :  { %v2886_v26 = vadd.f32 %v6157_v24, %v8065_v46  ;;  %v2877_v27 = vpop.f32.mrb[41].mxu0 }
 0x9df   :  { %v2878_v28 = vadd.f32 %v2877_v27, %v8065_v46  ;;  %v6158_v31 = vpop.f32.mrb[42].mxu0  ;;  %3105 = vmatmul.mubr.bf16.gmra.mrb[156].mxu1 %v2927_v17  ;;  %v8205_v17 = vrot.slane %v2950_v15, %v7667_v32 }
 0x9e0   :  { %v2889_v35 = vadd.f32 %v6158_v31, %v8065_v46  ;;  %v2880_v36 = vpop.f32.mrb[43].mxu0  ;;  %3114 = vmatprep.mubr.bf16.mxu1 %v6916_v61  ;;  %4073 = vmatpush1.bf16.msra.mxu1 %v6544_v23  ;;  %v2918_v39 = vmax.f32 %v2886_v26, 0.0 }
 0x9e1   :  { %v2881_v34 = vadd.f32 %v2880_v36, %v8065_v46  ;;  %4074 = vmatprep.subr.bf16.mxu1 %v6552_v25  ;;  %v2916_v41 = vmax.f32 %v2878_v28, 0.0 }
 0x9e2   :  { %v2919_v40 = vmax.f32 %v2889_v35, 0.0 }
 0x9e3   :  { %v2917_v42 = vmax.f32 %v2881_v34, 0.0  ;;  %v6601_v34 = vld [vmem:[%s9099_s3 + $0x10] ss:$28 sps:$4 sm:$0xff]  }
 0x9e4   :  { %v2929_v43 = vpack.c.bf16 %v2919_v40, %v2918_v39  ;;  %4075 = vmatpush1.bf16.msra.mxu1 %v6550_v33 }
 0x9e5   :  { %v2928_v45 = vpack.c.bf16 %v2917_v42, %v2916_v41  ;;  %4076 = vmatprep.subr.bf16.mxu1 %v6558_v37  ;;  %v6605_v37 = vld [vmem:[%s9099_s3 + $0x18] ss:$28 sps:$4 sm:$0xff]   ;;  %v6608_v41 = vld [vmem:[%s9099_s3 + $0x4c] ss:$28 sps:$4 sm:$0xff]  }
 0x9e6   :  { %v6612_v42 = vld [vmem:[%s9099_s3 + $0x210] ss:$28 sps:$4 sm:$0xff]  }
 0x9e7   :  { %3115 = vmatmul.mubr.bf16.gmra.mrb[160].mxu1 %v2928_v45 }
 0x9e8   :  { %3124 = vmatprep.mubr.bf16.mxu1 %v6916_v61  ;;  %4077 = vmatpush1.bf16.msra.mxu1 %v6556_v44 }
 0x9e9   :  { %4078 = vmatprep.subr.bf16.mxu1 %v6564_v47 }
 0x9ec   :  { %4079 = vmatpush1.bf16.msra.mxu1 %v6562_v48 }
 0x9ed   :  { %v6161_v51 = vpop.f32.mrb[44].mxu0  ;;  %4080 = vmatprep.subr.bf16.mxu1 %v6570_v49  ;;  %v6606_v49 = vld [vmem:[%s9099_s3 + $0x48] ss:$28 sps:$4 sm:$0xff]  }
 0x9ee   :  { %v2902_v53 = vadd.f32 %v6161_v51, %v8065_v46  ;;  %v2893_v54 = vpop.f32.mrb[45].mxu0 }
 0x9ef   :  { %v2894_v55 = vadd.f32 %v2893_v54, %v8065_v46  ;;  %v6162_v56 = vpop.f32.mrb[46].mxu0  ;;  %3125 = vmatmul.mubr.bf16.gmra.mrb[164].mxu1 %v2929_v43  ;;  %v6620_v54 = vld [vmem:[%s9099_s3 + $0x248] ss:$28 sps:$4 sm:$0xff]  }
 0x9f0   :  { %v2905_v57 = vadd.f32 %v6162_v56, %v8065_v46  ;;  %v2896_v58 = vpop.f32.mrb[47].mxu0  ;;  %3134 = vmatprep.mubr.bf16.mxu1 %v6916_v61  ;;  %4081 = vmatpush1.bf16.msra.mxu1 %v6568_v50  ;;  %v2922_v63 = vmax.f32 %v2902_v53, 0.0  ;;  %v6613_v50 = vld [vmem:[%s9099_s3 + $0x50] ss:$28 sps:$4 sm:$0xff]   ;;  %v6611_v53 = vld [vmem:[%s9099_s3 + $0x84] ss:$28 sps:$4 sm:$0xff]  }
 0x9f1   :  { %v2897_v60 = vadd.f32 %v2896_v58, %v8065_v46  ;;  %4082 = vmatprep.subr.bf16.mxu1 %v6576_v52  ;;  %v2920_v1 = vmax.f32 %v2894_v55, 0.0  ;;  %v6588_v46 = vld [vmem:[%s9099_s3 + $0x2e4] ss:$28 sps:$4 sm:$0xff]  }
 0x9f2   :  { %v2923_v0 = vmax.f32 %v2905_v57, 0.0 }
 0x9f3   :  { %v2921_v2 = vmax.f32 %v2897_v60, 0.0  ;;  %v6609_v60 = vld [vmem:[%s9099_s3 + $0x80] ss:$28 sps:$4 sm:$0xff]  }
 0x9f4   :  { %v2931_v3 = vpack.c.bf16 %v2923_v0, %v2922_v63  ;;  %4083 = vmatpush1.bf16.msra.mxu1 %v6574_v59 }
 0x9f5   :  { %v2930_v5 = vpack.c.bf16 %v2921_v2, %v2920_v1  ;;  %4084 = vmatprep.subr.bf16.mxu1 %v6582_v62  ;;  %v6621_v62 = vld [vmem:[%s9099_s3 + $0x88] ss:$28 sps:$4 sm:$0xff]   ;;  %v6616_v1 = vld [vmem:[%s9099_s3 + $0xbc] ss:$28 sps:$4 sm:$0xff]  }
 0x9f6   :  { %v6628_v2 = vld [vmem:[%s9099_s3 + $0x280] ss:$28 sps:$4 sm:$0xff]  }
 0x9f7   :  { %3135 = vmatmul.mubr.bf16.gmra.mrb[168].mxu1 %v2930_v5 }
 0x9f8   :  { %3144 = vmatprep.mubr.bf16.mxu1 %v6916_v61  ;;  %4085 = vmatpush1.bf16.msra.mxu1 %v6580_v4  ;;  %v6589_v61 = vld [vmem:[%s9099_s3 + $0x310] ss:$28 sps:$4 sm:$0xff]  }
 0x9f9   :  { %4086 = vmatprep.subr.bf16.mxu1 %v6588_v46  ;;  %3976 = vmatpush1.bf16.msra.mxu0 %v6589_v61 }
 0x9fa   :  { %3977 = vmatprep.subr.bf16.mxu0 %v6597_v11  ;;  %v6619_v11 = vld [vmem:[%s9099_s3 + $0xf4] ss:$28 sps:$4 sm:$0xff]  }
 0x9fc   :  { %4087 = vmatpush1.bf16.msra.mxu1 %v6586_v6 }
 0x9fd   :  { %4088 = vmatprep.subr.bf16.mxu1 %v6594_v7  ;;  %3978 = vmatpush1.bf16.msra.mxu0 %v6595_v38  ;;  %v6629_v7 = vld [vmem:[%s9099_s3 + $0xc0] ss:$28 sps:$4 sm:$0xff]  }
 0x9fe   :  { %4173 = vmatprep.subr.bf16.mxu0 %v6603_v13 }
 0x9ff   :  { %3145 = vmatmul.mubr.bf16.gmra.mrb[172].mxu1 %v2931_v3 }
 0xa00   :  { %4089 = vmatpush1.bf16.msra.mxu1 %v6592_v10 }
 0xa01   :  { %4090 = vmatprep.subr.bf16.mxu1 %v6600_v8  ;;  %v6636_v8 = vld [vmem:[%s9099_s3 + $0x2b8] ss:$28 sps:$4 sm:$0xff]  }
 0xa04   :  { %4091 = vmatpush1.bf16.msra.mxu1 %v6598_v12 }
 0xa05   :  { %5925 = vmatprep.subr.bf16.mxu1 %v6604_v14 }
 0xa9a   :  { %v3076_v18 = vpop.f32.mrb[144].mxu1 }
 0xa9b   :  { %v3077_v19 = vadd.f32 %v3076_v18, %v8202_v16  ;;  %v3078_v20 = vpop.f32.mrb[145].mxu1  ;;  %v6617_v18 = vld [vmem:[%s9099_s3 + $0xf0] ss:$28 sps:$4 sm:$0xff]  }
 0xa9c   :  { %v3079_v21 = vadd.f32 %v3078_v20, %v8205_v17  ;;  %v3080_v22 = vpop.f32.mrb[146].mxu1 }
 0xa9d   :  { %v3081_v23 = vadd.f32 %v3080_v22, %v8202_v16  ;;  %v3082_v24 = vpop.f32.mrb[147].mxu1  ;;  %v3155_v26 = vmax.f32 %v3077_v19, 0.0  ;;  %v6637_v19 = vld [vmem:[%s9099_s3 + $0xf8] ss:$28 sps:$4 sm:$0xff]   ;;  %v6624_v22 = vld [vmem:[%s9099_s3 + $0x12c] ss:$28 sps:$4 sm:$0xff]  }
 0xa9e   :  { %v3083_v25 = vadd.f32 %v3082_v24, %v8205_v17  ;;  %v3156_v28 = vmax.f32 %v3079_v21, 0.0 }
 0xa9f   :  { %v3157_v27 = vmax.f32 %v3081_v23, 0.0  ;;  %v6644_v23 = vld [vmem:[%s9099_s3 + $0x2f0] ss:$28 sps:$4 sm:$0xff]  }
 0xaa0   :  { %v3158_v31 = vmax.f32 %v3083_v25, 0.0 }
 0xaa1   :  { %v8211_v35 = vpack.c.bf16 %v3157_v27, %v3155_v26 }
 0xaa2   :  { %v8213_v36 = vpack.c.bf16 %v3158_v31, %v3156_v28  ;;  %v3086_v33 = vpop.f32.mrb[148].mxu1  ;;  %v6622_v31 = vld [vmem:[%s9099_s3 + $0x128] ss:$28 sps:$4 sm:$0xff]  }
 0xaa3   :  { %v3087_v39 = vadd.f32 %v3086_v33, %v8202_v16  ;;  %v3088_v40 = vpop.f32.mrb[149].mxu1  ;;  %v6645_v33 = vld [vmem:[%s9099_s3 + $0x130] ss:$28 sps:$4 sm:$0xff]  }
 0xaa4   :  { %v3089_v43 = vadd.f32 %v3088_v40, %v8205_v17  ;;  %v3090_v44 = vpop.f32.mrb[150].mxu1  ;;  %3979 = vmatprep.mubr.bf16.mxu0 %v8213_v36  ;;  %4092 = vmatprep.mubr.bf16.mxu1 %v8213_v36  ;;  %v6652_v40 = vld [vmem:[%s9099_s3 + $0x328] ss:$28 sps:$4 sm:$0xff]  }
 0xaa5   :  { %v3091_v45 = vadd.f32 %v3090_v44, %v8202_v16  ;;  %v3092_v47 = vpop.f32.mrb[151].mxu1  ;;  %3980 = vmatmul.mubr.bf16.vlgmr.msra.gmra.mrb[48].mxu0 %v8211_v35  ;;  %4093 = vmatmul.mubr.bf16.vlgmr.msra.gmra.mrb[176].mxu1 %v8211_v35  ;;  %v3159_v51 = vmax.f32 %v3087_v39, 0.0  ;;  %v6627_v39 = vld [vmem:[%s9099_s3 + $0x164] ss:$28 sps:$4 sm:$0xff]  }
 0xaa6   :  { %v3093_v48 = vadd.f32 %v3092_v47, %v8205_v17  ;;  %4174 = vmatpush1.bf16.msra.mxu0 %v6601_v34  ;;  %5926 = vmatpush3.bf16.msra.mxu1 %v6605_v37  ;;  %v3160_v55 = vmax.f32 %v3089_v43, 0.0  ;;  %v6625_v47 = vld [vmem:[%s9099_s3 + $0x160] ss:$28 sps:$4 sm:$0xff]  }
 0xaa7   :  { %v3161_v52 = vmax.f32 %v3091_v45, 0.0  ;;  %4175 = vmatprep.subr.bf16.mxu0 %v6608_v41  ;;  %5927 = vmatprep.subr.bf16.mxu1 %v6612_v42 }
 0xaa8   :  { %v3162_v56 = vmax.f32 %v3093_v48, 0.0  ;;  %v6653_v48 = vld [vmem:[%s9099_s3 + $0x168] ss:$28 sps:$4 sm:$0xff]  }
 0xaa9   :  { %v8247_v57 = vpack.c.bf16 %v3161_v52, %v3159_v51  ;;  %v6632_v51 = vld [vmem:[%s9099_s3 + $0x19c] ss:$28 sps:$4 sm:$0xff]  }
 0xaaa   :  { %v8249_v58 = vpack.c.bf16 %v3162_v56, %v3160_v55  ;;  %v3096_v59 = vpop.f32.mrb[152].mxu1  ;;  %4176 = vmatpush1.bf16.msra.mxu0 %v6606_v49  ;;  %5928 = vmatpush3.bf16.msra.mxu1 %v6613_v50  ;;  %v6660_v52 = vld [vmem:[%s9099_s3 + $0x360] ss:$28 sps:$4 sm:$0xff]  }
 0xaab   :  { %v3097_v63 = vadd.f32 %v3096_v59, %v8202_v16  ;;  %v3098_v0 = vpop.f32.mrb[153].mxu1  ;;  %4177 = vmatprep.subr.bf16.mxu0 %v6611_v53  ;;  %5929 = vmatprep.subr.bf16.mxu1 %v6620_v54 }
 0xaac   :  { %v3099_v3 = vadd.f32 %v3098_v0, %v8205_v17  ;;  %v3100_v4 = vpop.f32.mrb[154].mxu1  ;;  %3989 = vmatprep.mubr.bf16.mxu0 %v8249_v58  ;;  %4102 = vmatprep.mubr.bf16.mxu1 %v8249_v58 }
 0xaad   :  { %v3101_v5 = vadd.f32 %v3100_v4, %v8202_v16  ;;  %v3102_v46 = vpop.f32.mrb[155].mxu1  ;;  %3990 = vmatmul.mubr.bf16.gmra.mrb[52].mxu0 %v8247_v57  ;;  %4103 = vmatmul.mubr.bf16.gmra.mrb[180].mxu1 %v8247_v57  ;;  %v3163_v61 = vmax.f32 %v3097_v63, 0.0 }
 0xaae   :  { %v3103_v6 = vadd.f32 %v3102_v46, %v8205_v17  ;;  %4178 = vmatpush1.bf16.msra.mxu0 %v6609_v60  ;;  %5930 = vmatpush3.bf16.msra.mxu1 %v6621_v62  ;;  %v3164_v38 = vmax.f32 %v3099_v3, 0.0  ;;  %v6630_v60 = vld [vmem:[%s9099_s3 + $0x198] ss:$28 sps:$4 sm:$0xff]   ;;  %v6661_v62 = vld [vmem:[%s9099_s3 + $0x1a0] ss:$28 sps:$4 sm:$0xff]  }
 0xaaf   :  { %v3165_v10 = vmax.f32 %v3101_v5, 0.0  ;;  %4179 = vmatprep.subr.bf16.mxu0 %v6616_v1  ;;  %5931 = vmatprep.subr.bf16.mxu1 %v6628_v2  ;;  %v6635_v1 = vld [vmem:[%s9099_s3 + $0x1d4] ss:$28 sps:$4 sm:$0xff]  }
 0xab0   :  { %v3166_v12 = vmax.f32 %v3103_v6, 0.0  ;;  %v6633_v6 = vld [vmem:[%s9099_s3 + $0x1d0] ss:$28 sps:$4 sm:$0xff]  }
 0xab1   :  { %v8283_v13 = vpack.c.bf16 %v3165_v10, %v3163_v61  ;;  %v6640_v61 = vld [vmem:[%s9099_s3 + $0x20c] ss:$28 sps:$4 sm:$0xff]  }
 0xab2   :  { %v8285_v14 = vpack.c.bf16 %v3166_v12, %v3164_v38  ;;  %v3106_v15 = vpop.f32.mrb[156].mxu1  ;;  %4180 = vmatpush1.bf16.msra.mxu0 %v6614_v9  ;;  %5932 = vmatpush3.bf16.msra.mxu1 %v6629_v7 }
 0xab3   :  { %v3107_v20 = vadd.f32 %v3106_v15, %v8202_v16  ;;  %v3108_v21 = vpop.f32.mrb[157].mxu1  ;;  %4181 = vmatprep.subr.bf16.mxu0 %v6619_v11  ;;  %5933 = vmatprep.subr.bf16.mxu1 %v6636_v8  ;;  %v6638_v15 = vld [vmem:[%s9099_s3 + $0x208] ss:$28 sps:$4 sm:$0xff]  }
 0xab4   :  { %v3109_v24 = vadd.f32 %v3108_v21, %v8205_v17  ;;  %v3110_v25 = vpop.f32.mrb[158].mxu1  ;;  %3999 = vmatprep.mubr.bf16.mxu0 %v8285_v14  ;;  %4112 = vmatprep.mubr.bf16.mxu1 %v8285_v14 }
 0xab5   :  { %v3111_v26 = vadd.f32 %v3110_v25, %v8202_v16  ;;  %v3112_v27 = vpop.f32.mrb[159].mxu1  ;;  %4000 = vmatmul.mubr.bf16.gmra.mrb[56].mxu0 %v8283_v13  ;;  %4113 = vmatmul.mubr.bf16.gmra.mrb[184].mxu1 %v8283_v13  ;;  %v3167_v34 = vmax.f32 %v3107_v20, 0.0  ;;  %v6643_v20 = vld [vmem:[%s9099_s3 + $0x244] ss:$28 sps:$4 sm:$0xff]  }
 0xab6   :  { %v3113_v28 = vadd.f32 %v3112_v27, %v8205_v17  ;;  %4182 = vmatpush1.bf16.msra.mxu0 %v6617_v18  ;;  %5934 = vmatpush3.bf16.msra.mxu1 %v6637_v19  ;;  %v3168_v41 = vmax.f32 %v3109_v24, 0.0 }
 0xab7   :  { %v3169_v37 = vmax.f32 %v3111_v26, 0.0  ;;  %4183 = vmatprep.subr.bf16.mxu0 %v6624_v22  ;;  %5935 = vmatprep.subr.bf16.mxu1 %v6644_v23  ;;  %v6641_v26 = vld [vmem:[%s9099_s3 + $0x240] ss:$28 sps:$4 sm:$0xff]  }
 0xab8   :  { %v3170_v42 = vmax.f32 %v3113_v28, 0.0 }
 0xab9   :  { %v8319_v43 = vpack.c.bf16 %v3169_v37, %v3167_v34 }
 0xaba   :  { %v8321_v44 = vpack.c.bf16 %v3170_v42, %v3168_v41  ;;  %v3116_v45 = vpop.f32.mrb[160].mxu1  ;;  %4184 = vmatpush1.bf16.msra.mxu0 %v6622_v31  ;;  %5936 = vmatpush3.bf16.msra.mxu1 %v6645_v33  ;;  %v6648_v31 = vld [vmem:[%s9099_s3 + $0x27c] ss:$28 sps:$4 sm:$0xff]  }
 0xabb   :  { %v3117_v49 = vadd.f32 %v3116_v45, %v8202_v16  ;;  %v3118_v50 = vpop.f32.mrb[161].mxu1  ;;  %4185 = vmatprep.subr.bf16.mxu0 %v6627_v39  ;;  %5937 = vmatprep.subr.bf16.mxu1 %v6652_v40  ;;  %v6646_v41 = vld [vmem:[%s9099_s3 + $0x278] ss:$28 sps:$4 sm:$0xff]  }
 0xabc   :  { %v3119_v53 = vadd.f32 %v3118_v50, %v8205_v17  ;;  %v3120_v54 = vpop.f32.mrb[162].mxu1  ;;  %4009 = vmatprep.mubr.bf16.mxu0 %v8321_v44  ;;  %4122 = vmatprep.mubr.bf16.mxu1 %v8321_v44 }
 0xabd   :  { %v3121_v55 = vadd.f32 %v3120_v54, %v8202_v16  ;;  %v3122_v56 = vpop.f32.mrb[163].mxu1  ;;  %4010 = vmatmul.mubr.bf16.gmra.mrb[60].mxu0 %v8319_v43  ;;  %4123 = vmatmul.mubr.bf16.gmra.mrb[188].mxu1 %v8319_v43  ;;  %v3171_v63 = vmax.f32 %v3117_v49, 0.0 }
 0xabe   :  { %v3123_v59 = vadd.f32 %v3122_v56, %v8205_v17  ;;  %4186 = vmatpush1.bf16.msra.mxu0 %v6625_v47  ;;  %5938 = vmatpush3.bf16.msra.mxu1 %v6653_v48  ;;  %v3172_v2 = vmax.f32 %v3119_v53, 0.0  ;;  %v6651_v47 = vld [vmem:[%s9099_s3 + $0x2b4] ss:$28 sps:$4 sm:$0xff]   ;;  %v6656_v56 = vld [vmem:[%s9099_s3 + $0x2ec] ss:$28 sps:$4 sm:$0xff]  }
 0xabf   :  { %v3173_v0 = vmax.f32 %v3121_v55, 0.0  ;;  %4187 = vmatprep.subr.bf16.mxu0 %v6632_v51  ;;  %5939 = vmatprep.subr.bf16.mxu1 %v6660_v52  ;;  %v6649_v53 = vld [vmem:[%s9099_s3 + $0x2b0] ss:$28 sps:$4 sm:$0xff]  }
 0xac0   :  { %v3174_v3 = vmax.f32 %v3123_v59, 0.0 }
 0xac1   :  { %v8352_v4 = vpack.c.bf16 %v3173_v0, %v3171_v63 }
 0xac2   :  { %v8354_v5 = vpack.c.bf16 %v3174_v3, %v3172_v2  ;;  %v3126_v46 = vpop.f32.mrb[164].mxu1  ;;  %4188 = vmatpush1.bf16.msra.mxu0 %v6630_v60  ;;  %5940 = vmatpush3.bf16.msra.mxu1 %v6661_v62 }
 0xac3   :  { %v3127_v9 = vadd.f32 %v3126_v46, %v8202_v16  ;;  %v3128_v7 = vpop.f32.mrb[165].mxu1  ;;  %4189 = vmatprep.subr.bf16.mxu0 %v6635_v1  ;;  %v6654_v1 = vld [vmem:[%s9099_s3 + $0x2e8] ss:$28 sps:$4 sm:$0xff]  }
 0xac4   :  { %v3129_v10 = vadd.f32 %v3128_v7, %v8205_v17  ;;  %v3130_v11 = vpop.f32.mrb[166].mxu1  ;;  %4019 = vmatprep.mubr.bf16.mxu0 %v8354_v5  ;;  %4132 = vmatprep.mubr.bf16.mxu1 %v8354_v5  ;;  %v6659_v46 = vld [vmem:[%s9099_s3 + $0x324] ss:$28 sps:$4 sm:$0xff]  }
 0xac5   :  { %v3131_v8 = vadd.f32 %v3130_v11, %v8202_v16  ;;  %v3132_v38 = vpop.f32.mrb[167].mxu1  ;;  %4020 = vmatmul.mubr.bf16.gmra.mrb[64].mxu0 %v8352_v4  ;;  %4133 = vmatmul.mubr.bf16.gmra.mrb[192].mxu1 %v8352_v4  ;;  %v3175_v18 = vmax.f32 %v3127_v9, 0.0 }
 0xac6   :  { %v3133_v12 = vadd.f32 %v3132_v38, %v8205_v17  ;;  %4190 = vmatpush1.bf16.msra.mxu0 %v6633_v6  ;;  %v3176_v21 = vmax.f32 %v3129_v10, 0.0  ;;  %v6662_v10 = vld [vmem:[%s9099_s3 + $0x358] ss:$28 sps:$4 sm:$0xff]  }
 0xac7   :  { %v3177_v19 = vmax.f32 %v3131_v8, 0.0  ;;  %4191 = vmatprep.subr.bf16.mxu0 %v6640_v61  ;;  %v6664_v61 = vld [vmem:[%s9099_s3 + $0x35c] ss:$28 sps:$4 sm:$0xff]  }
 0xac8   :  { %v3178_v22 = vmax.f32 %v3133_v12, 0.0 }
 0xac9   :  { %v8376_v23 = vpack.c.bf16 %v3177_v19, %v3175_v18 }
 0xaca   :  { %v8378_v24 = vpack.c.bf16 %v3178_v22, %v3176_v21  ;;  %v3136_v25 = vpop.f32.mrb[168].mxu1  ;;  %4192 = vmatpush1.bf16.msra.mxu0 %v6638_v15 }
 0xacb   :  { %v3137_v27 = vadd.f32 %v3136_v25, %v8202_v16  ;;  %v3138_v28 = vpop.f32.mrb[169].mxu1  ;;  %4193 = vmatprep.subr.bf16.mxu0 %v6643_v20 }
 0xacc   :  { %v3139_v33 = vadd.f32 %v3138_v28, %v8205_v17  ;;  %v3140_v34 = vpop.f32.mrb[170].mxu1  ;;  %4029 = vmatprep.mubr.bf16.mxu0 %v8378_v24  ;;  %4142 = vmatprep.mubr.bf16.mxu1 %v8378_v24 }
 0xacd   :  { %v3141_v37 = vadd.f32 %v3140_v34, %v8202_v16  ;;  %v3142_v39 = vpop.f32.mrb[171].mxu1  ;;  %4030 = vmatmul.mubr.bf16.gmra.mrb[68].mxu0 %v8376_v23  ;;  %4143 = vmatmul.mubr.bf16.gmra.mrb[196].mxu1 %v8376_v23  ;;  %v3179_v42 = vmax.f32 %v3137_v27, 0.0 }
 0xace   :  { %v3143_v40 = vadd.f32 %v3142_v39, %v8205_v17  ;;  %4194 = vmatpush1.bf16.msra.mxu0 %v6641_v26  ;;  %v3180_v48 = vmax.f32 %v3139_v33, 0.0 }
 0xacf   :  { %v3181_v45 = vmax.f32 %v3141_v37, 0.0  ;;  %4195 = vmatprep.subr.bf16.mxu0 %v6648_v31 }
 0xad0   :  { %v3182_v49 = vmax.f32 %v3143_v40, 0.0 }
 0xad1   :  { %v8400_v50 = vpack.c.bf16 %v3181_v45, %v3179_v42  ;;  %v3354_v42 = vsub.s32 4, %v7661_v29 }
 0xad2   :  { %v8402_v51 = vpack.c.bf16 %v3182_v49, %v3180_v48  ;;  %v3146_v52 = vpop.f32.mrb[172].mxu1  ;;  %4196 = vmatpush1.bf16.msra.mxu0 %v6646_v41 }
 0xad3   :  { %v3147_v54 = vadd.f32 %v3146_v52, %v8202_v16  ;;  %v3148_v55 = vpop.f32.mrb[173].mxu1  ;;  %4197 = vmatprep.subr.bf16.mxu0 %v6651_v47 }
 0xad4   :  { %v3149_v59 = vadd.f32 %v3148_v55, %v8205_v17  ;;  %v3150_v60 = vpop.f32.mrb[174].mxu1  ;;  %4039 = vmatprep.mubr.bf16.mxu0 %v8402_v51  ;;  %4152 = vmatprep.mubr.bf16.mxu1 %v8402_v51  ;;  %v3362_v55 = vsub.s32 6, %v7661_v29 }
 0xad5   :  { %v3151_v62 = vadd.f32 %v3150_v60, %v8202_v16  ;;  %v3152_v63 = vpop.f32.mrb[175].mxu1  ;;  %4040 = vmatmul.mubr.bf16.gmra.mrb[72].mxu0 %v8400_v50  ;;  %4153 = vmatmul.mubr.bf16.gmra.mrb[200].mxu1 %v8400_v50  ;;  %v3183_v2 = vmax.f32 %v3147_v54, 0.0 }
 0xad6   :  { %v3153_v0 = vadd.f32 %v3152_v63, %v8205_v17  ;;  %4198 = vmatpush1.bf16.msra.mxu0 %v6649_v53  ;;  %v3184_v16 = vmax.f32 %v3149_v59, 0.0  ;;  %v6657_v17 = vld [vmem:[%s9099_s3 + $0x320] ss:$28 sps:$4 sm:$0xff]  }
 0xad7   :  { %v3185_v3 = vmax.f32 %v3151_v62, 0.0  ;;  %4199 = vmatprep.subr.bf16.mxu0 %v6656_v56 }
 0xad8   :  { %v3186_v6 = vmax.f32 %v3153_v0, 0.0 }
 0xad9   :  { %v3201_v9 = vpack.c.bf16 %v3185_v3, %v3183_v2 }
 0xada   :  { %v3202_v7 = vpack.c.bf16 %v3186_v6, %v3184_v16  ;;  %4200 = vmatpush1.bf16.msra.mxu0 %v6654_v1 }
 0xadb   :  { %4201 = vmatprep.subr.bf16.mxu0 %v6659_v46 }
 0xadc   :  { %4049 = vmatprep.mubr.bf16.mxu0 %v3202_v7  ;;  %4162 = vmatprep.mubr.bf16.mxu1 %v3202_v7 }
 0xadd   :  { %4050 = vmatmul.mubr.bf16.gmra.mrb[76].mxu0 %v3201_v9  ;;  %4163 = vmatmul.mubr.bf16.gmra.mrb[204].mxu1 %v3201_v9 }
 0xade   :  { %4202 = vmatpush1.bf16.msra.mxu0 %v6657_v17  ;;  %4205 = vmatprep.mubr.bf16.mxu0 %v8213_v36 }
 0xadf   :  { %4318 = vmatprep.mubr.bf16.mxu1 %v8213_v36  ;;  %4203 = vmatprep.subr.bf16.mxu0 %v6664_v61  ;;  %v3333_v36 = vld [vmem:[#allocation2 + $0x3b] ss:$8 sm:$0x70] }
 0xae2   :  { %4204 = vmatpush1.bf16.msra.mxu0 %v6662_v10 }
 0xae5   :  { %4206 = vmatmul.mubr.bf16.vlgmr.msra.gmra.mrb[80].mxu0 %v8211_v35  ;;  %4319 = vmatmul.mubr.bf16.vlgmr.msra.gmra.mrb[208].mxu1 %v8211_v35  ;;  %v3332_v35 = vld [vmem:[#allocation2 + $0x3b] ss:$8 sm:$0xf] }
 0xae6   :  { %4215 = vmatprep.mubr.bf16.mxu0 %v8249_v58  ;;  %4326 = vmatprep.mubr.bf16.mxu1 %v8249_v58  ;;  %v3346_v58 = vsub.s32 2, %v7661_v29 }
 0xaed   :  { %4216 = vmatmul.mubr.bf16.gmra.mrb[84].mxu0 %v8247_v57  ;;  %4327 = vmatmul.mubr.bf16.gmra.mrb[212].mxu1 %v8247_v57  ;;  %v8461_v57 = vor.u32 %v3333_v36, %v3332_v35 }
 0xaee   :  { %4225 = vmatprep.mubr.bf16.mxu0 %v8285_v14  ;;  %4334 = vmatprep.mubr.bf16.mxu1 %v8285_v14 }
 0xaef   :  { %v8467_v14 = vrot.slane %v8461_v57, %v7664_v30 }
 0xaf5   :  { %4226 = vmatmul.mubr.bf16.gmra.mrb[88].mxu0 %v8283_v13  ;;  %4335 = vmatmul.mubr.bf16.gmra.mrb[216].mxu1 %v8283_v13  ;;  %v3350_v13 = vsub.s32 3, %v7661_v29 }
 0xaf6   :  { %4235 = vmatprep.mubr.bf16.mxu0 %v8321_v44  ;;  %4342 = vmatprep.mubr.bf16.mxu1 %v8321_v44  ;;  %v8474_v44 = vrot.slane %v8461_v57, %v7667_v32 }
 0xafd   :  { %4236 = vmatmul.mubr.bf16.gmra.mrb[92].mxu0 %v8319_v43  ;;  %4343 = vmatmul.mubr.bf16.gmra.mrb[220].mxu1 %v8319_v43  ;;  %v8470_v43 = vrot.slane %v8461_v57, %v3346_v58 }
 0xafe   :  { %4245 = vmatprep.mubr.bf16.mxu0 %v8354_v5  ;;  %4350 = vmatprep.mubr.bf16.mxu1 %v8354_v5 }
 0xb05   :  { %4246 = vmatmul.mubr.bf16.gmra.mrb[96].mxu0 %v8352_v4  ;;  %4351 = vmatmul.mubr.bf16.gmra.mrb[224].mxu1 %v8352_v4  ;;  %v8477_v4 = vrot.slane %v8461_v57, %v3350_v13  ;;  %v8505_v13 = vrot.slane %v8461_v57, %v3362_v55 }
 0xb06   :  { %4255 = vmatprep.mubr.bf16.mxu0 %v8378_v24  ;;  %4358 = vmatprep.mubr.bf16.mxu1 %v8378_v24 }
 0xb0d   :  { %4256 = vmatmul.mubr.bf16.gmra.mrb[100].mxu0 %v8376_v23  ;;  %4359 = vmatmul.mubr.bf16.gmra.mrb[228].mxu1 %v8376_v23 }
 0xb0e   :  { %4265 = vmatprep.mubr.bf16.mxu0 %v8402_v51  ;;  %4366 = vmatprep.mubr.bf16.mxu1 %v8402_v51 }
 0xb15   :  { %4266 = vmatmul.mubr.bf16.gmra.mrb[104].mxu0 %v8400_v50  ;;  %4367 = vmatmul.mubr.bf16.gmra.mrb[232].mxu1 %v8400_v50  ;;  %v3358_v50 = vsub.s32 5, %v7661_v29 }
 0xb16   :  { %4275 = vmatprep.mubr.bf16.mxu0 %v3202_v7  ;;  %4374 = vmatprep.mubr.bf16.mxu1 %v3202_v7  ;;  %v8499_v7 = vrot.slane %v8461_v57, %v3354_v42 }
 0xb17   :  { %v8502_v17 = vrot.slane %v8461_v57, %v3358_v50 }
 0xb1d   :  { %4276 = vmatmul.mubr.bf16.gmra.mrb[108].mxu0 %v3201_v9  ;;  %4375 = vmatmul.mubr.bf16.gmra.mrb[236].mxu1 %v3201_v9 }
 0xb78   :  { %v3981_v5 = vpop.f32.mrb[48].mxu0  ;;  %v4094_v11 = vpop.f32.mrb[176].mxu1 }
 0xb79   :  { %v3982_v8 = vadd.f32 %v3981_v5, %v8467_v14  ;;  %v4095_v38 = vadd.f32 %v4094_v11, %v8470_v43  ;;  %v3983_v12 = vpop.f32.mrb[49].mxu0  ;;  %v4096_v15 = vpop.f32.mrb[177].mxu1 }
 0xb7a   :  { %v3984_v30 = vadd.f32 %v3983_v12, %v8474_v44  ;;  %v4097_v18 = vadd.f32 %v4096_v15, %v8477_v4  ;;  %v3985_v19 = vpop.f32.mrb[50].mxu0  ;;  %v4098_v20 = vpop.f32.mrb[178].mxu1 }
 0xb7b   :  { %v4383_v21 = vmul.f32 0.5, %v3982_v8  ;;  %v4385_v32 = vmul.f32 0.5, %v4095_v38  ;;  %v3986_v22 = vadd.f32 %v3985_v19, %v8467_v14  ;;  %v4099_v23 = vadd.f32 %v4098_v20, %v8470_v43  ;;  %v3987_v24 = vpop.f32.mrb[51].mxu0  ;;  %v4100_v25 = vpop.f32.mrb[179].mxu1 }
 0xb7c   :  { %v4384_v26 = vmul.f32 0.5, %v3984_v30  ;;  %v4386_v27 = vmul.f32 0.5, %v4097_v18  ;;  %v3988_v28 = vadd.f32 %v3987_v24, %v8474_v44  ;;  %v4101_v31 = vadd.f32 %v4100_v25, %v8477_v4 }
 0xb7d   :  { %6665 = vtanh.f32 %v4383_v21  ;;  %v4390_v33 = vmul.f32 0.5, %v3986_v22  ;;  %v4392_v34 = vmul.f32 0.5, %v4099_v23 }
 0xb7e   :  { %6667 = vtanh.f32 %v4385_v32  ;;  %v4391_v37 = vmul.f32 0.5, %v3988_v28  ;;  %v4393_v39 = vmul.f32 0.5, %v4101_v31 }
 0xb7f   :  { %6669 = vtanh.f32 %v4384_v26 }
 0xb80   :  { %6671 = vtanh.f32 %v4386_v27  ;;  %v3991_v40 = vpop.f32.mrb[52].mxu0  ;;  %v4104_v41 = vpop.f32.mrb[180].mxu1 }
 0xb81   :  { %6673 = vtanh.f32 %v4390_v33  ;;  %v3992_v45 = vadd.f32 %v3991_v40, %v8467_v14  ;;  %v4105_v47 = vadd.f32 %v4104_v41, %v8470_v43  ;;  %v3993_v48 = vpop.f32.mrb[53].mxu0  ;;  %v4106_v49 = vpop.f32.mrb[181].mxu1 }
 0xb82   :  { %6675 = vtanh.f32 %v4392_v34  ;;  %v3994_v51 = vadd.f32 %v3993_v48, %v8474_v44  ;;  %v4107_v52 = vadd.f32 %v4106_v49, %v8477_v4  ;;  %v3995_v53 = vpop.f32.mrb[54].mxu0  ;;  %v4108_v54 = vpop.f32.mrb[182].mxu1 }
 0xb83   :  { %6677 = vtanh.f32 %v4391_v37  ;;  %v4397_v56 = vmul.f32 0.5, %v3992_v45  ;;  %v4399_v59 = vmul.f32 0.5, %v4105_v47  ;;  %v3996_v60 = vadd.f32 %v3995_v53, %v8467_v14  ;;  %v3997_v62 = vpop.f32.mrb[55].mxu0  ;;  %v4110_v63 = vpop.f32.mrb[183].mxu1 }
 0xb84   :  { %6679 = vtanh.f32 %v4393_v39  ;;  %v4398_v0 = vmul.f32 0.5, %v3994_v51  ;;  %v4400_v1 = vmul.f32 0.5, %v4107_v52  ;;  %v4109_v2 = vadd.f32 %v4108_v54, %v8470_v43 }
 0xb85   :  { %6681 = vtanh.f32 %v4397_v56  ;;  %v4404_v3 = vmul.f32 0.5, %v3996_v60  ;;  %v3998_v46 = vadd.f32 %v3997_v62, %v8474_v44  ;;  %v4111_v16 = vadd.f32 %v4110_v63, %v8477_v4 }
 0xb86   :  { %6683 = vtanh.f32 %v4399_v59  ;;  %v4406_v29 = vmul.f32 0.5, %v4109_v2 }
 0xb87   :  { %v6666_v6 = vpop.eup %6665  ;;  %6685 = vtanh.f32 %v4398_v0  ;;  %v4405_v9 = vmul.f32 0.5, %v3998_v46  ;;  %v4407_v35 = vmul.f32 0.5, %v4111_v16 }
 0xb88   :  { %v6668_v61 = vpop.eup %6667  ;;  %v4607_v10 = vmul.f32 0.5, %v6666_v6  ;;  %6687 = vtanh.f32 %v4400_v1  ;;  %v4001_v36 = vpop.f32.mrb[56].mxu0 }
 0xb89   :  { %v4114_v58 = vpop.f32.mrb[184].mxu1  ;;  %v6670_v5 = vpop.eup %6669  ;;  %v4609_v11 = vmul.f32 0.5, %v6668_v61  ;;  %6689 = vtanh.f32 %v4404_v3  ;;  %v4002_v8 = vadd.f32 %v4001_v36, %v8467_v14 }
 0xb8a   :  { %v4115_v38 = vadd.f32 %v4114_v58, %v8470_v43  ;;  %v4003_v12 = vpop.f32.mrb[57].mxu0  ;;  %v4116_v15 = vpop.f32.mrb[185].mxu1  ;;  %v4719_v18 = vadd.f32 0.5, %v4607_v10  ;;  %v4608_v19 = vmul.f32 0.5, %v6670_v5  ;;  %6691 = vtanh.f32 %v4406_v29 }
 0xb8b   :  { %v6672_v30 = vpop.eup %6671  ;;  %v4004_v20 = vadd.f32 %v4003_v12, %v8474_v44  ;;  %v4005_v21 = vpop.f32.mrb[58].mxu0  ;;  %v4721_v57 = vadd.f32 0.5, %v4609_v11  ;;  %6693 = vtanh.f32 %v4405_v9  ;;  %v4411_v24 = vmul.f32 0.5, %v4002_v8 }
 0xb8c   :  { %v4118_v32 = vpop.f32.mrb[186].mxu1  ;;  %v6674_v22 = vpop.eup %6673  ;;  %v4610_v23 = vmul.f32 0.5, %v6672_v30  ;;  %v4720_v28 = vadd.f32 0.5, %v4608_v19  ;;  %6695 = vtanh.f32 %v4407_v35  ;;  %v4413_v33 = vmul.f32 0.5, %v4115_v38 }
 0xb8d   :  { %v4007_v25 = vpop.f32.mrb[59].mxu0  ;;  %v8510_v26 = vpop.f32.mrb[187].mxu1  ;;  %v4614_v31 = vmul.f32 0.5, %v6674_v22  ;;  %6697 = vtanh.f32 %v4411_v24  ;;  %v4412_v40 = vmul.f32 0.5, %v4004_v20  ;;  %v4117_v55 = vadd.f32 %v4116_v15, %v8477_v4 }
 0xb8e   :  { %v6676_v27 = vpop.eup %6675  ;;  %v4722_v37 = vadd.f32 0.5, %v4610_v23  ;;  %v5710_v42 = vpack.c.bf16 %v4720_v28, %v4719_v18  ;;  %6699 = vtanh.f32 %v4413_v33  ;;  %v4006_v56 = vadd.f32 %v4005_v21, %v8467_v14 }
 0xb8f   :  { %v6678_v34 = vpop.eup %6677  ;;  %v4616_v39 = vmul.f32 0.5, %v6676_v27  ;;  %v4726_v45 = vadd.f32 0.5, %v4614_v31  ;;  %6701 = vtanh.f32 %v4412_v40  ;;  %v4119_v1 = vadd.f32 %v4118_v32, %v8470_v43 }
 0xb90   :  { %v6680_v41 = vpop.eup %6679  ;;  %v4615_v47 = vmul.f32 0.5, %v6678_v34  ;;  %v5711_v49 = vpack.c.bf16 %v4722_v37, %v4721_v57  ;;  %5183 = vst [vmem:[%s9102_s6] sm:$0xff] %v5710_v42  ;;  %v4011_v59 = vpop.f32.mrb[60].mxu0  ;;  %v4008_v2 = vadd.f32 %v4007_v25, %v8474_v44  ;;  %v4414_v61 = vmul.f32 0.5, %v4117_v55 }
 0xb91   :  { %v6682_v48 = vpop.eup %6681  ;;  %v4728_v50 = vadd.f32 0.5, %v4616_v39  ;;  %v4617_v51 = vmul.f32 0.5, %v6680_v41  ;;  %v4124_v60 = vpop.f32.mrb[188].mxu1  ;;  %v4418_v8 = vmul.f32 0.5, %v4006_v56  ;;  %v4420_v19 = vmul.f32 0.5, %v4119_v1 }
 0xb92   :  { %v6684_v52 = vpop.eup %6683  ;;  %v4727_v53 = vadd.f32 0.5, %v4615_v47  ;;  %v4621_v54 = vmul.f32 0.5, %v6682_v48  ;;  %5184 = vst [vmem:[%s9102_s6 + $0x8] sm:$0xff] %v5711_v49  ;;  %v4013_v3 = vpop.f32.mrb[61].mxu0  ;;  %6703 = vtanh.f32 %v4414_v61  ;;  %v4419_v22 = vmul.f32 0.5, %v4008_v2 }
 0xb93   :  { %v6686_v62 = vpop.eup %6685  ;;  %v4729_v63 = vadd.f32 0.5, %v4617_v51  ;;  %v4623_v0 = vmul.f32 0.5, %v6684_v52  ;;  %v8522_v46 = vpop.f32.mrb[189].mxu1  ;;  %6705 = vtanh.f32 %v4418_v8  ;;  %v4121_v40 = vadd.f32 %v8510_v26, %v8477_v4 }
 0xb94   :  { %v6688_v16 = vpop.eup %6687  ;;  %v5714_v29 = vpack.c.bf16 %v4727_v53, %v4726_v45  ;;  %v4733_v6 = vadd.f32 0.5, %v4621_v54  ;;  %v4622_v9 = vmul.f32 0.5, %v6686_v62  ;;  %v8524_v10 = vpop.f32.mrb[62].mxu0  ;;  %6707 = vtanh.f32 %v4420_v19 }
 0xb95   :  { %v8526_v35 = vpop.f32.mrb[190].mxu1  ;;  %v6690_v36 = vpop.eup %6689  ;;  %v5715_v58 = vpack.c.bf16 %v4729_v63, %v4728_v50  ;;  %v4735_v5 = vadd.f32 0.5, %v4623_v0  ;;  %v4624_v11 = vmul.f32 0.5, %v6688_v16  ;;  %6709 = vtanh.f32 %v4419_v22 }
 0xb96   :  { %v4017_v38 = vpop.f32.mrb[63].mxu0  ;;  %v8528_v12 = vpop.f32.mrb[191].mxu1  ;;  %5188 = vst [vmem:[%s9102_s6 + $0x1c] sm:$0xff] %v5714_v29  ;;  %v4734_v30 = vadd.f32 0.5, %v4622_v9  ;;  %v4628_v18 = vmul.f32 0.5, %v6690_v36  ;;  %v4012_v41 = vadd.f32 %v4011_v59, %v8467_v14  ;;  %v4125_v50 = vadd.f32 %v4124_v60, %v8470_v43 }
 0xb97   :  { %v6692_v15 = vpop.eup %6691  ;;  %5189 = vst [vmem:[%s9102_s6 + $0x24] sm:$0xff] %v5715_v58  ;;  %v4736_v21 = vadd.f32 0.5, %v4624_v11  ;;  %v4014_v51 = vadd.f32 %v4013_v3, %v8474_v44  ;;  %v4421_v56 = vmul.f32 0.5, %v4121_v40  ;;  %v4016_v9 = vadd.f32 %v8524_v10, %v8467_v14 }
 0xb98   :  { %v6694_v20 = vpop.eup %6693  ;;  %v4630_v32 = vmul.f32 0.5, %v6692_v15  ;;  %v5718_v23 = vpack.c.bf16 %v4734_v30, %v4733_v6  ;;  %v4740_v24 = vadd.f32 0.5, %v4628_v18  ;;  %v4021_v42 = vpop.f32.mrb[64].mxu0  ;;  %v4425_v1 = vmul.f32 0.5, %v4012_v41 }
 0xb99   :  { %v6696_v57 = vpop.eup %6695  ;;  %v4629_v25 = vmul.f32 0.5, %v6694_v20  ;;  %v5719_v28 = vpack.c.bf16 %v4736_v21, %v4735_v5  ;;  %v4134_v45 = vpop.f32.mrb[192].mxu1  ;;  %v4427_v2 = vmul.f32 0.5, %v4125_v50  ;;  %6711 = vtanh.f32 %v4421_v56 }
 0xb9a   :  { %v6698_v27 = vpop.eup %6697  ;;  %v4742_v31 = vadd.f32 0.5, %v4630_v32  ;;  %v4631_v33 = vmul.f32 0.5, %v6696_v57  ;;  %5192 = vst [vmem:[%s9102_s6 + $0x38] sm:$0xff] %v5718_v23  ;;  %v8547_v52 = vpop.f32.mrb[65].mxu0  ;;  %v4426_v3 = vmul.f32 0.5, %v4014_v51  ;;  %v4127_v6 = vadd.f32 %v8522_v46, %v8477_v4 }
 0xb9b   :  { %v6700_v34 = vpop.eup %6699  ;;  %v4741_v37 = vadd.f32 0.5, %v4629_v25  ;;  %v4635_v39 = vmul.f32 0.5, %v6698_v27  ;;  %5193 = vst [vmem:[%s9102_s6 + $0x40] sm:$0xff] %v5719_v28  ;;  %v8549_v53 = vpop.f32.mrb[193].mxu1  ;;  %6713 = vtanh.f32 %v4425_v1  ;;  %v4129_v61 = vadd.f32 %v8526_v35, %v8470_v43 }
 0xb9c   :  { %v6702_v47 = vpop.eup %6701  ;;  %v4743_v48 = vadd.f32 0.5, %v4631_v33  ;;  %v4637_v49 = vmul.f32 0.5, %v6700_v34  ;;  %v4025_v59 = vpop.f32.mrb[66].mxu0  ;;  %v4018_v36 = vadd.f32 %v4017_v38, %v8474_v44  ;;  %6715 = vtanh.f32 %v4427_v2 }
 0xb9d   :  { %v5722_v26 = vpack.c.bf16 %v4741_v37, %v4740_v24  ;;  %v4747_v54 = vadd.f32 0.5, %v4635_v39  ;;  %v4636_v55 = vmul.f32 0.5, %v6702_v47  ;;  %v4138_v62 = vpop.f32.mrb[194].mxu1  ;;  %v4027_v16 = vpop.f32.mrb[67].mxu0  ;;  %v4428_v11 = vmul.f32 0.5, %v4127_v6 }
 0xb9e   :  { %v5723_v63 = vpack.c.bf16 %v4743_v48, %v4742_v31  ;;  %v4749_v0 = vadd.f32 0.5, %v4637_v49  ;;  %v8551_v29 = vpop.f32.mrb[195].mxu1  ;;  %v6704_v58 = vpop.eup %6703  ;;  %v4131_v46 = vadd.f32 %v8528_v12, %v8477_v4  ;;  %6717 = vtanh.f32 %v4426_v3 }
 0xb9f   :  { %5196 = vst [vmem:[%s9102_s6 + $0x54] sm:$0xff] %v5722_v26  ;;  %v4748_v60 = vadd.f32 0.5, %v4636_v55  ;;  %v6706_v8 = vpop.eup %6705  ;;  %v4638_v15 = vmul.f32 0.5, %v6704_v58  ;;  %v4432_v30 = vmul.f32 0.5, %v4016_v9  ;;  %v4434_v18 = vmul.f32 0.5, %v4129_v61 }
 0xba0   :  { %5197 = vst [vmem:[%s9102_s6 + $0x5c] sm:$0xff] %v5723_v63  ;;  %v6708_v19 = vpop.eup %6707  ;;  %v4642_v10 = vmul.f32 0.5, %v6706_v8  ;;  %6719 = vtanh.f32 %v4428_v11  ;;  %v4433_v35 = vmul.f32 0.5, %v4018_v36  ;;  %v4435_v38 = vmul.f32 0.5, %v4131_v46  ;;  %v4031_v20 = vpop.f32.mrb[68].mxu0 }
 0xba1   :  { %v5726_v5 = vpack.c.bf16 %v4748_v60, %v4747_v54  ;;  %v8571_v21 = vpop.f32.mrb[196].mxu1  ;;  %v6710_v32 = vpop.eup %6709  ;;  %v4750_v22 = vadd.f32 0.5, %v4638_v15  ;;  %v4644_v12 = vmul.f32 0.5, %v6708_v19  ;;  %6721 = vtanh.f32 %v4432_v30 }
 0xba2   :  { %v4022_v57 = vadd.f32 %v4021_v42, %v8467_v14  ;;  %v8574_v23 = vpop.f32.mrb[69].mxu0  ;;  %v8576_v24 = vpop.f32.mrb[197].mxu1  ;;  %v4754_v25 = vadd.f32 0.5, %v4642_v10  ;;  %v4643_v27 = vmul.f32 0.5, %v6710_v32  ;;  %6723 = vtanh.f32 %v4434_v18 }
 0xba3   :  { %5200 = vst [vmem:[%s9102_s6 + $0x70] sm:$0xff] %v5726_v5  ;;  %v4135_v28 = vadd.f32 %v4134_v45, %v8470_v43  ;;  %v8579_v31 = vpop.f32.mrb[70].mxu0  ;;  %v8581_v33 = vpop.f32.mrb[198].mxu1  ;;  %v5727_v34 = vpack.c.bf16 %v4750_v22, %v4749_v0  ;;  %v4756_v37 = vadd.f32 0.5, %v4644_v12  ;;  %6725 = vtanh.f32 %v4433_v35 }
 0xba4   :  { %v4439_v39 = vmul.f32 0.5, %v4022_v57  ;;  %v8583_v40 = vpop.f32.mrb[71].mxu0  ;;  %v8585_v41 = vpop.f32.mrb[199].mxu1  ;;  %v4755_v42 = vadd.f32 0.5, %v4643_v27  ;;  %6727 = vtanh.f32 %v4435_v38  ;;  %v4024_v48 = vadd.f32 %v8547_v52, %v8474_v44 }
 0xba5   :  { %v4441_v47 = vmul.f32 0.5, %v4135_v28  ;;  %5201 = vst [vmem:[%s9102_s6 + $0x78] sm:$0xff] %v5727_v34  ;;  %v4137_v45 = vadd.f32 %v8549_v53, %v8477_v4  ;;  %v4026_v49 = vadd.f32 %v4025_v59, %v8467_v14  ;;  %v4139_v50 = vadd.f32 %v4138_v62, %v8470_v43  ;;  %v6712_v51 = vpop.eup %6711 }
 0xba6   :  { %6729 = vtanh.f32 %v4439_v39  ;;  %v5730_v26 = vpack.c.bf16 %v4755_v42, %v4754_v25  ;;  %v4440_v54 = vmul.f32 0.5, %v4024_v48  ;;  %v4028_v55 = vadd.f32 %v4027_v16, %v8474_v44  ;;  %v6714_v56 = vpop.eup %6713 }
 0xba7   :  { %6731 = vtanh.f32 %v4441_v47  ;;  %v4645_v52 = vmul.f32 0.5, %v6712_v51  ;;  %v4442_v63 = vmul.f32 0.5, %v4137_v45  ;;  %v4446_v0 = vmul.f32 0.5, %v4026_v49  ;;  %v6716_v2 = vpop.eup %6715 }
 0xba8   :  { %v4448_v1 = vmul.f32 0.5, %v4139_v50  ;;  %5204 = vst [vmem:[%s9102_s6 + $0x8c] sm:$0xff] %v5730_v26  ;;  %v4649_v53 = vmul.f32 0.5, %v6714_v56  ;;  %6733 = vtanh.f32 %v4440_v54  ;;  %v4447_v59 = vmul.f32 0.5, %v4028_v55  ;;  %v8602_v60 = vpop.f32.mrb[72].mxu0  ;;  %v8604_v3 = vpop.f32.mrb[200].mxu1 }
 0xba9   :  { %v4141_v62 = vadd.f32 %v8551_v29, %v8477_v4  ;;  %v6718_v16 = vpop.eup %6717  ;;  %v4757_v6 = vadd.f32 0.5, %v4645_v52  ;;  %v4651_v9 = vmul.f32 0.5, %v6716_v2  ;;  %6735 = vtanh.f32 %v4442_v63  ;;  %v8607_v36 = vpop.f32.mrb[73].mxu0 }
 0xbaa   :  { %v4032_v61 = vadd.f32 %v4031_v20, %v8467_v14  ;;  %v8609_v58 = vpop.f32.mrb[201].mxu1  ;;  %v6720_v5 = vpop.eup %6719  ;;  %v4761_v11 = vadd.f32 0.5, %v4649_v53  ;;  %v4650_v46 = vmul.f32 0.5, %v6718_v16  ;;  %6737 = vtanh.f32 %v4446_v0 }
 0xbab   :  { %v4449_v8 = vmul.f32 0.5, %v4141_v62  ;;  %v8611_v29 = vpop.f32.mrb[74].mxu0  ;;  %v8613_v15 = vpop.f32.mrb[202].mxu1  ;;  %v5731_v18 = vpack.c.bf16 %v4757_v6, %v4756_v37  ;;  %v4763_v19 = vadd.f32 0.5, %v4651_v9  ;;  %v4652_v10 = vmul.f32 0.5, %v6720_v5 }
 0xbac   :  { %v6722_v30 = vpop.eup %6721  ;;  %6739 = vtanh.f32 %v4448_v1  ;;  %v8615_v35 = vpop.f32.mrb[75].mxu0  ;;  %v4762_v32 = vadd.f32 0.5, %v4650_v46  ;;  %v4453_v12 = vmul.f32 0.5, %v4032_v61  ;;  %v4145_v28 = vadd.f32 %v8571_v21, %v8470_v43 }
 0xbad   :  { %v8617_v38 = vpop.f32.mrb[203].mxu1  ;;  %v6724_v20 = vpop.eup %6723  ;;  %v4656_v22 = vmul.f32 0.5, %v6722_v30  ;;  %6741 = vtanh.f32 %v4447_v59  ;;  %5205 = vst [vmem:[%s9102_s6 + $0x94] sm:$0xff] %v5731_v18  ;;  %v4764_v25 = vadd.f32 0.5, %v4652_v10  ;;  %v4034_v21 = vadd.f32 %v8574_v23, %v8474_v44 }
 0xbae   :  { %v6726_v57 = vpop.eup %6725  ;;  %v4658_v27 = vmul.f32 0.5, %v6724_v20  ;;  %6743 = vtanh.f32 %v4449_v8  ;;  %v5734_v37 = vpack.c.bf16 %v4762_v32, %v4761_v11  ;;  %v4455_v50 = vmul.f32 0.5, %v4145_v28 }
 0xbaf   :  { %v6728_v34 = vpop.eup %6727  ;;  %v4768_v39 = vadd.f32 0.5, %v4656_v22  ;;  %v4657_v42 = vmul.f32 0.5, %v6726_v57  ;;  %6745 = vtanh.f32 %v4453_v12  ;;  %v5735_v48 = vpack.c.bf16 %v4764_v25, %v4763_v19 }
 0xbb0   :  { %v6730_v47 = vpop.eup %6729  ;;  %v4770_v45 = vadd.f32 0.5, %v4658_v27  ;;  %v4659_v49 = vmul.f32 0.5, %v6728_v34  ;;  %5208 = vst [vmem:[%s9102_s6 + $0xa8] sm:$0xff] %v5734_v37  ;;  %v4147_v55 = vadd.f32 %v8576_v24, %v8477_v4  ;;  %v8631_v56 = vpop.f32.mrb[76].mxu0  ;;  %6747 = vtanh.f32 %v4455_v50 }
 0xbb1   :  { %v6732_v51 = vpop.eup %6731  ;;  %v4769_v26 = vadd.f32 0.5, %v4657_v42  ;;  %v4663_v54 = vmul.f32 0.5, %v6730_v47  ;;  %v8633_v52 = vpop.f32.mrb[204].mxu1  ;;  %5209 = vst [vmem:[%s9102_s6 + $0xb0] sm:$0xff] %v5735_v48  ;;  %v4036_v1 = vadd.f32 %v8579_v31, %v8467_v14  ;;  %v4454_v62 = vmul.f32 0.5, %v4034_v21 }
 0xbb2   :  { %v4771_v63 = vadd.f32 0.5, %v4659_v49  ;;  %v4665_v0 = vmul.f32 0.5, %v6732_v51  ;;  %v8640_v2 = vpop.f32.mrb[77].mxu0  ;;  %v8642_v23 = vpop.f32.mrb[205].mxu1  ;;  %v4456_v16 = vmul.f32 0.5, %v4147_v55  ;;  %v4149_v10 = vadd.f32 %v8581_v33, %v8470_v43 }
 0xbb3   :  { %v6734_v53 = vpop.eup %6733  ;;  %v5738_v24 = vpack.c.bf16 %v4769_v26, %v4768_v39  ;;  %v4775_v59 = vadd.f32 0.5, %v4663_v54  ;;  %v8644_v6 = vpop.f32.mrb[78].mxu0  ;;  %v4460_v8 = vmul.f32 0.5, %v4036_v1  ;;  %6749 = vtanh.f32 %v4454_v62 }
 0xbb4   :  { %v8646_v9 = vpop.f32.mrb[206].mxu1  ;;  %v6736_v61 = vpop.eup %6735  ;;  %v5739_v5 = vpack.c.bf16 %v4771_v63, %v4770_v45  ;;  %v4777_v11 = vadd.f32 0.5, %v4665_v0  ;;  %v4664_v46 = vmul.f32 0.5, %v6734_v53  ;;  %v4038_v20 = vadd.f32 %v8583_v40, %v8474_v44 }
 0xbb5   :  { %v8648_v30 = vpop.f32.mrb[79].mxu0  ;;  %v8650_v31 = vpop.f32.mrb[207].mxu1  ;;  %5212 = vst [vmem:[%s9102_s6 + $0xc4] sm:$0xff] %v5738_v24  ;;  %v4666_v19 = vmul.f32 0.5, %v6736_v61  ;;  %6751 = vtanh.f32 %v4456_v16  ;;  %v4151_v57 = vadd.f32 %v8585_v41, %v8477_v4  ;;  %v4462_v34 = vmul.f32 0.5, %v4149_v10 }
 0xbb6   :  { %v6738_v18 = vpop.eup %6737  ;;  %5213 = vst [vmem:[%s9102_s6 + $0xcc] sm:$0xff] %v5739_v5  ;;  %v4776_v22 = vadd.f32 0.5, %v4664_v46  ;;  %6753 = vtanh.f32 %v4460_v8  ;;  %v4461_v42 = vmul.f32 0.5, %v4038_v20  ;;  %v4042_v0 = vadd.f32 %v8602_v60, %v8467_v14 }
 0xbb7   :  { %v6740_v32 = vpop.eup %6739  ;;  %v4670_v12 = vmul.f32 0.5, %v6738_v18  ;;  %v4778_v27 = vadd.f32 0.5, %v4666_v19  ;;  %6755 = vtanh.f32 %v4462_v34  ;;  %v4463_v54 = vmul.f32 0.5, %v4151_v57 }
 0xbb8   :  { %v6742_v25 = vpop.eup %6741  ;;  %v4672_v28 = vmul.f32 0.5, %v6740_v32  ;;  %v5742_v37 = vpack.c.bf16 %v4776_v22, %v4775_v59  ;;  %v8664_v50 = vpop.f32.mrb[80].mxu0  ;;  %6757 = vtanh.f32 %v4461_v42  ;;  %v4155_v1 = vadd.f32 %v8604_v3, %v8470_v43 }
 0xbb9   :  { %v6744_v33 = vpop.eup %6743  ;;  %v4782_v39 = vadd.f32 0.5, %v4670_v12  ;;  %v4671_v40 = vmul.f32 0.5, %v6742_v25  ;;  %v5743_v48 = vpack.c.bf16 %v4778_v27, %v4777_v11  ;;  %v8666_v51 = vpop.f32.mrb[208].mxu1  ;;  %v4044_v53 = vadd.f32 %v8607_v36, %v8474_v44 }
 0xbba   :  { %v6746_v47 = vpop.eup %6745  ;;  %v4784_v45 = vadd.f32 0.5, %v4672_v28  ;;  %v4673_v49 = vmul.f32 0.5, %v6744_v33  ;;  %5216 = vst [vmem:[%s9102_s6 + $0xe0] sm:$0xff] %v5742_v37  ;;  %v8671_v21 = vpop.f32.mrb[81].mxu0  ;;  %6759 = vtanh.f32 %v4463_v54  ;;  %v4157_v5 = vadd.f32 %v8609_v58, %v8477_v4 }
 0xbbb   :  { %v4783_v41 = vadd.f32 0.5, %v4671_v40  ;;  %v4677_v26 = vmul.f32 0.5, %v6746_v47  ;;  %v8673_v55 = vpop.f32.mrb[209].mxu1  ;;  %5217 = vst [vmem:[%s9102_s6 + $0xe8] sm:$0xff] %v5743_v48  ;;  %v8684_v24 = vpop.f32.mrb[82].mxu0  ;;  %v4467_v8 = vmul.f32 0.5, %v4042_v0  ;;  %v4046_v10 = vadd.f32 %v8611_v29, %v8467_v14 }
 0xbbc   :  { %v4785_v63 = vadd.f32 0.5, %v4673_v49  ;;  %v8686_v59 = vpop.f32.mrb[210].mxu1  ;;  %v6748_v62 = vpop.eup %6747  ;;  %v4469_v18 = vmul.f32 0.5, %v4155_v1  ;;  %v4468_v36 = vmul.f32 0.5, %v4044_v53  ;;  %v4470_v19 = vmul.f32 0.5, %v4157_v5 }
 0xbbd   :  { %v5746_v16 = vpack.c.bf16 %v4783_v41, %v4782_v39  ;;  %v4789_v61 = vadd.f32 0.5, %v4677_v26  ;;  %v8690_v11 = vpop.f32.mrb[83].mxu0  ;;  %v8692_v60 = vpop.f32.mrb[211].mxu1  ;;  %v4679_v3 = vmul.f32 0.5, %v6748_v62  ;;  %v4159_v58 = vadd.f32 %v8613_v15, %v8470_v43 }
 0xbbe   :  { %v5747_v46 = vpack.c.bf16 %v4785_v63, %v4784_v45  ;;  %v6750_v20 = vpop.eup %6749  ;;  %6761 = vtanh.f32 %v4467_v8  ;;  %v4048_v22 = vadd.f32 %v8615_v35, %v8474_v44  ;;  %v4161_v12 = vadd.f32 %v8617_v38, %v8477_v4 }
 0xbbf   :  { %5220 = vst [vmem:[%s9102_s6 + $0xfc] sm:$0xff] %v5746_v16  ;;  %v4791_v32 = vadd.f32 0.5, %v4679_v3  ;;  %v6752_v57 = vpop.eup %6751  ;;  %v4678_v25 = vmul.f32 0.5, %v6750_v20  ;;  %6763 = vtanh.f32 %v4469_v18  ;;  %v4474_v29 = vmul.f32 0.5, %v4046_v10 }
 0xbc0   :  { %5221 = vst [vmem:[%s9102_s6 + $0x104] sm:$0xff] %v5747_v46  ;;  %v4476_v27 = vmul.f32 0.5, %v4159_v58  ;;  %v6754_v28 = vpop.eup %6753  ;;  %v4680_v15 = vmul.f32 0.5, %v6752_v57  ;;  %6765 = vtanh.f32 %v4468_v36  ;;  %v4475_v34 = vmul.f32 0.5, %v4048_v22  ;;  %v8708_v37 = vpop.f32.mrb[84].mxu0 }
 0xbc1   :  { %v4477_v33 = vmul.f32 0.5, %v4161_v12  ;;  %v8710_v39 = vpop.f32.mrb[212].mxu1  ;;  %v4790_v40 = vadd.f32 0.5, %v4678_v25  ;;  %v4684_v42 = vmul.f32 0.5, %v6754_v28  ;;  %6767 = vtanh.f32 %v4470_v19  ;;  %v8714_v38 = vpop.f32.mrb[85].mxu0 }
 0xbc2   :  { %v4052_v35 = vadd.f32 %v8631_v56, %v8467_v14  ;;  %v8716_v47 = vpop.f32.mrb[213].mxu1  ;;  %v6756_v48 = vpop.eup %6755  ;;  %v4792_v45 = vadd.f32 0.5, %v4680_v15  ;;  %6769 = vtanh.f32 %v4474_v29  ;;  %v4165_v49 = vadd.f32 %v8633_v52, %v8470_v43 }
 0xbc3   :  { %v4054_v41 = vadd.f32 %v8640_v2, %v8474_v44  ;;  %v8722_v26 = vpop.f32.mrb[86].mxu0  ;;  %v8724_v54 = vpop.f32.mrb[214].mxu1  ;;  %v5750_v0 = vpack.c.bf16 %v4790_v40, %v4789_v61  ;;  %v4796_v56 = vadd.f32 0.5, %v4684_v42  ;;  %v4686_v1 = vmul.f32 0.5, %v6756_v48 }
 0xbc4   :  { %v6758_v63 = vpop.eup %6757  ;;  %6771 = vtanh.f32 %v4476_v27  ;;  %v8726_v53 = vpop.f32.mrb[87].mxu0  ;;  %v5751_v16 = vpack.c.bf16 %v4792_v45, %v4791_v32  ;;  %v4481_v52 = vmul.f32 0.5, %v4052_v35  ;;  %v4483_v3 = vmul.f32 0.5, %v4165_v49 }
 0xbc5   :  { %v8728_v62 = vpop.f32.mrb[215].mxu1  ;;  %v4685_v5 = vmul.f32 0.5, %v6758_v63  ;;  %6773 = vtanh.f32 %v4475_v34  ;;  %v6760_v46 = vpop.eup %6759  ;;  %5224 = vst [vmem:[%s9102_s6 + $0x118] sm:$0xff] %v5750_v0  ;;  %v4798_v2 = vadd.f32 0.5, %v4686_v1  ;;  %v4482_v61 = vmul.f32 0.5, %v4054_v41 }
 0xbc6   :  { %6775 = vtanh.f32 %v4477_v33  ;;  %5225 = vst [vmem:[%s9102_s6 + $0x120] sm:$0xff] %v5751_v16  ;;  %v4687_v18 = vmul.f32 0.5, %v6760_v46  ;;  %v4167_v36 = vadd.f32 %v8642_v23, %v8477_v4  ;;  %v4056_v19 = vadd.f32 %v8644_v6, %v8467_v14 }
 0xbc7   :  { %v4797_v8 = vadd.f32 0.5, %v4685_v5  ;;  %6777 = vtanh.f32 %v4481_v52  ;;  %v4169_v10 = vadd.f32 %v8646_v9, %v8470_v43  ;;  %v4058_v58 = vadd.f32 %v8648_v30, %v8474_v44 }
 0xbc8   :  { %6779 = vtanh.f32 %v4483_v3  ;;  %v6762_v20 = vpop.eup %6761  ;;  %v4799_v22 = vadd.f32 0.5, %v4687_v18  ;;  %v4484_v12 = vmul.f32 0.5, %v4167_v36  ;;  %v8744_v57 = vpop.f32.mrb[88].mxu0  ;;  %v4488_v27 = vmul.f32 0.5, %v4056_v19 }
 0xbc9   :  { %v5754_v32 = vpack.c.bf16 %v4797_v8, %v4796_v56  ;;  %6781 = vtanh.f32 %v4482_v61  ;;  %v8746_v25 = vpop.f32.mrb[216].mxu1  ;;  %v6764_v23 = vpop.eup %6763  ;;  %v4691_v29 = vmul.f32 0.5, %v6762_v20  ;;  %v4490_v28 = vmul.f32 0.5, %v4169_v10 }
 0xbca   :  { %v4489_v14 = vmul.f32 0.5, %v4058_v58  ;;  %v8748_v6 = vpop.f32.mrb[89].mxu0  ;;  %v8750_v43 = vpop.f32.mrb[217].mxu1  ;;  %v5755_v44 = vpack.c.bf16 %v4799_v22, %v4798_v2  ;;  %v4693_v30 = vmul.f32 0.5, %v6764_v23  ;;  %6783 = vtanh.f32 %v4484_v12 }
 0xbcb   :  { %v6766_v9 = vpop.eup %6765  ;;  %5228 = vst [vmem:[%s9102_s6 + $0x134] sm:$0xff] %v5754_v32  ;;  %v4171_v15 = vadd.f32 %v8650_v31, %v8477_v4  ;;  %v8757_v34 = vpop.f32.mrb[90].mxu0  ;;  %v4803_v42 = vadd.f32 0.5, %v4691_v29  ;;  %6785 = vtanh.f32 %v4488_v27  ;;  %v4208_v48 = vadd.f32 %v8664_v50, %v8499_v7 }
 0xbcc   :  { %v8759_v33 = vpop.f32.mrb[218].mxu1  ;;  %v6768_v40 = vpop.eup %6767  ;;  %v4692_v35 = vmul.f32 0.5, %v6766_v9  ;;  %5229 = vst [vmem:[%s9102_s6 + $0x13c] sm:$0xff] %v5755_v44  ;;  %v4805_v4 = vadd.f32 0.5, %v4693_v30  ;;  %6787 = vtanh.f32 %v4490_v28  ;;  %v4210_v46 = vadd.f32 %v8671_v21, %v8502_v17 }
 0xbcd   :  { %v8763_v45 = vpop.f32.mrb[91].mxu0  ;;  %v8765_v49 = vpop.f32.mrb[219].mxu1  ;;  %v4694_v31 = vmul.f32 0.5, %v6768_v40  ;;  %v4491_v63 = vmul.f32 0.5, %v4171_v15  ;;  %6789 = vtanh.f32 %v4489_v14  ;;  %v4387_v16 = vmul.f32 0.5, %v4208_v48 }
 0xbce   :  { %v6770_v41 = vpop.eup %6769  ;;  %v4804_v56 = vadd.f32 0.5, %v4692_v35  ;;  %v4388_v58 = vmul.f32 0.5, %v4210_v46  ;;  %v5943_v23 = vadd.f32 %v8673_v55, %v8666_v51  ;;  %v4212_v29 = vadd.f32 %v8684_v24, %v8499_v7 }
 0xbcf   :  { %v6772_v0 = vpop.eup %6771  ;;  %v4698_v1 = vmul.f32 0.5, %v6770_v41  ;;  %v4806_v50 = vadd.f32 0.5, %v4694_v31  ;;  %6791 = vtanh.f32 %v4491_v63  ;;  %v4214_v30 = vadd.f32 %v8690_v11, %v8502_v17 }
 0xbd0   :  { %v6774_v5 = vpop.eup %6773  ;;  %v4700_v52 = vmul.f32 0.5, %v6772_v0  ;;  %v5758_v3 = vpack.c.bf16 %v4804_v56, %v4803_v42  ;;  %6793 = vtanh.f32 %v4387_v16  ;;  %v8772_v20 = vpop.f32.mrb[92].mxu0  ;;  %v4321_v42 = vadd.f32 %v5943_v23, %v8505_v13 }
 0xbd1   :  { %v6776_v2 = vpop.eup %6775  ;;  %v4810_v61 = vadd.f32 0.5, %v4698_v1  ;;  %v4699_v8 = vmul.f32 0.5, %v6774_v5  ;;  %v5759_v36 = vpack.c.bf16 %v4806_v50, %v4805_v4  ;;  %v8774_v32 = vpop.f32.mrb[220].mxu1  ;;  %6795 = vtanh.f32 %v4388_v58 }
 0xbd2   :  { %v6778_v18 = vpop.eup %6777  ;;  %v4812_v19 = vadd.f32 0.5, %v4700_v52  ;;  %v4701_v10 = vmul.f32 0.5, %v6776_v2  ;;  %5232 = vst [vmem:[%s9102_s6 + $0x150] sm:$0xff] %v5758_v3  ;;  %v8783_v27 = vpop.f32.mrb[93].mxu0  ;;  %v4394_v63 = vmul.f32 0.5, %v4212_v29  ;;  %v4395_v0 = vmul.f32 0.5, %v4214_v30 }
 0xbd3   :  { %v6780_v22 = vpop.eup %6779  ;;  %v4811_v21 = vadd.f32 0.5, %v4699_v8  ;;  %v4705_v12 = vmul.f32 0.5, %v6778_v18  ;;  %v8785_v28 = vpop.f32.mrb[221].mxu1  ;;  %5233 = vst [vmem:[%s9102_s6 + $0x158] sm:$0xff] %v5759_v36  ;;  %v4389_v16 = vmul.f32 0.5, %v4321_v42  ;;  %v5946_v5 = vadd.f32 %v8692_v60, %v8686_v59 }
 0xbd4   :  { %v6782_v14 = vpop.eup %6781  ;;  %v4813_v9 = vadd.f32 0.5, %v4701_v10  ;;  %v4707_v44 = vmul.f32 0.5, %v6780_v22  ;;  %v8792_v15 = vpop.f32.mrb[94].mxu0  ;;  %6797 = vtanh.f32 %v4394_v63  ;;  %v4218_v46 = vadd.f32 %v8708_v37, %v8499_v7 }
 0xbd5   :  { %v8794_v51 = vpop.f32.mrb[222].mxu1  ;;  %v5762_v55 = vpack.c.bf16 %v4811_v21, %v4810_v61  ;;  %v4817_v24 = vadd.f32 0.5, %v4705_v12  ;;  %v4706_v40 = vmul.f32 0.5, %v6782_v14  ;;  %v8797_v35 = vpop.f32.mrb[95].mxu0  ;;  %v4220_v2 = vadd.f32 %v8714_v38, %v8502_v17 }
 0xbd6   :  { %v8799_v48 = vpop.f32.mrb[223].mxu1  ;;  %v6784_v41 = vpop.eup %6783  ;;  %v5763_v4 = vpack.c.bf16 %v4813_v9, %v4812_v19  ;;  %v4819_v31 = vadd.f32 0.5, %v4707_v44  ;;  %6799 = vtanh.f32 %v4389_v16  ;;  %v4324_v19 = vadd.f32 %v5946_v5, %v8505_v13 }
 0xbd7   :  { %v6786_v56 = vpop.eup %6785  ;;  %5236 = vst [vmem:[%s9102_s6 + $0x16c] sm:$0xff] %v5762_v55  ;;  %v4818_v11 = vadd.f32 0.5, %v4706_v40  ;;  %v4708_v1 = vmul.f32 0.5, %v6784_v41  ;;  %6801 = vtanh.f32 %v4395_v0  ;;  %v4401_v12 = vmul.f32 0.5, %v4218_v46 }
 0xbd8   :  { %v6788_v50 = vpop.eup %6787  ;;  %5237 = vst [vmem:[%s9102_s6 + $0x174] sm:$0xff] %v5763_v4  ;;  %v4712_v52 = vmul.f32 0.5, %v6786_v56  ;;  %v8814_v10 = vpop.f32.mrb[96].mxu0  ;;  %v4396_v44 = vmul.f32 0.5, %v4324_v19  ;;  %v4402_v30 = vmul.f32 0.5, %v4220_v2  ;;  %v5949_v42 = vadd.f32 %v8716_v47, %v8710_v39 }
 0xbd9   :  { %v6790_v3 = vpop.eup %6789  ;;  %v5766_v61 = vpack.c.bf16 %v4818_v11, %v4817_v24  ;;  %v4820_v8 = vadd.f32 0.5, %v4708_v1  ;;  %v4714_v18 = vmul.f32 0.5, %v6788_v50  ;;  %v8816_v58 = vpop.f32.mrb[224].mxu1  ;;  %6803 = vtanh.f32 %v4401_v12 }
 0xbda   :  { %v6792_v36 = vpop.eup %6791  ;;  %v4824_v59 = vadd.f32 0.5, %v4712_v52  ;;  %v4713_v60 = vmul.f32 0.5, %v6790_v3  ;;  %v8821_v23 = vpop.f32.mrb[97].mxu0  ;;  %v4222_v41 = vadd.f32 %v8722_v26, %v8499_v7  ;;  %6805 = vtanh.f32 %v4396_v44 }
 0xbdb   :  { %v6794_v22 = vpop.eup %6793  ;;  %5240 = vst [vmem:[%s9102_s6 + $0x188] sm:$0xff] %v5766_v61  ;;  %v5767_v37 = vpack.c.bf16 %v4820_v8, %v4819_v31  ;;  %v4826_v38 = vadd.f32 0.5, %v4714_v18  ;;  %v4715_v21 = vmul.f32 0.5, %v6792_v36  ;;  %v8823_v29 = vpop.f32.mrb[225].mxu1  ;;  %v4224_v11 = vadd.f32 %v8726_v53, %v8502_v17 }
 0xbdc   :  { %v4825_v14 = vadd.f32 0.5, %v4713_v60  ;;  %v4611_v9 = vmul.f32 0.5, %v6794_v22  ;;  %v8825_v55 = vpop.f32.mrb[98].mxu0  ;;  %v8827_v24 = vpop.f32.mrb[226].mxu1  ;;  %6807 = vtanh.f32 %v4402_v30  ;;  %v4329_v39 = vadd.f32 %v5949_v42, %v8505_v13 }
 0xbdd   :  { %5241 = vst [vmem:[%s9102_s6 + $0x190] sm:$0xff] %v5767_v37  ;;  %v4827_v40 = vadd.f32 0.5, %v4715_v21  ;;  %v8836_v4 = vpop.f32.mrb[99].mxu0  ;;  %v8838_v31 = vpop.f32.mrb[227].mxu1  ;;  %v4408_v47 = vmul.f32 0.5, %v4222_v41  ;;  %v4409_v26 = vmul.f32 0.5, %v4224_v11  ;;  %v5952_v5 = vadd.f32 %v8728_v62, %v8724_v54 }
 0xbde   :  { %v6796_v63 = vpop.eup %6795  ;;  %v5770_v0 = vpack.c.bf16 %v4825_v14, %v4824_v59  ;;  %v4723_v56 = vadd.f32 0.5, %v4611_v9  ;;  %v4228_v50 = vadd.f32 %v8744_v57, %v8499_v7  ;;  %v4403_v52 = vmul.f32 0.5, %v4329_v39 }
 0xbdf   :  { %v5771_v1 = vpack.c.bf16 %v4827_v40, %v4826_v38  ;;  %v4612_v16 = vmul.f32 0.5, %v6796_v63  ;;  %v4230_v46 = vadd.f32 %v8748_v6, %v8502_v17  ;;  %v5955_v2 = vadd.f32 %v8750_v43, %v8746_v25  ;;  %v6798_v3 = vpop.eup %6797 }
 0xbe0   :  { %5244 = vst [vmem:[%s9102_s6 + $0x1a4] sm:$0xff] %v5770_v0  ;;  %6809 = vtanh.f32 %v4408_v47  ;;  %v4332_v61 = vadd.f32 %v5952_v5, %v8505_v13  ;;  %v4415_v54 = vmul.f32 0.5, %v4228_v50  ;;  %v4232_v62 = vadd.f32 %v8757_v34, %v8499_v7  ;;  %v8860_v57 = vpop.f32.mrb[100].mxu0  ;;  %v8862_v8 = vpop.f32.mrb[228].mxu1 }
 0xbe1   :  { %5245 = vst [vmem:[%s9102_s6 + $0x1ac] sm:$0xff] %v5771_v1  ;;  %v4724_v53 = vadd.f32 0.5, %v4612_v16  ;;  %v6800_v18 = vpop.eup %6799  ;;  %v4618_v59 = vmul.f32 0.5, %v6798_v3  ;;  %6811 = vtanh.f32 %v4403_v52  ;;  %v4416_v6 = vmul.f32 0.5, %v4230_v46  ;;  %v8864_v60 = vpop.f32.mrb[101].mxu0 }
 0xbe2   :  { %v8866_v25 = vpop.f32.mrb[229].mxu1  ;;  %v6802_v43 = vpop.eup %6801  ;;  %v4613_v19 = vmul.f32 0.5, %v6800_v18  ;;  %6813 = vtanh.f32 %v4409_v26  ;;  %v4410_v22 = vmul.f32 0.5, %v4332_v61  ;;  %v4337_v37 = vadd.f32 %v5955_v2, %v8505_v13 }
 0xbe3   :  { %v5712_v36 = vpack.c.bf16 %v4724_v53, %v4723_v56  ;;  %v8869_v34 = vpop.f32.mrb[102].mxu0  ;;  %v8871_v38 = vpop.f32.mrb[230].mxu1  ;;  %v4730_v21 = vadd.f32 0.5, %v4618_v59  ;;  %v4619_v12 = vmul.f32 0.5, %v6802_v43  ;;  %6815 = vtanh.f32 %v4415_v54 }
 0xbe4   :  { %v4422_v14 = vmul.f32 0.5, %v4232_v62  ;;  %v8876_v9 = vpop.f32.mrb[103].mxu0  ;;  %v8878_v44 = vpop.f32.mrb[231].mxu1  ;;  %v4725_v30 = vadd.f32 0.5, %v4613_v19  ;;  %6817 = vtanh.f32 %v4410_v22  ;;  %v4417_v40 = vmul.f32 0.5, %v4337_v37 }
 0xbe5   :  { %5185 = vst [vmem:[%s9102_s6 + $0x10] sm:$0xff] %v5712_v36  ;;  %v4234_v42 = vadd.f32 %v8763_v45, %v8502_v17  ;;  %v6804_v41 = vpop.eup %6803  ;;  %v4731_v63 = vadd.f32 0.5, %v4619_v12  ;;  %6819 = vtanh.f32 %v4416_v6  ;;  %v5958_v0 = vadd.f32 %v8765_v49, %v8759_v33 }
 0xbe6   :  { %v4238_v56 = vadd.f32 %v8772_v20, %v8499_v7  ;;  %v6806_v11 = vpop.eup %6805  ;;  %v5713_v1 = vpack.c.bf16 %v4725_v30, %v4725_v30  ;;  %v4625_v16 = vmul.f32 0.5, %v6804_v41  ;;  %6821 = vtanh.f32 %v4417_v40 }
 0xbe7   :  { %v4423_v39 = vmul.f32 0.5, %v4234_v42  ;;  %v6808_v47 = vpop.eup %6807  ;;  %v5716_v26 = vpack.c.bf16 %v4731_v63, %v4730_v21  ;;  %v4620_v5 = vmul.f32 0.5, %v6806_v11  ;;  %6823 = vtanh.f32 %v4422_v14 }
 0xbe8   :  { %v4340_v45 = vadd.f32 %v5958_v0, %v8505_v13  ;;  %5187 = vst.msk [vmem:[%s9102_s6 + $0x18] sm:$0xf] %vm5186_vm5, %v5713_v1  ;;  %v4737_v33 = vadd.f32 0.5, %v4625_v16  ;;  %v4626_v49 = vmul.f32 0.5, %v6808_v47  ;;  %v4429_v20 = vmul.f32 0.5, %v4238_v56  ;;  %v8891_v50 = vpop.f32.mrb[104].mxu0 }
 0xbe9   :  { %6825 = vtanh.f32 %v4423_v39  ;;  %v8893_v53 = vpop.f32.mrb[232].mxu1  ;;  %5190 = vst [vmem:[%s9102_s6 + $0x2c] sm:$0xff] %v5716_v26  ;;  %v4732_v52 = vadd.f32 0.5, %v4620_v5  ;;  %v4240_v2 = vadd.f32 %v8783_v27, %v8502_v17  ;;  %v5961_v3 = vadd.f32 %v8785_v28, %v8774_v32  ;;  %v8902_v61 = vpop.f32.mrb[105].mxu0 }
 0xbea   :  { %v4424_v46 = vmul.f32 0.5, %v4340_v45  ;;  %v8904_v54 = vpop.f32.mrb[233].mxu1  ;;  %v6810_v62 = vpop.eup %6809  ;;  %v4738_v18 = vadd.f32 0.5, %v4626_v49  ;;  %6827 = vtanh.f32 %v4429_v20  ;;  %v4242_v36 = vadd.f32 %v8792_v15, %v8499_v7 }
 0xbeb   :  { %v4244_v59 = vadd.f32 %v8797_v35, %v8502_v17  ;;  %v8910_v6 = vpop.f32.mrb[106].mxu0  ;;  %v8912_v43 = vpop.f32.mrb[234].mxu1  ;;  %v5717_v19 = vpack.c.bf16 %v4732_v52, %v4732_v52  ;;  %v4632_v32 = vmul.f32 0.5, %v6810_v62  ;;  %v4430_v28 = vmul.f32 0.5, %v4240_v2 }
 0xbec   :  { %v6812_v27 = vpop.eup %6811  ;;  %6829 = vtanh.f32 %v4424_v46  ;;  %v8914_v22 = vpop.f32.mrb[107].mxu0  ;;  %v5720_v12 = vpack.c.bf16 %v4738_v18, %v4737_v33  ;;  %v4345_v15 = vadd.f32 %v5961_v3, %v8505_v13  ;;  %v4436_v30 = vmul.f32 0.5, %v4242_v36 }
 0xbed   :  { %v8916_v37 = vpop.f32.mrb[235].mxu1  ;;  %v6814_v21 = vpop.eup %6813  ;;  %v4627_v14 = vmul.f32 0.5, %v6812_v27  ;;  %5191 = vst.msk [vmem:[%s9102_s6 + $0x34] sm:$0xf] %vm5186_vm5, %v5717_v19  ;;  %v4744_v40 = vadd.f32 0.5, %v4632_v32  ;;  %6831 = vtanh.f32 %v4430_v28  ;;  %v4437_v41 = vmul.f32 0.5, %v4244_v59 }
 0xbee   :  { %v6816_v35 = vpop.eup %6815  ;;  %v4633_v42 = vmul.f32 0.5, %v6814_v21  ;;  %5194 = vst [vmem:[%s9102_s6 + $0x48] sm:$0xff] %v5720_v12  ;;  %v4431_v11 = vmul.f32 0.5, %v4345_v15  ;;  %6833 = vtanh.f32 %v4436_v30  ;;  %v5964_v47 = vadd.f32 %v8799_v48, %v8794_v51 }
 0xbef   :  { %v6818_v63 = vpop.eup %6817  ;;  %v4739_v0 = vadd.f32 0.5, %v4627_v14  ;;  %v4639_v56 = vmul.f32 0.5, %v6816_v35  ;;  %6835 = vtanh.f32 %v4437_v41  ;;  %v4248_v27 = vadd.f32 %v8814_v10, %v8499_v7 }
 0xbf0   :  { %v6820_v1 = vpop.eup %6819  ;;  %v4745_v16 = vadd.f32 0.5, %v4633_v42  ;;  %v4634_v39 = vmul.f32 0.5, %v6818_v63  ;;  %6837 = vtanh.f32 %v4431_v11  ;;  %v8928_v49 = vpop.f32.mrb[108].mxu0  ;;  %v4348_v62 = vadd.f32 %v5964_v47, %v8505_v13 }
 0xbf1   :  { %v6822_v26 = vpop.eup %6821  ;;  %v5721_v5 = vpack.c.bf16 %v4739_v0, %v4739_v0  ;;  %v4751_v45 = vadd.f32 0.5, %v4639_v56  ;;  %v4640_v33 = vmul.f32 0.5, %v6820_v1  ;;  %v8930_v20 = vpop.f32.mrb[236].mxu1  ;;  %v4250_v19 = vadd.f32 %v8821_v23, %v8502_v17 }
 0xbf2   :  { %v6824_v52 = vpop.eup %6823  ;;  %v5724_v46 = vpack.c.bf16 %v4745_v16, %v4744_v40  ;;  %v4746_v2 = vadd.f32 0.5, %v4634_v39  ;;  %v4641_v3 = vmul.f32 0.5, %v6822_v26  ;;  %v8933_v18 = vpop.f32.mrb[109].mxu0  ;;  %v4438_v15 = vmul.f32 0.5, %v4348_v62 }
 0xbf3   :  { %v8935_v36 = vpop.f32.mrb[237].mxu1  ;;  %v6826_v51 = vpop.eup %6825  ;;  %5195 = vst.msk [vmem:[%s9102_s6 + $0x50] sm:$0xf] %vm5186_vm5, %v5721_v5  ;;  %v4752_v48 = vadd.f32 0.5, %v4640_v33  ;;  %v4646_v59 = vmul.f32 0.5, %v6824_v52  ;;  %v4443_v23 = vmul.f32 0.5, %v4248_v27  ;;  %v5967_v16 = vadd.f32 %v8823_v29, %v8816_v58 }
 0xbf4   :  { %v8945_v32 = vpop.f32.mrb[110].mxu0  ;;  %v8947_v28 = vpop.f32.mrb[238].mxu1  ;;  %5198 = vst [vmem:[%s9102_s6 + $0x64] sm:$0xff] %v5724_v46  ;;  %v5725_v21 = vpack.c.bf16 %v4746_v2, %v4746_v2  ;;  %v4753_v12 = vadd.f32 0.5, %v4641_v3  ;;  %v4647_v14 = vmul.f32 0.5, %v6826_v51  ;;  %v4444_v41 = vmul.f32 0.5, %v4250_v19 }
 0xbf5   :  { %v8952_v30 = vpop.f32.mrb[111].mxu0  ;;  %v8954_v35 = vpop.f32.mrb[239].mxu1  ;;  %v5728_v40 = vpack.c.bf16 %v4752_v48, %v4751_v45  ;;  %v4758_v42 = vadd.f32 0.5, %v4646_v59  ;;  %6839 = vtanh.f32 %v4438_v15  ;;  %v4252_v39 = vadd.f32 %v8825_v55, %v8499_v7 }
 0xbf6   :  { %v6828_v10 = vpop.eup %6827  ;;  %5199 = vst.msk [vmem:[%s9102_s6 + $0x6c] sm:$0xf] %vm5186_vm5, %v5725_v21  ;;  %v5729_v0 = vpack.c.bf16 %v4753_v12, %v4753_v12  ;;  %v4759_v56 = vadd.f32 0.5, %v4647_v14  ;;  %6841 = vtanh.f32 %v4443_v23  ;;  %v4254_v45 = vadd.f32 %v8836_v4, %v8502_v17 }
 0xbf7   :  { %v6830_v63 = vpop.eup %6829  ;;  %v4653_v11 = vmul.f32 0.5, %v6828_v10  ;;  %5202 = vst [vmem:[%s9102_s6 + $0x80] sm:$0xff] %v5728_v40  ;;  %6843 = vtanh.f32 %v4444_v41  ;;  %v4353_v58 = vadd.f32 %v5967_v16, %v8505_v13  ;;  %v4450_v29 = vmul.f32 0.5, %v4252_v39 }
 0xbf8   :  { %v4648_v1 = vmul.f32 0.5, %v6830_v63  ;;  %v6832_v47 = vpop.eup %6831  ;;  %5203 = vst.msk [vmem:[%s9102_s6 + $0x88] sm:$0xf] %vm5186_vm5, %v5729_v0  ;;  %v5732_v26 = vpack.c.bf16 %v4759_v56, %v4758_v42  ;;  %v4451_v3 = vmul.f32 0.5, %v4254_v45  ;;  %v5970_v62 = vadd.f32 %v8838_v31, %v8827_v24 }
 0xbf9   :  { %v4765_v5 = vadd.f32 0.5, %v4653_v11  ;;  %v6834_v33 = vpop.eup %6833  ;;  %v4654_v46 = vmul.f32 0.5, %v6832_v47  ;;  %v4258_v51 = vadd.f32 %v8860_v57, %v8499_v7  ;;  %v4445_v19 = vmul.f32 0.5, %v4353_v58 }
 0xbfa   :  { %v4760_v52 = vadd.f32 0.5, %v4648_v1  ;;  %v6836_v2 = vpop.eup %6835  ;;  %5206 = vst [vmem:[%s9102_s6 + $0x9c] sm:$0xff] %v5732_v26  ;;  %v4660_v55 = vmul.f32 0.5, %v6834_v33  ;;  %6845 = vtanh.f32 %v4450_v29  ;;  %v4356_v14 = vadd.f32 %v5970_v62, %v8505_v13 }
 0xbfb   :  { %v6838_v4 = vpop.eup %6837  ;;  %v4766_v59 = vadd.f32 0.5, %v4654_v46  ;;  %v4661_v27 = vmul.f32 0.5, %v6836_v2  ;;  %6847 = vtanh.f32 %v4445_v19  ;;  %v4457_v31 = vmul.f32 0.5, %v4258_v51 }
 0xbfc   :  { %v5733_v48 = vpack.c.bf16 %v4760_v52, %v4760_v52  ;;  %v4655_v21 = vmul.f32 0.5, %v6838_v4  ;;  %v4772_v12 = vadd.f32 0.5, %v4660_v55  ;;  %6849 = vtanh.f32 %v4451_v3 }
 0xbfd   :  { %v5736_v15 = vpack.c.bf16 %v4766_v59, %v4765_v5  ;;  %v4773_v24 = vadd.f32 0.5, %v4661_v27  ;;  %v4452_v10 = vmul.f32 0.5, %v4356_v14  ;;  %v4260_v40 = vadd.f32 %v8864_v60, %v8502_v17 }
 0xbfe   :  { %5207 = vst.msk [vmem:[%s9102_s6 + $0xa4] sm:$0xf] %vm5186_vm5, %v5733_v48  ;;  %v4767_v57 = vadd.f32 0.5, %v4655_v21  ;;  %6851 = vtanh.f32 %v4457_v31  ;;  %v5973_v23 = vadd.f32 %v8866_v25, %v8862_v8  ;;  %v4262_v41 = vadd.f32 %v8869_v34, %v8499_v7 }
 0xbff   :  { %5210 = vst [vmem:[%s9102_s6 + $0xb8] sm:$0xff] %v5736_v15  ;;  %v5740_v42 = vpack.c.bf16 %v4773_v24, %v4772_v12  ;;  %v6840_v63 = vpop.eup %6839  ;;  %6853 = vtanh.f32 %v4452_v10  ;;  %v4458_v56 = vmul.f32 0.5, %v4260_v40  ;;  %v4264_v11 = vadd.f32 %v8876_v9, %v8502_v17 }
 0xc00   :  { %v5737_v0 = vpack.c.bf16 %v4767_v57, %v4767_v57  ;;  %v6842_v60 = vpop.eup %6841  ;;  %v4662_v1 = vmul.f32 0.5, %v6840_v63  ;;  %v4361_v16 = vadd.f32 %v5973_v23, %v8505_v13  ;;  %v4464_v39 = vmul.f32 0.5, %v4262_v41 }
 0xc01   :  { %5214 = vst [vmem:[%s9102_s6 + $0xd4] sm:$0xff] %v5740_v42  ;;  %v5976_v8 = vadd.f32 %v8878_v44, %v8871_v38  ;;  %v6844_v25 = vpop.eup %6843  ;;  %v4667_v34 = vmul.f32 0.5, %v6842_v60  ;;  %6855 = vtanh.f32 %v4458_v56  ;;  %v4465_v9 = vmul.f32 0.5, %v4264_v11 }
 0xc02   :  { %5211 = vst.msk [vmem:[%s9102_s6 + $0xc0] sm:$0xf] %vm5186_vm5, %v5737_v0  ;;  %v4268_v47 = vadd.f32 %v8891_v50, %v8499_v7  ;;  %v4774_v26 = vadd.f32 0.5, %v4662_v1  ;;  %v4668_v5 = vmul.f32 0.5, %v6844_v25  ;;  %v4459_v45 = vmul.f32 0.5, %v4361_v16 }
 0xc03   :  { %6857 = vtanh.f32 %v4464_v39  ;;  %v4779_v33 = vadd.f32 0.5, %v4667_v34  ;;  %v4364_v38 = vadd.f32 %v5976_v8, %v8505_v13  ;;  %v4270_v58 = vadd.f32 %v8902_v61, %v8502_v17 }
 0xc04   :  { %6859 = vtanh.f32 %v4465_v9  ;;  %v4471_v44 = vmul.f32 0.5, %v4268_v47  ;;  %v5741_v52 = vpack.c.bf16 %v4774_v26, %v4774_v26  ;;  %v4780_v46 = vadd.f32 0.5, %v4668_v5  ;;  %v6846_v29 = vpop.eup %6845 }
 0xc05   :  { %6861 = vtanh.f32 %v4459_v45  ;;  %v4466_v2 = vmul.f32 0.5, %v4364_v38  ;;  %v5979_v50 = vadd.f32 %v8904_v54, %v8893_v53  ;;  %v4272_v55 = vadd.f32 %v8910_v6, %v8499_v7  ;;  %v6848_v3 = vpop.eup %6847 }
 0xc06   :  { %6863 = vtanh.f32 %v4471_v44  ;;  %5215 = vst.msk [vmem:[%s9102_s6 + $0xdc] sm:$0xf] %vm5186_vm5, %v5741_v52  ;;  %v5744_v62 = vpack.c.bf16 %v4780_v46, %v4779_v33  ;;  %v4674_v51 = vmul.f32 0.5, %v6846_v29  ;;  %v4472_v4 = vmul.f32 0.5, %v4270_v58  ;;  %v6850_v48 = vpop.eup %6849 }
 0xc07   :  { %v4274_v61 = vadd.f32 %v8914_v22, %v8502_v17  ;;  %v4669_v59 = vmul.f32 0.5, %v6848_v3  ;;  %6865 = vtanh.f32 %v4466_v2  ;;  %v4369_v53 = vadd.f32 %v5979_v50, %v8505_v13 }
 0xc08   :  { %v4478_v54 = vmul.f32 0.5, %v4272_v55  ;;  %v6852_v27 = vpop.eup %6851  ;;  %5218 = vst [vmem:[%s9102_s6 + $0xf0] sm:$0xff] %v5744_v62  ;;  %v4786_v6 = vadd.f32 0.5, %v4674_v51  ;;  %v4675_v19 = vmul.f32 0.5, %v6850_v48  ;;  %6867 = vtanh.f32 %v4472_v4 }
 0xc09   :  { %v4479_v21 = vmul.f32 0.5, %v4274_v61  ;;  %v6854_v12 = vpop.eup %6853  ;;  %v4781_v14 = vadd.f32 0.5, %v4669_v59  ;;  %v4681_v15 = vmul.f32 0.5, %v6852_v27  ;;  %v4473_v24 = vmul.f32 0.5, %v4369_v53 }
 0xc0a   :  { %6869 = vtanh.f32 %v4478_v54  ;;  %v4787_v22 = vadd.f32 0.5, %v4675_v19  ;;  %v4676_v31 = vmul.f32 0.5, %v6854_v12  ;;  %v5982_v57 = vadd.f32 %v8916_v37, %v8912_v43 }
 0xc0b   :  { %6871 = vtanh.f32 %v4479_v21  ;;  %v6856_v10 = vpop.eup %6855  ;;  %v5745_v40 = vpack.c.bf16 %v4781_v14, %v4781_v14  ;;  %v4793_v42 = vadd.f32 0.5, %v4681_v15  ;;  %v4278_v23 = vadd.f32 %v8928_v49, %v8499_v7 }
 0xc0c   :  { %6873 = vtanh.f32 %v4473_v24  ;;  %v5748_v63 = vpack.c.bf16 %v4787_v22, %v4786_v6  ;;  %v4788_v0 = vadd.f32 0.5, %v4676_v31  ;;  %v4682_v56 = vmul.f32 0.5, %v6856_v10 }
 0xc0d   :  { %v6858_v41 = vpop.eup %6857  ;;  %v4372_v11 = vadd.f32 %v5982_v57, %v8505_v13  ;;  %5219 = vst.msk [vmem:[%s9102_s6 + $0xf8] sm:$0xf] %vm5186_vm5, %v5745_v40  ;;  %v4485_v37 = vmul.f32 0.5, %v4278_v23  ;;  %v4280_v1 = vadd.f32 %v8933_v18, %v8502_v17  ;;  %v5985_v49 = vadd.f32 %v8935_v36, %v8930_v20 }
 0xc0e   :  { %v6860_v60 = vpop.eup %6859  ;;  %v4688_v43 = vmul.f32 0.5, %v6858_v41  ;;  %5222 = vst [vmem:[%s9102_s6 + $0x10c] sm:$0xff] %v5748_v63  ;;  %v5749_v39 = vpack.c.bf16 %v4788_v0, %v4788_v0  ;;  %v4794_v8 = vadd.f32 0.5, %v4682_v56  ;;  %v4282_v44 = vadd.f32 %v8945_v32, %v8499_v7 }
 0xc0f   :  { %v6862_v16 = vpop.eup %6861  ;;  %v4689_v25 = vmul.f32 0.5, %v6860_v60  ;;  %v4480_v34 = vmul.f32 0.5, %v4372_v11  ;;  %6875 = vtanh.f32 %v4485_v37  ;;  %v4486_v5 = vmul.f32 0.5, %v4280_v1 }
 0xc10   :  { %v6864_v9 = vpop.eup %6863  ;;  %v4683_v47 = vmul.f32 0.5, %v6862_v16  ;;  %v4800_v26 = vadd.f32 0.5, %v4688_v43  ;;  %5223 = vst.msk [vmem:[%s9102_s6 + $0x114] sm:$0xf] %vm5186_vm5, %v5749_v39  ;;  %v5752_v20 = vpack.c.bf16 %v4794_v8, %v4793_v42  ;;  %v4377_v38 = vadd.f32 %v5985_v49, %v8505_v13 }
 0xc11   :  { %v4801_v18 = vadd.f32 0.5, %v4689_v25  ;;  %v4695_v36 = vmul.f32 0.5, %v6864_v9  ;;  %6877 = vtanh.f32 %v4480_v34  ;;  %v6866_v45 = vpop.eup %6865  ;;  %v4284_v2 = vadd.f32 %v8952_v30, %v8502_v17 }
 0xc12   :  { %v4795_v33 = vadd.f32 0.5, %v4683_v47  ;;  %6879 = vtanh.f32 %v4486_v5  ;;  %v6868_v52 = vpop.eup %6867  ;;  %5226 = vst [vmem:[%s9102_s6 + $0x128] sm:$0xff] %v5752_v20  ;;  %v4690_v58 = vmul.f32 0.5, %v6866_v45  ;;  %v4487_v62 = vmul.f32 0.5, %v4377_v38 }
 0xc13   :  { %v5756_v46 = vpack.c.bf16 %v4801_v18, %v4800_v26  ;;  %v4807_v29 = vadd.f32 0.5, %v4695_v36  ;;  %v4696_v3 = vmul.f32 0.5, %v6868_v52  ;;  %v4492_v51 = vmul.f32 0.5, %v4282_v44 }
 0xc14   :  { %v6870_v50 = vpop.eup %6869  ;;  %v5753_v55 = vpack.c.bf16 %v4795_v33, %v4795_v33  ;;  %v4802_v7 = vadd.f32 0.5, %v4690_v58  ;;  %v4493_v61 = vmul.f32 0.5, %v4284_v2  ;;  %v5988_v48 = vadd.f32 %v8954_v35, %v8947_v28 }
 0xc15   :  { %v6872_v4 = vpop.eup %6871  ;;  %5230 = vst [vmem:[%s9102_s6 + $0x144] sm:$0xff] %v5756_v46  ;;  %v4702_v32 = vmul.f32 0.5, %v6870_v50  ;;  %v4808_v17 = vadd.f32 0.5, %v4696_v3  ;;  %6881 = vtanh.f32 %v4487_v62 }
 0xc16   :  { %v6874_v59 = vpop.eup %6873  ;;  %5227 = vst.msk [vmem:[%s9102_s6 + $0x130] sm:$0xf] %vm5186_vm5, %v5753_v55  ;;  %v4703_v30 = vmul.f32 0.5, %v6872_v4  ;;  %v5757_v53 = vpack.c.bf16 %v4802_v7, %v4802_v7  ;;  %6883 = vtanh.f32 %v4492_v51  ;;  %v4380_v21 = vadd.f32 %v5988_v48, %v8505_v13 }
 0xc17   :  { %v4697_v54 = vmul.f32 0.5, %v6874_v59  ;;  %v4814_v27 = vadd.f32 0.5, %v4702_v32  ;;  %v5760_v6 = vpack.c.bf16 %v4808_v17, %v4807_v29  ;;  %6885 = vtanh.f32 %v4493_v61 }
 0xc18   :  { %v4815_v19 = vadd.f32 0.5, %v4703_v30  ;;  %5231 = vst.msk [vmem:[%s9102_s6 + $0x14c] sm:$0xf] %vm5186_vm5, %v5757_v53  ;;  %v4494_v14 = vmul.f32 0.5, %v4380_v21 }
 0xc19   :  { %v4809_v28 = vadd.f32 0.5, %v4697_v54  ;;  %v6876_v35 = vpop.eup %6875  ;;  %5234 = vst [vmem:[%s9102_s6 + $0x160] sm:$0xff] %v5760_v6 }
 0xc1a   :  { %v5764_v12 = vpack.c.bf16 %v4815_v19, %v4814_v27  ;;  %v4709_v22 = vmul.f32 0.5, %v6876_v35  ;;  %6887 = vtanh.f32 %v4494_v14 }
 0xc1b   :  { %v6878_v15 = vpop.eup %6877  ;;  %v5761_v24 = vpack.c.bf16 %v4809_v28, %v4809_v28 }
 0xc1c   :  { %v6880_v31 = vpop.eup %6879  ;;  %5238 = vst [vmem:[%s9102_s6 + $0x17c] sm:$0xff] %v5764_v12  ;;  %v4704_v13 = vmul.f32 0.5, %v6878_v15  ;;  %v4821_v57 = vadd.f32 0.5, %v4709_v22 }
 0xc1d   :  { %5235 = vst.msk [vmem:[%s9102_s6 + $0x168] sm:$0xf] %vm5186_vm5, %v5761_v24  ;;  %v4710_v10 = vmul.f32 0.5, %v6880_v31 }
 0xc1e   :  { %v4816_v40 = vadd.f32 0.5, %v4704_v13 }
 0xc1f   :  { %v4822_v42 = vadd.f32 0.5, %v4710_v10  ;;  %v6882_v23 = vpop.eup %6881 }
 0xc20   :  { %v5765_v41 = vpack.c.bf16 %v4816_v40, %v4816_v40  ;;  %v6884_v63 = vpop.eup %6883  ;;  %v4711_v56 = vmul.f32 0.5, %v6882_v23 }
 0xc21   :  { %v5768_v0 = vpack.c.bf16 %v4822_v42, %v4821_v57  ;;  %v6886_v11 = vpop.eup %6885  ;;  %v4716_v60 = vmul.f32 0.5, %v6884_v63 }
 0xc22   :  { %5239 = vst.msk [vmem:[%s9102_s6 + $0x184] sm:$0xf] %vm5186_vm5, %v5765_v41  ;;  %v4823_v43 = vadd.f32 0.5, %v4711_v56  ;;  %v4717_v37 = vmul.f32 0.5, %v6886_v11 }
 0xc23   :  { %5242 = vst [vmem:[%s9102_s6 + $0x198] sm:$0xff] %v5768_v0  ;;  %v4828_v1 = vadd.f32 0.5, %v4716_v60 }
 0xc24   :  { %v5769_v49 = vpack.c.bf16 %v4823_v43, %v4823_v43  ;;  %v4829_v16 = vadd.f32 0.5, %v4717_v37  ;;  %v6888_v39 = vpop.eup %6887 }
 0xc25   :  { %v4718_v25 = vmul.f32 0.5, %v6888_v39 }
 0xc26   :  { %5243 = vst.msk [vmem:[%s9102_s6 + $0x1a0] sm:$0xf] %vm5186_vm5, %v5769_v49  ;;  %v5772_v8 = vpack.c.bf16 %v4829_v16, %v4828_v1 }
 0xc27   :  { %v4830_v34 = vadd.f32 0.5, %v4718_v25 }
 0xc28   :  { %5246 = vst [vmem:[%s9102_s6 + $0x1b4] sm:$0xff] %v5772_v8 }
 0xc29   :  { %v5773_v9 = vpack.c.bf16 %v4830_v34, %v4830_v34 }
 0xc2b   :  { %5247 = vst.msk [vmem:[%s9102_s6 + $0x1bc] sm:$0xf] %vm5186_vm5, %v5773_v9 }
 0xc2c   :  { %5256 = vsyncpa [#allocation3], 1 }

</bundles_post_ra>
